<compile_context>
chip_gen: v5e
topology: v5e:2x2
jax: 0.10.0
libtpu: 0.0.40
codegen_flags: <defaults>
</compile_context>

<pallas_src>
import functools

import jax
import jax.numpy as jnp
from jax.experimental import pallas as pl
from jax.experimental.pallas import tpu as pltpu


# --------------------------------------------------------------------------
# helpers
# --------------------------------------------------------------------------
def _round_up(n, m):
    return ((n + m - 1) // m) * m


def _pad2(a, rows, cols):
    return jnp.pad(a, ((0, rows - a.shape[0]), (0, cols - a.shape[1])))


# --------------------------------------------------------------------------
# Fused GCKAN layer kernel (grid over edge tiles)
# --------------------------------------------------------------------------
def gckan_kernel(row_ref, col_ref, ea_ref, x_ref, wn_ref, bn_ref, we_ref,
                 be_ref, wb_ref, wsp_ref, out_ref, xt_ref, agg_ref,
                 *, grid_size, spline_order):
    f32 = jnp.float32
    bf16 = jnp.bfloat16
    e = pl.program_id(0)
    num_e = pl.num_programs(0)

    n_pad = xt_ref.shape[0]
    te = ea_ref.shape[0]

    # ---- first edge tile: node transform + zero the accumulator ----
    @pl.when(e == 0)
    def _init():
        xt_ref[...] = (jnp.dot(x_ref[...], wn_ref[...],
                               preferred_element_type=f32) + bn_ref[...])
        agg_ref[...] = jnp.zeros_like(agg_ref)

    # ---- edge transform for this tile (MXU, f32) ----
    ea_t = jnp.dot(ea_ref[...], we_ref[...],
                   preferred_element_type=f32) + be_ref[...]      # (TE, out)

    # ---- gather x_t[row], message multiply, scatter-add over col ----
    # One-hot matrices are exact 0/1 -> lossless in bf16; accumulation is f32.
    row = row_ref[...]                                            # (1, TE) i32
    col = col_ref[...]                                            # (1, TE) i32
    iota_n = jax.lax.broadcasted_iota(jnp.int32, (n_pad, te), 0)
    g_oh = (iota_n == row).astype(bf16)                           # (N, TE)
    s_oh = (iota_n == col).astype(bf16)                           # (N, TE)

    # gathered[t, :] = x_t[row[t], :]   (contract over node axis)
    gathered = jax.lax.dot_general(
        g_oh, xt_ref[...].astype(bf16),
        dimension_numbers=(((0,), (0,)), ((), ())),
        preferred_element_type=f32)                               # (TE, out)
    msg = (ea_t * gathered).astype(bf16)                          # (TE, out)
    # agg[n, :] += sum_{t : col[t]==n} msg[t, :]   (torch index_add_)
    agg_ref[...] += jnp.dot(s_oh, msg, preferred_element_type=f32)

    # ---- last edge tile: efficient-kan KANLinear(out, out) ----
    @pl.when(e == num_e - 1)
    def _finalize():
        a = agg_ref[...]                                          # (N, out) f32
        # base path: SiLU(a) @ Wb
        base = jnp.dot(a * jax.nn.sigmoid(a), wb_ref[...],
                       preferred_element_type=f32)

        # B-spline path: uniform grid -> knots & reciprocals are constants.
        h = 2.0 / grid_size
        npts = grid_size + 2 * spline_order + 1
        knots = [-1.0 + (j - spline_order) * h for j in range(npts)]

        bases = [jnp.where((a >= knots[j]) & (a < knots[j + 1]), 1.0, 0.0)
                 for j in range(npts - 1)]
        for k in range(1, spline_order + 1):
            inv = 1.0 / (k * h)                       # constant denominator
            bases = [((a - knots[j]) * inv) * bases[j]
                     + ((knots[j + k + 1] - a) * inv) * bases[j + 1]
                     for j in range(len(bases) - 1)]
        # len(bases) == grid_size + spline_order == nbasis

        # single fused spline matmul: (N, nbasis*out) @ (nbasis*out, out)
        b_cat = jnp.concatenate(bases, axis=1)
        spline = jnp.dot(b_cat, wsp_ref[...], preferred_element_type=f32)

        out_ref[...] = base + spline


# --------------------------------------------------------------------------
# Wrapper: one pallas_call per GCKAN layer
# --------------------------------------------------------------------------
def gckan_layer(x_pad, row_p, col_p, ea_p, p, *, grid_size, spline_order, te):
    n_pad, fin_pad = x_pad.shape
    out_pad = p["wn"].shape[1]
    e_pad, edge_dim = ea_p.shape
    nbp = p["wsp"].shape[0]                     # nbasis * out_pad
    n_tiles = e_pad // te
    nbasis = grid_size + spline_order

    kernel = functools.partial(gckan_kernel, grid_size=grid_size,
                               spline_order=spline_order)

    flops = int(2 * e_pad * edge_dim * out_pad          # edge transform
                + 2 * n_pad * fin_pad * out_pad         # node transform
                + 4 * n_pad * e_pad * out_pad           # gather + scatter
                + 2 * n_pad * out_pad * out_pad * (1 + nbasis))  # KAN tail
    bytes_accessed = int(4 * (x_pad.size + ea_p.size + row_p.size + col_p.size
                              + p["wn"].size + p["bn"].size + p["we"].size
                              + p["be"].size + p["wb"].size + p["wsp"].size
                              + n_pad * out_pad))

    return pl.pallas_call(
        kernel,
        out_shape=jax.ShapeDtypeStruct((n_pad, out_pad), jnp.float32),
        grid_spec=pltpu.PrefetchScalarGridSpec(
            num_scalar_prefetch=0,
            grid=(n_tiles,),
            in_specs=[
                pl.BlockSpec((1, te), lambda e: (0, e)),              # row idx
                pl.BlockSpec((1, te), lambda e: (0, e)),              # col idx
                pl.BlockSpec((te, edge_dim), lambda e: (e, 0)),       # edge_attr
                pl.BlockSpec((n_pad, fin_pad), lambda e: (0, 0)),     # x (resident)
                pl.BlockSpec((fin_pad, out_pad), lambda e: (0, 0)),   # wn
                pl.BlockSpec((1, out_pad), lambda e: (0, 0)),         # bn
                pl.BlockSpec((edge_dim, out_pad), lambda e: (0, 0)),  # we
                pl.BlockSpec((1, out_pad), lambda e: (0, 0)),         # be
                pl.BlockSpec((out_pad, out_pad), lambda e: (0, 0)),   # wb
                pl.BlockSpec((nbp, out_pad), lambda e: (0, 0)),       # wsp (fused)
            ],
            out_specs=pl.BlockSpec((n_pad, out_pad), lambda e: (0, 0)),
            scratch_shapes=[pltpu.VMEM((n_pad, out_pad), jnp.float32),   # x_t
                            pltpu.VMEM((n_pad, out_pad), jnp.float32)],  # agg
        ),
        compiler_params=pltpu.CompilerParams(
            dimension_semantics=("arbitrary",),
            vmem_limit_bytes=64 * 1024 * 1024),
        cost_estimate=pl.CostEstimate(flops=flops,
                                      transcendentals=int(n_pad * out_pad),
                                      bytes_accessed=bytes_accessed),
    )(row_p, col_p, ea_p, x_pad, p["wn"], p["bn"], p["we"], p["be"],
      p["wb"], p["wsp"])


# --------------------------------------------------------------------------
# Deterministic parameter initialization (padded, lane-dense layouts)
# --------------------------------------------------------------------------
def init_gckan_params(key, in_feat, out_feat, grid_size=4, spline_order=3,
                      edge_dim=384, lane=128):
    ks = jax.random.split(key, 7)
    f32 = jnp.float32
    in_pad = _round_up(in_feat, lane)
    out_pad = _round_up(out_feat, lane)

    # nn.Linear weights, pre-transposed to (in, out)
    wn = jax.random.normal(ks[0], (in_feat, out_feat), f32) / jnp.sqrt(in_feat)
    bn = 0.01 * jax.random.normal(ks[1], (1, out_feat), f32)
    we = jax.random.normal(ks[2], (edge_dim, out_feat), f32) / jnp.sqrt(edge_dim)
    be = 0.01 * jax.random.normal(ks[3], (1, out_feat), f32)
    # KANLinear(out_feat, out_feat): base_weight (out,in) -> (in,out)
    wb = jax.random.normal(ks[4], (out_feat, out_feat), f32) / jnp.sqrt(out_feat)
    nbasis = grid_size + spline_order
    spline_w = 0.1 * jax.random.normal(ks[5], (out_feat, out_feat, nbasis), f32)
    spline_scaler = (jax.random.normal(ks[6], (out_feat, out_feat), f32)
                     / jnp.sqrt(out_feat))
    scaled = spline_w * spline_scaler[..., None]          # (out, in_kan, nbasis)
    wsp = jnp.transpose(scaled, (2, 1, 0))                # (nbasis, in_kan, out)

    # zero-pad feature dims to lane multiples (padding is exact: zero weights)
    wn_p = _pad2(wn, in_pad, out_pad)
    bn_p = _pad2(bn, 1, out_pad)
    we_p = _pad2(we, edge_dim, out_pad)
    be_p = _pad2(be, 1, out_pad)
    wb_p = _pad2(wb, out_pad, out_pad)
    wsp_p = jnp.zeros((nbasis, out_pad, out_pad), f32)
    wsp_p = wsp_p.at[:, :out_feat, :out_feat].set(wsp)
    wsp_cat = wsp_p.reshape(nbasis * out_pad, out_pad)    # fused spline weight

    return dict(wn=wn_p, bn=bn_p, we=we_p, be=be_p, wb=wb_p, wsp=wsp_cat)


# --------------------------------------------------------------------------
# GKAN_Nodes forward (glue / padding in plain JAX; hot path in Pallas)
# --------------------------------------------------------------------------
def gkan_nodes_forward(x, edge_index, edge_attr, conv_params, conv_out_params,
                       *, hidden_channels, num_classes, skip=True,
                       grid_size=4, spline_order=3, te=128):
    n = x.shape[0]
    e = edge_attr.shape[0]
    n_pad = _round_up(max(n, 8), 8)
    e_pad = _round_up(e, te)

    row = edge_index[0].astype(jnp.int32)
    col = edge_index[1].astype(jnp.int32)
    # sentinel index (== n_pad) for padded edges: matches no node, so padded
    # edges contribute nothing to gather/scatter.
    fill = jnp.full((e_pad - e,), n_pad, jnp.int32)
    row_p = jnp.concatenate([row, fill]).reshape(1, e_pad)
    col_p = jnp.concatenate([col, fill]).reshape(1, e_pad)
    ea_p = jnp.pad(edge_attr.astype(jnp.float32), ((0, e_pad - e), (0, 0)))

    def run_layer(h, p, out_feat):
        fin_pad = p["wn"].shape[0]
        h_pad = _pad2(h.astype(jnp.float32), n_pad, fin_pad)
        o_pad = gckan_layer(h_pad, row_p, col_p, ea_p, p,
                            grid_size=grid_size, spline_order=spline_order,
                            te=te)
        return o_pad[:n, :out_feat]

    feats = [x.astype(jnp.float32)]
    h = x
    for p in conv_params:
        h = run_layer(h, p, hidden_channels)
        # self.dropout has p=0.0 -> identity at inference
        feats.append(h)
    if skip:
        h = jnp.concatenate(feats, axis=1)
    return run_layer(h, conv_out_params, num_classes)


# --------------------------------------------------------------------------
if __name__ == "__main__":
    # small, module-consistent shapes (multiple edge tiles to exercise the
    # resident-accumulator / pipelined reduction path)
    N = 16              # nodes
    E = 200             # edges  -> 2 edge tiles of 128 (padded)
    num_features = 8
    hidden_channels = 16
    num_classes = 4
    mp_layers = 2
    grid_size, spline_order = 4, 3
    edge_dim = 384      # fixed by nn.Linear(384, out_feat)
    TE = 128            # edge tile size (lane-aligned)

    key = jax.random.PRNGKey(0)
    kx, ke, ki, kp1, kp2 = jax.random.split(key, 5)

    x = jax.random.normal(kx, (N, num_features), jnp.float32)
    edge_attr = jax.random.normal(ke, (E, edge_dim), jnp.float32)
    edge_index = jax.random.randint(ki, (2, E), 0, N, dtype=jnp.int32)

    # convs: mp_layers - 1 GCKAN layers (first takes num_features)
    conv_params = [init_gckan_params(kp1, num_features, hidden_channels,
                                     grid_size, spline_order, edge_dim)]
    # skip=True -> conv_out input dim = num_features + (mp_layers-1)*hidden
    dim_out_mp = num_features + (mp_layers - 1) * hidden_channels
    conv_out_params = init_gckan_params(kp2, dim_out_mp, num_classes,
                                        grid_size, spline_order, edge_dim)

    fwd = jax.jit(functools.partial(
        gkan_nodes_forward,
        hidden_channels=hidden_channels, num_classes=num_classes,
        skip=True, grid_size=grid_size, spline_order=spline_order, te=TE))

    out = fwd(x, edge_index, edge_attr, conv_params, conv_out_params)
    out = jax.block_until_ready(out)
    assert out.shape == (N, num_classes), out.shape
    assert bool(jnp.all(jnp.isfinite(out)))
    print("KERNEL_OK")
</pallas_src>

<mosaic_0001>
module attributes {stable_mosaic.version = 11 : i64} {
  func.func @gckan_kernel(%arg0: i32, %arg1: memref<1x128xi32, #tpu.memory_space<vmem>>, %arg2: memref<1x128xi32, #tpu.memory_space<vmem>>, %arg3: memref<128x384xf32, #tpu.memory_space<vmem>>, %arg4: memref<16x128xf32, #tpu.memory_space<vmem>>, %arg5: memref<128x128xf32, #tpu.memory_space<vmem>>, %arg6: memref<1x128xf32, #tpu.memory_space<vmem>>, %arg7: memref<384x128xf32, #tpu.memory_space<vmem>>, %arg8: memref<1x128xf32, #tpu.memory_space<vmem>>, %arg9: memref<128x128xf32, #tpu.memory_space<vmem>>, %arg10: memref<896x128xf32, #tpu.memory_space<vmem>>, %arg11: memref<16x128xf32, #tpu.memory_space<vmem>>, %arg12: memref<16x128xf32, #tpu.memory_space<vmem>>, %arg13: memref<16x128xf32, #tpu.memory_space<vmem>>) attributes {dimension_semantics = [#tpu.dimension_semantics<arbitrary>], iteration_bounds = array<i64: 2>, scalar_prefetch = 0 : i64, scratch_operands = 2 : i64, tpu.core_type = #tpu.core_type<tc>, window_params = [{transform_indices = @transform_0, window_bounds = array<i64: 1, 128>}, {transform_indices = @transform_1, window_bounds = array<i64: 1, 128>}, {transform_indices = @transform_2, window_bounds = array<i64: 128, 384>}, {pipeline_mode = #tpu.pipeline_mode<synchronous>, transform_indices = @transform_3, window_bounds = array<i64: 16, 128>}, {pipeline_mode = #tpu.pipeline_mode<synchronous>, transform_indices = @transform_4, window_bounds = array<i64: 128, 128>}, {pipeline_mode = #tpu.pipeline_mode<synchronous>, transform_indices = @transform_5, window_bounds = array<i64: 1, 128>}, {pipeline_mode = #tpu.pipeline_mode<synchronous>, transform_indices = @transform_6, window_bounds = array<i64: 384, 128>}, {pipeline_mode = #tpu.pipeline_mode<synchronous>, transform_indices = @transform_7, window_bounds = array<i64: 1, 128>}, {pipeline_mode = #tpu.pipeline_mode<synchronous>, transform_indices = @transform_8, window_bounds = array<i64: 128, 128>}, {pipeline_mode = #tpu.pipeline_mode<synchronous>, transform_indices = @transform_9, window_bounds = array<i64: 896, 128>}, {pipeline_mode = #tpu.pipeline_mode<synchronous>, transform_indices = @transform_10, window_bounds = array<i64: 16, 128>}]} {
    %c0_i32 = arith.constant 0 : i32
    %0 = arith.cmpi eq, %arg0, %c0_i32 : i32
    %1 = arith.extui %0 : i1 to i32
    %c0_i32_0 = arith.constant 0 : i32
    %2 = arith.cmpi ne, %1, %c0_i32_0 : i32
    scf.if %2 {
      %c0_19 = arith.constant 0 : index
      %c0_20 = arith.constant 0 : index
      %34 = vector.load %arg4[%c0_19, %c0_20] : memref<16x128xf32, #tpu.memory_space<vmem>>, vector<16x128xf32>
      %c0_21 = arith.constant 0 : index
      %c0_22 = arith.constant 0 : index
      %35 = vector.load %arg5[%c0_21, %c0_22] : memref<128x128xf32, #tpu.memory_space<vmem>>, vector<128x128xf32>
      %cst_23 = arith.constant dense<0.000000e+00> : vector<16x128xf32>
      %36 = tpu.matmul %34, %35, %cst_23 {dimension_numbers = #tpu.dot_dimension_numbers<[1], [0], [0], [1], [0, 0, 1, 1], [], []>} : vector<16x128xf32>, vector<128x128xf32>, vector<16x128xf32> -> vector<16x128xf32>
      %c0_24 = arith.constant 0 : index
      %c0_25 = arith.constant 0 : index
      %37 = vector.load %arg6[%c0_24, %c0_25] : memref<1x128xf32, #tpu.memory_space<vmem>>, vector<1x128xf32>
      %38 = vector.broadcast %37 : vector<1x128xf32> to vector<16x128xf32>
      %39 = arith.addf %36, %38 : vector<16x128xf32>
      %c0_26 = arith.constant 0 : index
      %c0_27 = arith.constant 0 : index
      %40 = vector.load %arg12[%c0_26, %c0_27] : memref<16x128xf32, #tpu.memory_space<vmem>>, vector<16x128xf32>
      tpu.vector_store %arg12[%c0_26, %c0_27], %39 {strides = array<i32>} : memref<16x128xf32, #tpu.memory_space<vmem>>, vector<16x128xf32>,
      %cst_28 = arith.constant 0.000000e+00 : f32
      %41 = vector.broadcast %cst_28 : f32 to vector<16x128xf32>
      %c0_29 = arith.constant 0 : index
      %c0_30 = arith.constant 0 : index
      %42 = vector.load %arg13[%c0_29, %c0_30] : memref<16x128xf32, #tpu.memory_space<vmem>>, vector<16x128xf32>
      tpu.vector_store %arg13[%c0_29, %c0_30], %41 {strides = array<i32>} : memref<16x128xf32, #tpu.memory_space<vmem>>, vector<16x128xf32>,
    } else {
    }
    %c0 = arith.constant 0 : index
    %c0_1 = arith.constant 0 : index
    %3 = vector.load %arg3[%c0, %c0_1] : memref<128x384xf32, #tpu.memory_space<vmem>>, vector<128x384xf32>
    %c0_2 = arith.constant 0 : index
    %c0_3 = arith.constant 0 : index
    %4 = vector.load %arg7[%c0_2, %c0_3] : memref<384x128xf32, #tpu.memory_space<vmem>>, vector<384x128xf32>
    %cst = arith.constant dense<0.000000e+00> : vector<128x128xf32>
    %5 = tpu.matmul %3, %4, %cst {dimension_numbers = #tpu.dot_dimension_numbers<[1], [0], [0], [1], [0, 0, 1, 1], [], []>} : vector<128x384xf32>, vector<384x128xf32>, vector<128x128xf32> -> vector<128x128xf32>
    %c0_4 = arith.constant 0 : index
    %c0_5 = arith.constant 0 : index
    %6 = vector.load %arg8[%c0_4, %c0_5] : memref<1x128xf32, #tpu.memory_space<vmem>>, vector<1x128xf32>
    %7 = vector.broadcast %6 : vector<1x128xf32> to vector<128x128xf32>
    %8 = arith.addf %5, %7 : vector<128x128xf32>
    %c0_6 = arith.constant 0 : index
    %c0_7 = arith.constant 0 : index
    %9 = vector.load %arg1[%c0_6, %c0_7] : memref<1x128xi32, #tpu.memory_space<vmem>>, vector<1x128xi32>
    %c0_8 = arith.constant 0 : index
    %c0_9 = arith.constant 0 : index
    %10 = vector.load %arg2[%c0_8, %c0_9] : memref<1x128xi32, #tpu.memory_space<vmem>>, vector<1x128xi32>
    %11 = tpu.iota {dimensions = array<i32: 0>} : vector<16x128xi32>
    %12 = vector.broadcast %9 : vector<1x128xi32> to vector<16x128xi32>
    %13 = arith.cmpi eq, %11, %12 : vector<16x128xi32>
    %14 = arith.extui %13 : vector<16x128xi1> to vector<16x128xi32>
    %15 = arith.sitofp %14 : vector<16x128xi32> to vector<16x128xf32>
    %16 = arith.truncf %15 : vector<16x128xf32> to vector<16x128xbf16>
    %17 = vector.broadcast %10 : vector<1x128xi32> to vector<16x128xi32>
    %18 = arith.cmpi eq, %11, %17 : vector<16x128xi32>
    %19 = arith.extui %18 : vector<16x128xi1> to vector<16x128xi32>
    %20 = arith.sitofp %19 : vector<16x128xi32> to vector<16x128xf32>
    %21 = arith.truncf %20 : vector<16x128xf32> to vector<16x128xbf16>
    %c0_10 = arith.constant 0 : index
    %c0_11 = arith.constant 0 : index
    %22 = vector.load %arg12[%c0_10, %c0_11] : memref<16x128xf32, #tpu.memory_space<vmem>>, vector<16x128xf32>
    %23 = arith.truncf %22 : vector<16x128xf32> to vector<16x128xbf16>
    %cst_12 = arith.constant dense<0.000000e+00> : vector<128x128xf32>
    %24 = tpu.matmul %16, %23, %cst_12 {dimension_numbers = #tpu.dot_dimension_numbers<[0], [0], [1], [1], [0, 1, 1, 1], [], []>} : vector<16x128xbf16>, vector<16x128xbf16>, vector<128x128xf32> -> vector<128x128xf32>
    %25 = arith.mulf %8, %24 : vector<128x128xf32>
    %26 = arith.truncf %25 : vector<128x128xf32> to vector<128x128xbf16>
    %c0_13 = arith.constant 0 : index
    %c0_14 = arith.constant 0 : index
    %27 = vector.load %arg13[%c0_13, %c0_14] : memref<16x128xf32, #tpu.memory_space<vmem>>, vector<16x128xf32>
    %cst_15 = arith.constant dense<0.000000e+00> : vector<16x128xf32>
    %28 = tpu.matmul %21, %26, %cst_15 {dimension_numbers = #tpu.dot_dimension_numbers<[1], [0], [0], [1], [0, 0, 1, 1], [], []>} : vector<16x128xbf16>, vector<128x128xbf16>, vector<16x128xf32> -> vector<16x128xf32>
    %29 = arith.addf %27, %28 : vector<16x128xf32>
    %c0_16 = arith.constant 0 : index
    %c0_17 = arith.constant 0 : index
    %30 = vector.load %arg13[%c0_16, %c0_17] : memref<16x128xf32, #tpu.memory_space<vmem>>, vector<16x128xf32>
    tpu.vector_store %arg13[%c0_16, %c0_17], %29 {strides = array<i32>} : memref<16x128xf32, #tpu.memory_space<vmem>>, vector<16x128xf32>,
    %c1_i32 = arith.constant 1 : i32
    %31 = arith.cmpi eq, %arg0, %c1_i32 : i32
    %32 = arith.extui %31 : i1 to i32
    %c0_i32_18 = arith.constant 0 : i32
    %33 = arith.cmpi ne, %32, %c0_i32_18 : i32
    scf.if %33 {
      %c0_19 = arith.constant 0 : index
      %c0_20 = arith.constant 0 : index
      %34 = vector.load %arg13[%c0_19, %c0_20] : memref<16x128xf32, #tpu.memory_space<vmem>>, vector<16x128xf32>
      %35 = arith.negf %34 : vector<16x128xf32>
      %36 = math.exp %35 : vector<16x128xf32>
      %cst_21 = arith.constant 1.000000e+00 : f32
      %37 = vector.broadcast %cst_21 : f32 to vector<16x128xf32>
      %38 = arith.addf %37, %36 : vector<16x128xf32>
      %39 = arith.divf %37, %38 : vector<16x128xf32>
      %40 = arith.mulf %34, %39 : vector<16x128xf32>
      %c0_22 = arith.constant 0 : index
      %c0_23 = arith.constant 0 : index
      %41 = vector.load %arg9[%c0_22, %c0_23] : memref<128x128xf32, #tpu.memory_space<vmem>>, vector<128x128xf32>
      %cst_24 = arith.constant dense<0.000000e+00> : vector<16x128xf32>
      %42 = tpu.matmul %40, %41, %cst_24 {dimension_numbers = #tpu.dot_dimension_numbers<[1], [0], [0], [1], [0, 0, 1, 1], [], []>} : vector<16x128xf32>, vector<128x128xf32>, vector<16x128xf32> -> vector<16x128xf32>
      %cst_25 = arith.constant -2.500000e+00 : f32
      %43 = vector.broadcast %cst_25 : f32 to vector<16x128xf32>
      %44 = arith.cmpf oge, %34, %43 : vector<16x128xf32>
      %cst_26 = arith.constant -2.000000e+00 : f32
      %45 = vector.broadcast %cst_26 : f32 to vector<16x128xf32>
      %46 = arith.cmpf olt, %34, %45 : vector<16x128xf32>
      %47 = arith.andi %44, %46 : vector<16x128xi1>
      %cst_27 = arith.constant 1.000000e+00 : f32
      %cst_28 = arith.constant 0.000000e+00 : f32
      %48 = vector.broadcast %cst_27 : f32 to vector<16x128xf32>
      %49 = vector.broadcast %cst_28 : f32 to vector<16x128xf32>
      %50 = arith.select %47, %48, %49 : vector<16x128xi1>, vector<16x128xf32>
      %cst_29 = arith.constant -2.000000e+00 : f32
      %51 = vector.broadcast %cst_29 : f32 to vector<16x128xf32>
      %52 = arith.cmpf oge, %34, %51 : vector<16x128xf32>
      %cst_30 = arith.constant -1.500000e+00 : f32
      %53 = vector.broadcast %cst_30 : f32 to vector<16x128xf32>
      %54 = arith.cmpf olt, %34, %53 : vector<16x128xf32>
      %55 = arith.andi %52, %54 : vector<16x128xi1>
      %cst_31 = arith.constant 1.000000e+00 : f32
      %cst_32 = arith.constant 0.000000e+00 : f32
      %56 = vector.broadcast %cst_31 : f32 to vector<16x128xf32>
      %57 = vector.broadcast %cst_32 : f32 to vector<16x128xf32>
      %58 = arith.select %55, %56, %57 : vector<16x128xi1>, vector<16x128xf32>
      %cst_33 = arith.constant -1.500000e+00 : f32
      %59 = vector.broadcast %cst_33 : f32 to vector<16x128xf32>
      %60 = arith.cmpf oge, %34, %59 : vector<16x128xf32>
      %cst_34 = arith.constant -1.000000e+00 : f32
      %61 = vector.broadcast %cst_34 : f32 to vector<16x128xf32>
      %62 = arith.cmpf olt, %34, %61 : vector<16x128xf32>
      %63 = arith.andi %60, %62 : vector<16x128xi1>
      %cst_35 = arith.constant 1.000000e+00 : f32
      %cst_36 = arith.constant 0.000000e+00 : f32
      %64 = vector.broadcast %cst_35 : f32 to vector<16x128xf32>
      %65 = vector.broadcast %cst_36 : f32 to vector<16x128xf32>
      %66 = arith.select %63, %64, %65 : vector<16x128xi1>, vector<16x128xf32>
      %cst_37 = arith.constant -1.000000e+00 : f32
      %67 = vector.broadcast %cst_37 : f32 to vector<16x128xf32>
      %68 = arith.cmpf oge, %34, %67 : vector<16x128xf32>
      %cst_38 = arith.constant -5.000000e-01 : f32
      %69 = vector.broadcast %cst_38 : f32 to vector<16x128xf32>
      %70 = arith.cmpf olt, %34, %69 : vector<16x128xf32>
      %71 = arith.andi %68, %70 : vector<16x128xi1>
      %cst_39 = arith.constant 1.000000e+00 : f32
      %cst_40 = arith.constant 0.000000e+00 : f32
      %72 = vector.broadcast %cst_39 : f32 to vector<16x128xf32>
      %73 = vector.broadcast %cst_40 : f32 to vector<16x128xf32>
      %74 = arith.select %71, %72, %73 : vector<16x128xi1>, vector<16x128xf32>
      %cst_41 = arith.constant -5.000000e-01 : f32
      %75 = vector.broadcast %cst_41 : f32 to vector<16x128xf32>
      %76 = arith.cmpf oge, %34, %75 : vector<16x128xf32>
      %cst_42 = arith.constant 0.000000e+00 : f32
      %77 = vector.broadcast %cst_42 : f32 to vector<16x128xf32>
      %78 = arith.cmpf olt, %34, %77 : vector<16x128xf32>
      %79 = arith.andi %76, %78 : vector<16x128xi1>
      %cst_43 = arith.constant 1.000000e+00 : f32
      %cst_44 = arith.constant 0.000000e+00 : f32
      %80 = vector.broadcast %cst_43 : f32 to vector<16x128xf32>
      %81 = vector.broadcast %cst_44 : f32 to vector<16x128xf32>
      %82 = arith.select %79, %80, %81 : vector<16x128xi1>, vector<16x128xf32>
      %cst_45 = arith.constant 0.000000e+00 : f32
      %83 = vector.broadcast %cst_45 : f32 to vector<16x128xf32>
      %84 = arith.cmpf oge, %34, %83 : vector<16x128xf32>
      %cst_46 = arith.constant 5.000000e-01 : f32
      %85 = vector.broadcast %cst_46 : f32 to vector<16x128xf32>
      %86 = arith.cmpf olt, %34, %85 : vector<16x128xf32>
      %87 = arith.andi %84, %86 : vector<16x128xi1>
      %cst_47 = arith.constant 1.000000e+00 : f32
      %cst_48 = arith.constant 0.000000e+00 : f32
      %88 = vector.broadcast %cst_47 : f32 to vector<16x128xf32>
      %89 = vector.broadcast %cst_48 : f32 to vector<16x128xf32>
      %90 = arith.select %87, %88, %89 : vector<16x128xi1>, vector<16x128xf32>
      %cst_49 = arith.constant 5.000000e-01 : f32
      %91 = vector.broadcast %cst_49 : f32 to vector<16x128xf32>
      %92 = arith.cmpf oge, %34, %91 : vector<16x128xf32>
      %cst_50 = arith.constant 1.000000e+00 : f32
      %93 = vector.broadcast %cst_50 : f32 to vector<16x128xf32>
      %94 = arith.cmpf olt, %34, %93 : vector<16x128xf32>
      %95 = arith.andi %92, %94 : vector<16x128xi1>
      %cst_51 = arith.constant 1.000000e+00 : f32
      %cst_52 = arith.constant 0.000000e+00 : f32
      %96 = vector.broadcast %cst_51 : f32 to vector<16x128xf32>
      %97 = vector.broadcast %cst_52 : f32 to vector<16x128xf32>
      %98 = arith.select %95, %96, %97 : vector<16x128xi1>, vector<16x128xf32>
      %cst_53 = arith.constant 1.000000e+00 : f32
      %99 = vector.broadcast %cst_53 : f32 to vector<16x128xf32>
      %100 = arith.cmpf oge, %34, %99 : vector<16x128xf32>
      %cst_54 = arith.constant 1.500000e+00 : f32
      %101 = vector.broadcast %cst_54 : f32 to vector<16x128xf32>
      %102 = arith.cmpf olt, %34, %101 : vector<16x128xf32>
      %103 = arith.andi %100, %102 : vector<16x128xi1>
      %cst_55 = arith.constant 1.000000e+00 : f32
      %cst_56 = arith.constant 0.000000e+00 : f32
      %104 = vector.broadcast %cst_55 : f32 to vector<16x128xf32>
      %105 = vector.broadcast %cst_56 : f32 to vector<16x128xf32>
      %106 = arith.select %103, %104, %105 : vector<16x128xi1>, vector<16x128xf32>
      %cst_57 = arith.constant 1.500000e+00 : f32
      %107 = vector.broadcast %cst_57 : f32 to vector<16x128xf32>
      %108 = arith.cmpf oge, %34, %107 : vector<16x128xf32>
      %cst_58 = arith.constant 2.000000e+00 : f32
      %109 = vector.broadcast %cst_58 : f32 to vector<16x128xf32>
      %110 = arith.cmpf olt, %34, %109 : vector<16x128xf32>
      %111 = arith.andi %108, %110 : vector<16x128xi1>
      %cst_59 = arith.constant 1.000000e+00 : f32
      %cst_60 = arith.constant 0.000000e+00 : f32
      %112 = vector.broadcast %cst_59 : f32 to vector<16x128xf32>
      %113 = vector.broadcast %cst_60 : f32 to vector<16x128xf32>
      %114 = arith.select %111, %112, %113 : vector<16x128xi1>, vector<16x128xf32>
      %cst_61 = arith.constant 2.000000e+00 : f32
      %115 = vector.broadcast %cst_61 : f32 to vector<16x128xf32>
      %116 = arith.cmpf oge, %34, %115 : vector<16x128xf32>
      %cst_62 = arith.constant 2.500000e+00 : f32
      %117 = vector.broadcast %cst_62 : f32 to vector<16x128xf32>
      %118 = arith.cmpf olt, %34, %117 : vector<16x128xf32>
      %119 = arith.andi %116, %118 : vector<16x128xi1>
      %cst_63 = arith.constant 1.000000e+00 : f32
      %cst_64 = arith.constant 0.000000e+00 : f32
      %120 = vector.broadcast %cst_63 : f32 to vector<16x128xf32>
      %121 = vector.broadcast %cst_64 : f32 to vector<16x128xf32>
      %122 = arith.select %119, %120, %121 : vector<16x128xi1>, vector<16x128xf32>
      %cst_65 = arith.constant -2.500000e+00 : f32
      %123 = vector.broadcast %cst_65 : f32 to vector<16x128xf32>
      %124 = arith.subf %34, %123 : vector<16x128xf32>
      %cst_66 = arith.constant 2.000000e+00 : f32
      %125 = vector.broadcast %cst_66 : f32 to vector<16x128xf32>
      %126 = arith.mulf %124, %125 : vector<16x128xf32>
      %127 = arith.mulf %126, %50 : vector<16x128xf32>
      %cst_67 = arith.constant -1.500000e+00 : f32
      %128 = vector.broadcast %cst_67 : f32 to vector<16x128xf32>
      %129 = arith.subf %128, %34 : vector<16x128xf32>
      %cst_68 = arith.constant 2.000000e+00 : f32
      %130 = vector.broadcast %cst_68 : f32 to vector<16x128xf32>
      %131 = arith.mulf %129, %130 : vector<16x128xf32>
      %132 = arith.mulf %131, %58 : vector<16x128xf32>
      %133 = arith.addf %127, %132 : vector<16x128xf32>
      %cst_69 = arith.constant -2.000000e+00 : f32
      %134 = vector.broadcast %cst_69 : f32 to vector<16x128xf32>
      %135 = arith.subf %34, %134 : vector<16x128xf32>
      %cst_70 = arith.constant 2.000000e+00 : f32
      %136 = vector.broadcast %cst_70 : f32 to vector<16x128xf32>
      %137 = arith.mulf %135, %136 : vector<16x128xf32>
      %138 = arith.mulf %137, %58 : vector<16x128xf32>
      %cst_71 = arith.constant -1.000000e+00 : f32
      %139 = vector.broadcast %cst_71 : f32 to vector<16x128xf32>
      %140 = arith.subf %139, %34 : vector<16x128xf32>
      %cst_72 = arith.constant 2.000000e+00 : f32
      %141 = vector.broadcast %cst_72 : f32 to vector<16x128xf32>
      %142 = arith.mulf %140, %141 : vector<16x128xf32>
      %143 = arith.mulf %142, %66 : vector<16x128xf32>
      %144 = arith.addf %138, %143 : vector<16x128xf32>
      %cst_73 = arith.constant -1.500000e+00 : f32
      %145 = vector.broadcast %cst_73 : f32 to vector<16x128xf32>
      %146 = arith.subf %34, %145 : vector<16x128xf32>
      %cst_74 = arith.constant 2.000000e+00 : f32
      %147 = vector.broadcast %cst_74 : f32 to vector<16x128xf32>
      %148 = arith.mulf %146, %147 : vector<16x128xf32>
      %149 = arith.mulf %148, %66 : vector<16x128xf32>
      %cst_75 = arith.constant -5.000000e-01 : f32
      %150 = vector.broadcast %cst_75 : f32 to vector<16x128xf32>
      %151 = arith.subf %150, %34 : vector<16x128xf32>
      %cst_76 = arith.constant 2.000000e+00 : f32
      %152 = vector.broadcast %cst_76 : f32 to vector<16x128xf32>
      %153 = arith.mulf %151, %152 : vector<16x128xf32>
      %154 = arith.mulf %153, %74 : vector<16x128xf32>
      %155 = arith.addf %149, %154 : vector<16x128xf32>
      %cst_77 = arith.constant -1.000000e+00 : f32
      %156 = vector.broadcast %cst_77 : f32 to vector<16x128xf32>
      %157 = arith.subf %34, %156 : vector<16x128xf32>
      %cst_78 = arith.constant 2.000000e+00 : f32
      %158 = vector.broadcast %cst_78 : f32 to vector<16x128xf32>
      %159 = arith.mulf %157, %158 : vector<16x128xf32>
      %160 = arith.mulf %159, %74 : vector<16x128xf32>
      %cst_79 = arith.constant 0.000000e+00 : f32
      %161 = vector.broadcast %cst_79 : f32 to vector<16x128xf32>
      %162 = arith.subf %161, %34 : vector<16x128xf32>
      %cst_80 = arith.constant 2.000000e+00 : f32
      %163 = vector.broadcast %cst_80 : f32 to vector<16x128xf32>
      %164 = arith.mulf %162, %163 : vector<16x128xf32>
      %165 = arith.mulf %164, %82 : vector<16x128xf32>
      %166 = arith.addf %160, %165 : vector<16x128xf32>
      %cst_81 = arith.constant -5.000000e-01 : f32
      %167 = vector.broadcast %cst_81 : f32 to vector<16x128xf32>
      %168 = arith.subf %34, %167 : vector<16x128xf32>
      %cst_82 = arith.constant 2.000000e+00 : f32
      %169 = vector.broadcast %cst_82 : f32 to vector<16x128xf32>
      %170 = arith.mulf %168, %169 : vector<16x128xf32>
      %171 = arith.mulf %170, %82 : vector<16x128xf32>
      %cst_83 = arith.constant 5.000000e-01 : f32
      %172 = vector.broadcast %cst_83 : f32 to vector<16x128xf32>
      %173 = arith.subf %172, %34 : vector<16x128xf32>
      %cst_84 = arith.constant 2.000000e+00 : f32
      %174 = vector.broadcast %cst_84 : f32 to vector<16x128xf32>
      %175 = arith.mulf %173, %174 : vector<16x128xf32>
      %176 = arith.mulf %175, %90 : vector<16x128xf32>
      %177 = arith.addf %171, %176 : vector<16x128xf32>
      %cst_85 = arith.constant 0.000000e+00 : f32
      %178 = vector.broadcast %cst_85 : f32 to vector<16x128xf32>
      %179 = arith.subf %34, %178 : vector<16x128xf32>
      %cst_86 = arith.constant 2.000000e+00 : f32
      %180 = vector.broadcast %cst_86 : f32 to vector<16x128xf32>
      %181 = arith.mulf %179, %180 : vector<16x128xf32>
      %182 = arith.mulf %181, %90 : vector<16x128xf32>
      %cst_87 = arith.constant 1.000000e+00 : f32
      %183 = vector.broadcast %cst_87 : f32 to vector<16x128xf32>
      %184 = arith.subf %183, %34 : vector<16x128xf32>
      %cst_88 = arith.constant 2.000000e+00 : f32
      %185 = vector.broadcast %cst_88 : f32 to vector<16x128xf32>
      %186 = arith.mulf %184, %185 : vector<16x128xf32>
      %187 = arith.mulf %186, %98 : vector<16x128xf32>
      %188 = arith.addf %182, %187 : vector<16x128xf32>
      %cst_89 = arith.constant 5.000000e-01 : f32
      %189 = vector.broadcast %cst_89 : f32 to vector<16x128xf32>
      %190 = arith.subf %34, %189 : vector<16x128xf32>
      %cst_90 = arith.constant 2.000000e+00 : f32
      %191 = vector.broadcast %cst_90 : f32 to vector<16x128xf32>
      %192 = arith.mulf %190, %191 : vector<16x128xf32>
      %193 = arith.mulf %192, %98 : vector<16x128xf32>
      %cst_91 = arith.constant 1.500000e+00 : f32
      %194 = vector.broadcast %cst_91 : f32 to vector<16x128xf32>
      %195 = arith.subf %194, %34 : vector<16x128xf32>
      %cst_92 = arith.constant 2.000000e+00 : f32
      %196 = vector.broadcast %cst_92 : f32 to vector<16x128xf32>
      %197 = arith.mulf %195, %196 : vector<16x128xf32>
      %198 = arith.mulf %197, %106 : vector<16x128xf32>
      %199 = arith.addf %193, %198 : vector<16x128xf32>
      %cst_93 = arith.constant 1.000000e+00 : f32
      %200 = vector.broadcast %cst_93 : f32 to vector<16x128xf32>
      %201 = arith.subf %34, %200 : vector<16x128xf32>
      %cst_94 = arith.constant 2.000000e+00 : f32
      %202 = vector.broadcast %cst_94 : f32 to vector<16x128xf32>
      %203 = arith.mulf %201, %202 : vector<16x128xf32>
      %204 = arith.mulf %203, %106 : vector<16x128xf32>
      %cst_95 = arith.constant 2.000000e+00 : f32
      %205 = vector.broadcast %cst_95 : f32 to vector<16x128xf32>
      %206 = arith.subf %205, %34 : vector<16x128xf32>
      %cst_96 = arith.constant 2.000000e+00 : f32
      %207 = vector.broadcast %cst_96 : f32 to vector<16x128xf32>
      %208 = arith.mulf %206, %207 : vector<16x128xf32>
      %209 = arith.mulf %208, %114 : vector<16x128xf32>
      %210 = arith.addf %204, %209 : vector<16x128xf32>
      %cst_97 = arith.constant 1.500000e+00 : f32
      %211 = vector.broadcast %cst_97 : f32 to vector<16x128xf32>
      %212 = arith.subf %34, %211 : vector<16x128xf32>
      %cst_98 = arith.constant 2.000000e+00 : f32
      %213 = vector.broadcast %cst_98 : f32 to vector<16x128xf32>
      %214 = arith.mulf %212, %213 : vector<16x128xf32>
      %215 = arith.mulf %214, %114 : vector<16x128xf32>
      %cst_99 = arith.constant 2.500000e+00 : f32
      %216 = vector.broadcast %cst_99 : f32 to vector<16x128xf32>
      %217 = arith.subf %216, %34 : vector<16x128xf32>
      %cst_100 = arith.constant 2.000000e+00 : f32
      %218 = vector.broadcast %cst_100 : f32 to vector<16x128xf32>
      %219 = arith.mulf %217, %218 : vector<16x128xf32>
      %220 = arith.mulf %219, %122 : vector<16x128xf32>
      %221 = arith.addf %215, %220 : vector<16x128xf32>
      %cst_101 = arith.constant -2.500000e+00 : f32
      %222 = vector.broadcast %cst_101 : f32 to vector<16x128xf32>
      %223 = arith.subf %34, %222 : vector<16x128xf32>
      %cst_102 = arith.constant 1.000000e+00 : f32
      %224 = vector.broadcast %cst_102 : f32 to vector<16x128xf32>
      %225 = arith.mulf %223, %224 : vector<16x128xf32>
      %226 = arith.mulf %225, %133 : vector<16x128xf32>
      %cst_103 = arith.constant -1.000000e+00 : f32
      %227 = vector.broadcast %cst_103 : f32 to vector<16x128xf32>
      %228 = arith.subf %227, %34 : vector<16x128xf32>
      %cst_104 = arith.constant 1.000000e+00 : f32
      %229 = vector.broadcast %cst_104 : f32 to vector<16x128xf32>
      %230 = arith.mulf %228, %229 : vector<16x128xf32>
      %231 = arith.mulf %230, %144 : vector<16x128xf32>
      %232 = arith.addf %226, %231 : vector<16x128xf32>
      %cst_105 = arith.constant -2.000000e+00 : f32
      %233 = vector.broadcast %cst_105 : f32 to vector<16x128xf32>
      %234 = arith.subf %34, %233 : vector<16x128xf32>
      %cst_106 = arith.constant 1.000000e+00 : f32
      %235 = vector.broadcast %cst_106 : f32 to vector<16x128xf32>
      %236 = arith.mulf %234, %235 : vector<16x128xf32>
      %237 = arith.mulf %236, %144 : vector<16x128xf32>
      %cst_107 = arith.constant -5.000000e-01 : f32
      %238 = vector.broadcast %cst_107 : f32 to vector<16x128xf32>
      %239 = arith.subf %238, %34 : vector<16x128xf32>
      %cst_108 = arith.constant 1.000000e+00 : f32
      %240 = vector.broadcast %cst_108 : f32 to vector<16x128xf32>
      %241 = arith.mulf %239, %240 : vector<16x128xf32>
      %242 = arith.mulf %241, %155 : vector<16x128xf32>
      %243 = arith.addf %237, %242 : vector<16x128xf32>
      %cst_109 = arith.constant -1.500000e+00 : f32
      %244 = vector.broadcast %cst_109 : f32 to vector<16x128xf32>
      %245 = arith.subf %34, %244 : vector<16x128xf32>
      %cst_110 = arith.constant 1.000000e+00 : f32
      %246 = vector.broadcast %cst_110 : f32 to vector<16x128xf32>
      %247 = arith.mulf %245, %246 : vector<16x128xf32>
      %248 = arith.mulf %247, %155 : vector<16x128xf32>
      %cst_111 = arith.constant 0.000000e+00 : f32
      %249 = vector.broadcast %cst_111 : f32 to vector<16x128xf32>
      %250 = arith.subf %249, %34 : vector<16x128xf32>
      %cst_112 = arith.constant 1.000000e+00 : f32
      %251 = vector.broadcast %cst_112 : f32 to vector<16x128xf32>
      %252 = arith.mulf %250, %251 : vector<16x128xf32>
      %253 = arith.mulf %252, %166 : vector<16x128xf32>
      %254 = arith.addf %248, %253 : vector<16x128xf32>
      %cst_113 = arith.constant -1.000000e+00 : f32
      %255 = vector.broadcast %cst_113 : f32 to vector<16x128xf32>
      %256 = arith.subf %34, %255 : vector<16x128xf32>
      %cst_114 = arith.constant 1.000000e+00 : f32
      %257 = vector.broadcast %cst_114 : f32 to vector<16x128xf32>
      %258 = arith.mulf %256, %257 : vector<16x128xf32>
      %259 = arith.mulf %258, %166 : vector<16x128xf32>
      %cst_115 = arith.constant 5.000000e-01 : f32
      %260 = vector.broadcast %cst_115 : f32 to vector<16x128xf32>
      %261 = arith.subf %260, %34 : vector<16x128xf32>
      %cst_116 = arith.constant 1.000000e+00 : f32
      %262 = vector.broadcast %cst_116 : f32 to vector<16x128xf32>
      %263 = arith.mulf %261, %262 : vector<16x128xf32>
      %264 = arith.mulf %263, %177 : vector<16x128xf32>
      %265 = arith.addf %259, %264 : vector<16x128xf32>
      %cst_117 = arith.constant -5.000000e-01 : f32
      %266 = vector.broadcast %cst_117 : f32 to vector<16x128xf32>
      %267 = arith.subf %34, %266 : vector<16x128xf32>
      %cst_118 = arith.constant 1.000000e+00 : f32
      %268 = vector.broadcast %cst_118 : f32 to vector<16x128xf32>
      %269 = arith.mulf %267, %268 : vector<16x128xf32>
      %270 = arith.mulf %269, %177 : vector<16x128xf32>
      %cst_119 = arith.constant 1.000000e+00 : f32
      %271 = vector.broadcast %cst_119 : f32 to vector<16x128xf32>
      %272 = arith.subf %271, %34 : vector<16x128xf32>
      %cst_120 = arith.constant 1.000000e+00 : f32
      %273 = vector.broadcast %cst_120 : f32 to vector<16x128xf32>
      %274 = arith.mulf %272, %273 : vector<16x128xf32>
      %275 = arith.mulf %274, %188 : vector<16x128xf32>
      %276 = arith.addf %270, %275 : vector<16x128xf32>
      %cst_121 = arith.constant 0.000000e+00 : f32
      %277 = vector.broadcast %cst_121 : f32 to vector<16x128xf32>
      %278 = arith.subf %34, %277 : vector<16x128xf32>
      %cst_122 = arith.constant 1.000000e+00 : f32
      %279 = vector.broadcast %cst_122 : f32 to vector<16x128xf32>
      %280 = arith.mulf %278, %279 : vector<16x128xf32>
      %281 = arith.mulf %280, %188 : vector<16x128xf32>
      %cst_123 = arith.constant 1.500000e+00 : f32
      %282 = vector.broadcast %cst_123 : f32 to vector<16x128xf32>
      %283 = arith.subf %282, %34 : vector<16x128xf32>
      %cst_124 = arith.constant 1.000000e+00 : f32
      %284 = vector.broadcast %cst_124 : f32 to vector<16x128xf32>
      %285 = arith.mulf %283, %284 : vector<16x128xf32>
      %286 = arith.mulf %285, %199 : vector<16x128xf32>
      %287 = arith.addf %281, %286 : vector<16x128xf32>
      %cst_125 = arith.constant 5.000000e-01 : f32
      %288 = vector.broadcast %cst_125 : f32 to vector<16x128xf32>
      %289 = arith.subf %34, %288 : vector<16x128xf32>
      %cst_126 = arith.constant 1.000000e+00 : f32
      %290 = vector.broadcast %cst_126 : f32 to vector<16x128xf32>
      %291 = arith.mulf %289, %290 : vector<16x128xf32>
      %292 = arith.mulf %291, %199 : vector<16x128xf32>
      %cst_127 = arith.constant 2.000000e+00 : f32
      %293 = vector.broadcast %cst_127 : f32 to vector<16x128xf32>
      %294 = arith.subf %293, %34 : vector<16x128xf32>
      %cst_128 = arith.constant 1.000000e+00 : f32
      %295 = vector.broadcast %cst_128 : f32 to vector<16x128xf32>
      %296 = arith.mulf %294, %295 : vector<16x128xf32>
      %297 = arith.mulf %296, %210 : vector<16x128xf32>
      %298 = arith.addf %292, %297 : vector<16x128xf32>
      %cst_129 = arith.constant 1.000000e+00 : f32
      %299 = vector.broadcast %cst_129 : f32 to vector<16x128xf32>
      %300 = arith.subf %34, %299 : vector<16x128xf32>
      %cst_130 = arith.constant 1.000000e+00 : f32
      %301 = vector.broadcast %cst_130 : f32 to vector<16x128xf32>
      %302 = arith.mulf %300, %301 : vector<16x128xf32>
      %303 = arith.mulf %302, %210 : vector<16x128xf32>
      %cst_131 = arith.constant 2.500000e+00 : f32
      %304 = vector.broadcast %cst_131 : f32 to vector<16x128xf32>
      %305 = arith.subf %304, %34 : vector<16x128xf32>
      %cst_132 = arith.constant 1.000000e+00 : f32
      %306 = vector.broadcast %cst_132 : f32 to vector<16x128xf32>
      %307 = arith.mulf %305, %306 : vector<16x128xf32>
      %308 = arith.mulf %307, %221 : vector<16x128xf32>
      %309 = arith.addf %303, %308 : vector<16x128xf32>
      %cst_133 = arith.constant -2.500000e+00 : f32
      %310 = vector.broadcast %cst_133 : f32 to vector<16x128xf32>
      %311 = arith.subf %34, %310 : vector<16x128xf32>
      %cst_134 = arith.constant 0.666666686 : f32
      %312 = vector.broadcast %cst_134 : f32 to vector<16x128xf32>
      %313 = arith.mulf %311, %312 : vector<16x128xf32>
      %314 = arith.mulf %313, %232 : vector<16x128xf32>
      %cst_135 = arith.constant -5.000000e-01 : f32
      %315 = vector.broadcast %cst_135 : f32 to vector<16x128xf32>
      %316 = arith.subf %315, %34 : vector<16x128xf32>
      %cst_136 = arith.constant 0.666666686 : f32
      %317 = vector.broadcast %cst_136 : f32 to vector<16x128xf32>
      %318 = arith.mulf %316, %317 : vector<16x128xf32>
      %319 = arith.mulf %318, %243 : vector<16x128xf32>
      %320 = arith.addf %314, %319 : vector<16x128xf32>
      %cst_137 = arith.constant -2.000000e+00 : f32
      %321 = vector.broadcast %cst_137 : f32 to vector<16x128xf32>
      %322 = arith.subf %34, %321 : vector<16x128xf32>
      %cst_138 = arith.constant 0.666666686 : f32
      %323 = vector.broadcast %cst_138 : f32 to vector<16x128xf32>
      %324 = arith.mulf %322, %323 : vector<16x128xf32>
      %325 = arith.mulf %324, %243 : vector<16x128xf32>
      %cst_139 = arith.constant 0.000000e+00 : f32
      %326 = vector.broadcast %cst_139 : f32 to vector<16x128xf32>
      %327 = arith.subf %326, %34 : vector<16x128xf32>
      %cst_140 = arith.constant 0.666666686 : f32
      %328 = vector.broadcast %cst_140 : f32 to vector<16x128xf32>
      %329 = arith.mulf %327, %328 : vector<16x128xf32>
      %330 = arith.mulf %329, %254 : vector<16x128xf32>
      %331 = arith.addf %325, %330 : vector<16x128xf32>
      %cst_141 = arith.constant -1.500000e+00 : f32
      %332 = vector.broadcast %cst_141 : f32 to vector<16x128xf32>
      %333 = arith.subf %34, %332 : vector<16x128xf32>
      %cst_142 = arith.constant 0.666666686 : f32
      %334 = vector.broadcast %cst_142 : f32 to vector<16x128xf32>
      %335 = arith.mulf %333, %334 : vector<16x128xf32>
      %336 = arith.mulf %335, %254 : vector<16x128xf32>
      %cst_143 = arith.constant 5.000000e-01 : f32
      %337 = vector.broadcast %cst_143 : f32 to vector<16x128xf32>
      %338 = arith.subf %337, %34 : vector<16x128xf32>
      %cst_144 = arith.constant 0.666666686 : f32
      %339 = vector.broadcast %cst_144 : f32 to vector<16x128xf32>
      %340 = arith.mulf %338, %339 : vector<16x128xf32>
      %341 = arith.mulf %340, %265 : vector<16x128xf32>
      %342 = arith.addf %336, %341 : vector<16x128xf32>
      %cst_145 = arith.constant -1.000000e+00 : f32
      %343 = vector.broadcast %cst_145 : f32 to vector<16x128xf32>
      %344 = arith.subf %34, %343 : vector<16x128xf32>
      %cst_146 = arith.constant 0.666666686 : f32
      %345 = vector.broadcast %cst_146 : f32 to vector<16x128xf32>
      %346 = arith.mulf %344, %345 : vector<16x128xf32>
      %347 = arith.mulf %346, %265 : vector<16x128xf32>
      %cst_147 = arith.constant 1.000000e+00 : f32
      %348 = vector.broadcast %cst_147 : f32 to vector<16x128xf32>
      %349 = arith.subf %348, %34 : vector<16x128xf32>
      %cst_148 = arith.constant 0.666666686 : f32
      %350 = vector.broadcast %cst_148 : f32 to vector<16x128xf32>
      %351 = arith.mulf %349, %350 : vector<16x128xf32>
      %352 = arith.mulf %351, %276 : vector<16x128xf32>
      %353 = arith.addf %347, %352 : vector<16x128xf32>
      %cst_149 = arith.constant -5.000000e-01 : f32
      %354 = vector.broadcast %cst_149 : f32 to vector<16x128xf32>
      %355 = arith.subf %34, %354 : vector<16x128xf32>
      %cst_150 = arith.constant 0.666666686 : f32
      %356 = vector.broadcast %cst_150 : f32 to vector<16x128xf32>
      %357 = arith.mulf %355, %356 : vector<16x128xf32>
      %358 = arith.mulf %357, %276 : vector<16x128xf32>
      %cst_151 = arith.constant 1.500000e+00 : f32
      %359 = vector.broadcast %cst_151 : f32 to vector<16x128xf32>
      %360 = arith.subf %359, %34 : vector<16x128xf32>
      %cst_152 = arith.constant 0.666666686 : f32
      %361 = vector.broadcast %cst_152 : f32 to vector<16x128xf32>
      %362 = arith.mulf %360, %361 : vector<16x128xf32>
      %363 = arith.mulf %362, %287 : vector<16x128xf32>
      %364 = arith.addf %358, %363 : vector<16x128xf32>
      %cst_153 = arith.constant 0.000000e+00 : f32
      %365 = vector.broadcast %cst_153 : f32 to vector<16x128xf32>
      %366 = arith.subf %34, %365 : vector<16x128xf32>
      %cst_154 = arith.constant 0.666666686 : f32
      %367 = vector.broadcast %cst_154 : f32 to vector<16x128xf32>
      %368 = arith.mulf %366, %367 : vector<16x128xf32>
      %369 = arith.mulf %368, %287 : vector<16x128xf32>
      %cst_155 = arith.constant 2.000000e+00 : f32
      %370 = vector.broadcast %cst_155 : f32 to vector<16x128xf32>
      %371 = arith.subf %370, %34 : vector<16x128xf32>
      %cst_156 = arith.constant 0.666666686 : f32
      %372 = vector.broadcast %cst_156 : f32 to vector<16x128xf32>
      %373 = arith.mulf %371, %372 : vector<16x128xf32>
      %374 = arith.mulf %373, %298 : vector<16x128xf32>
      %375 = arith.addf %369, %374 : vector<16x128xf32>
      %cst_157 = arith.constant 5.000000e-01 : f32
      %376 = vector.broadcast %cst_157 : f32 to vector<16x128xf32>
      %377 = arith.subf %34, %376 : vector<16x128xf32>
      %cst_158 = arith.constant 0.666666686 : f32
      %378 = vector.broadcast %cst_158 : f32 to vector<16x128xf32>
      %379 = arith.mulf %377, %378 : vector<16x128xf32>
      %380 = arith.mulf %379, %298 : vector<16x128xf32>
      %cst_159 = arith.constant 2.500000e+00 : f32
      %381 = vector.broadcast %cst_159 : f32 to vector<16x128xf32>
      %382 = arith.subf %381, %34 : vector<16x128xf32>
      %cst_160 = arith.constant 0.666666686 : f32
      %383 = vector.broadcast %cst_160 : f32 to vector<16x128xf32>
      %384 = arith.mulf %382, %383 : vector<16x128xf32>
      %385 = arith.mulf %384, %309 : vector<16x128xf32>
      %386 = arith.addf %380, %385 : vector<16x128xf32>
      %387 = tpu.concatenate %320, %331, %342, %353, %364, %375, %386 in 1 : vector<16x128xf32>, vector<16x128xf32>, vector<16x128xf32>, vector<16x128xf32>, vector<16x128xf32>, vector<16x128xf32>, vector<16x128xf32> -> vector<16x896xf32>
      %c0_161 = arith.constant 0 : index
      %c0_162 = arith.constant 0 : index
      %388 = vector.load %arg10[%c0_161, %c0_162] : memref<896x128xf32, #tpu.memory_space<vmem>>, vector<896x128xf32>
      %cst_163 = arith.constant dense<0.000000e+00> : vector<16x128xf32>
      %389 = tpu.matmul %387, %388, %cst_163 {dimension_numbers = #tpu.dot_dimension_numbers<[1], [0], [0], [1], [0, 0, 1, 1], [], []>} : vector<16x896xf32>, vector<896x128xf32>, vector<16x128xf32> -> vector<16x128xf32>
      %390 = arith.addf %42, %389 : vector<16x128xf32>
      %c0_164 = arith.constant 0 : index
      %c0_165 = arith.constant 0 : index
      %391 = vector.load %arg11[%c0_164, %c0_165] : memref<16x128xf32, #tpu.memory_space<vmem>>, vector<16x128xf32>
      tpu.vector_store %arg11[%c0_164, %c0_165], %390 {strides = array<i32>} : memref<16x128xf32, #tpu.memory_space<vmem>>, vector<16x128xf32>,
    } else {
    }
    return
  }
  func.func @transform_0(%arg0: i32) -> (i32, i32) {
    %c0_i32 = arith.constant 0 : i32
    %c0_i32_0 = arith.constant 0 : i32
    return %c0_i32, %arg0 : i32, i32
  }
  func.func @transform_1(%arg0: i32) -> (i32, i32) {
    %c0_i32 = arith.constant 0 : i32
    %c0_i32_0 = arith.constant 0 : i32
    return %c0_i32, %arg0 : i32, i32
  }
  func.func @transform_2(%arg0: i32) -> (i32, i32) {
    %c0_i32 = arith.constant 0 : i32
    %c0_i32_0 = arith.constant 0 : i32
    return %arg0, %c0_i32 : i32, i32
  }
  func.func @transform_3(%arg0: i32) -> (i32, i32) {
    %c0_i32 = arith.constant 0 : i32
    %c0_i32_0 = arith.constant 0 : i32
    %c0_i32_1 = arith.constant 0 : i32
    return %c0_i32, %c0_i32_0 : i32, i32
  }
  func.func @transform_4(%arg0: i32) -> (i32, i32) {
    %c0_i32 = arith.constant 0 : i32
    %c0_i32_0 = arith.constant 0 : i32
    %c0_i32_1 = arith.constant 0 : i32
    return %c0_i32, %c0_i32_0 : i32, i32
  }
  func.func @transform_5(%arg0: i32) -> (i32, i32) {
    %c0_i32 = arith.constant 0 : i32
    %c0_i32_0 = arith.constant 0 : i32
    %c0_i32_1 = arith.constant 0 : i32
    return %c0_i32, %c0_i32_0 : i32, i32
  }
  func.func @transform_6(%arg0: i32) -> (i32, i32) {
    %c0_i32 = arith.constant 0 : i32
    %c0_i32_0 = arith.constant 0 : i32
    %c0_i32_1 = arith.constant 0 : i32
    return %c0_i32, %c0_i32_0 : i32, i32
  }
  func.func @transform_7(%arg0: i32) -> (i32, i32) {
    %c0_i32 = arith.constant 0 : i32
    %c0_i32_0 = arith.constant 0 : i32
    %c0_i32_1 = arith.constant 0 : i32
    return %c0_i32, %c0_i32_0 : i32, i32
  }
  func.func @transform_8(%arg0: i32) -> (i32, i32) {
    %c0_i32 = arith.constant 0 : i32
    %c0_i32_0 = arith.constant 0 : i32
    %c0_i32_1 = arith.constant 0 : i32
    return %c0_i32, %c0_i32_0 : i32, i32
  }
  func.func @transform_9(%arg0: i32) -> (i32, i32) {
    %c0_i32 = arith.constant 0 : i32
    %c0_i32_0 = arith.constant 0 : i32
    %c0_i32_1 = arith.constant 0 : i32
    return %c0_i32, %c0_i32_0 : i32, i32
  }
  func.func @transform_10(%arg0: i32) -> (i32, i32) {
    %c0_i32 = arith.constant 0 : i32
    %c0_i32_0 = arith.constant 0 : i32
    %c0_i32_1 = arith.constant 0 : i32
    return %c0_i32, %c0_i32_0 : i32, i32
  }
}

module attributes {stable_mosaic.version = 11 : i64} {
  func.func @gckan_kernel(%arg0: i32, %arg1: memref<1x128xi32, #tpu.memory_space<vmem>>, %arg2: memref<1x128xi32, #tpu.memory_space<vmem>>, %arg3: memref<128x384xf32, #tpu.memory_space<vmem>>, %arg4: memref<16x128xf32, #tpu.memory_space<vmem>>, %arg5: memref<128x128xf32, #tpu.memory_space<vmem>>, %arg6: memref<1x128xf32, #tpu.memory_space<vmem>>, %arg7: memref<384x128xf32, #tpu.memory_space<vmem>>, %arg8: memref<1x128xf32, #tpu.memory_space<vmem>>, %arg9: memref<128x128xf32, #tpu.memory_space<vmem>>, %arg10: memref<896x128xf32, #tpu.memory_space<vmem>>, %arg11: memref<16x128xf32, #tpu.memory_space<vmem>>, %arg12: memref<16x128xf32, #tpu.memory_space<vmem>>, %arg13: memref<16x128xf32, #tpu.memory_space<vmem>>) attributes {dimension_semantics = [#tpu.dimension_semantics<arbitrary>], iteration_bounds = array<i64: 2>, scalar_prefetch = 0 : i64, scratch_operands = 2 : i64, tpu.core_type = #tpu.core_type<tc>, window_params = [{transform_indices = @transform_0, window_bounds = array<i64: 1, 128>}, {transform_indices = @transform_1, window_bounds = array<i64: 1, 128>}, {transform_indices = @transform_2, window_bounds = array<i64: 128, 384>}, {pipeline_mode = #tpu.pipeline_mode<synchronous>, transform_indices = @transform_3, window_bounds = array<i64: 16, 128>}, {pipeline_mode = #tpu.pipeline_mode<synchronous>, transform_indices = @transform_4, window_bounds = array<i64: 128, 128>}, {pipeline_mode = #tpu.pipeline_mode<synchronous>, transform_indices = @transform_5, window_bounds = array<i64: 1, 128>}, {pipeline_mode = #tpu.pipeline_mode<synchronous>, transform_indices = @transform_6, window_bounds = array<i64: 384, 128>}, {pipeline_mode = #tpu.pipeline_mode<synchronous>, transform_indices = @transform_7, window_bounds = array<i64: 1, 128>}, {pipeline_mode = #tpu.pipeline_mode<synchronous>, transform_indices = @transform_8, window_bounds = array<i64: 128, 128>}, {pipeline_mode = #tpu.pipeline_mode<synchronous>, transform_indices = @transform_9, window_bounds = array<i64: 896, 128>}, {pipeline_mode = #tpu.pipeline_mode<synchronous>, transform_indices = @transform_10, window_bounds = array<i64: 16, 128>}]} {
    %c0_i32 = arith.constant 0 : i32
    %0 = arith.cmpi eq, %arg0, %c0_i32 : i32
    %1 = arith.extui %0 : i1 to i32
    %c0_i32_0 = arith.constant 0 : i32
    %2 = arith.cmpi ne, %1, %c0_i32_0 : i32
    scf.if %2 {
      %c0_19 = arith.constant 0 : index
      %c0_20 = arith.constant 0 : index
      %34 = vector.load %arg4[%c0_19, %c0_20] : memref<16x128xf32, #tpu.memory_space<vmem>>, vector<16x128xf32>
      %c0_21 = arith.constant 0 : index
      %c0_22 = arith.constant 0 : index
      %35 = vector.load %arg5[%c0_21, %c0_22] : memref<128x128xf32, #tpu.memory_space<vmem>>, vector<128x128xf32>
      %cst_23 = arith.constant dense<0.000000e+00> : vector<16x128xf32>
      %36 = tpu.matmul %34, %35, %cst_23 {dimension_numbers = #tpu.dot_dimension_numbers<[1], [0], [0], [1], [0, 0, 1, 1], [], []>} : vector<16x128xf32>, vector<128x128xf32>, vector<16x128xf32> -> vector<16x128xf32>
      %c0_24 = arith.constant 0 : index
      %c0_25 = arith.constant 0 : index
      %37 = vector.load %arg6[%c0_24, %c0_25] : memref<1x128xf32, #tpu.memory_space<vmem>>, vector<1x128xf32>
      %38 = vector.broadcast %37 : vector<1x128xf32> to vector<16x128xf32>
      %39 = arith.addf %36, %38 : vector<16x128xf32>
      %c0_26 = arith.constant 0 : index
      %c0_27 = arith.constant 0 : index
      %40 = vector.load %arg12[%c0_26, %c0_27] : memref<16x128xf32, #tpu.memory_space<vmem>>, vector<16x128xf32>
      tpu.vector_store %arg12[%c0_26, %c0_27], %39 {strides = array<i32>} : memref<16x128xf32, #tpu.memory_space<vmem>>, vector<16x128xf32>,
      %cst_28 = arith.constant 0.000000e+00 : f32
      %41 = vector.broadcast %cst_28 : f32 to vector<16x128xf32>
      %c0_29 = arith.constant 0 : index
      %c0_30 = arith.constant 0 : index
      %42 = vector.load %arg13[%c0_29, %c0_30] : memref<16x128xf32, #tpu.memory_space<vmem>>, vector<16x128xf32>
      tpu.vector_store %arg13[%c0_29, %c0_30], %41 {strides = array<i32>} : memref<16x128xf32, #tpu.memory_space<vmem>>, vector<16x128xf32>,
    } else {
    }
    %c0 = arith.constant 0 : index
    %c0_1 = arith.constant 0 : index
    %3 = vector.load %arg3[%c0, %c0_1] : memref<128x384xf32, #tpu.memory_space<vmem>>, vector<128x384xf32>
    %c0_2 = arith.constant 0 : index
    %c0_3 = arith.constant 0 : index
    %4 = vector.load %arg7[%c0_2, %c0_3] : memref<384x128xf32, #tpu.memory_space<vmem>>, vector<384x128xf32>
    %cst = arith.constant dense<0.000000e+00> : vector<128x128xf32>
    %5 = tpu.matmul %3, %4, %cst {dimension_numbers = #tpu.dot_dimension_numbers<[1], [0], [0], [1], [0, 0, 1, 1], [], []>} : vector<128x384xf32>, vector<384x128xf32>, vector<128x128xf32> -> vector<128x128xf32>
    %c0_4 = arith.constant 0 : index
    %c0_5 = arith.constant 0 : index
    %6 = vector.load %arg8[%c0_4, %c0_5] : memref<1x128xf32, #tpu.memory_space<vmem>>, vector<1x128xf32>
    %7 = vector.broadcast %6 : vector<1x128xf32> to vector<128x128xf32>
    %8 = arith.addf %5, %7 : vector<128x128xf32>
    %c0_6 = arith.constant 0 : index
    %c0_7 = arith.constant 0 : index
    %9 = vector.load %arg1[%c0_6, %c0_7] : memref<1x128xi32, #tpu.memory_space<vmem>>, vector<1x128xi32>
    %c0_8 = arith.constant 0 : index
    %c0_9 = arith.constant 0 : index
    %10 = vector.load %arg2[%c0_8, %c0_9] : memref<1x128xi32, #tpu.memory_space<vmem>>, vector<1x128xi32>
    %11 = tpu.iota {dimensions = array<i32: 0>} : vector<16x128xi32>
    %12 = vector.broadcast %9 : vector<1x128xi32> to vector<16x128xi32>
    %13 = arith.cmpi eq, %11, %12 : vector<16x128xi32>
    %14 = arith.extui %13 : vector<16x128xi1> to vector<16x128xi32>
    %15 = arith.sitofp %14 : vector<16x128xi32> to vector<16x128xf32>
    %16 = arith.truncf %15 : vector<16x128xf32> to vector<16x128xbf16>
    %17 = vector.broadcast %10 : vector<1x128xi32> to vector<16x128xi32>
    %18 = arith.cmpi eq, %11, %17 : vector<16x128xi32>
    %19 = arith.extui %18 : vector<16x128xi1> to vector<16x128xi32>
    %20 = arith.sitofp %19 : vector<16x128xi32> to vector<16x128xf32>
    %21 = arith.truncf %20 : vector<16x128xf32> to vector<16x128xbf16>
    %c0_10 = arith.constant 0 : index
    %c0_11 = arith.constant 0 : index
    %22 = vector.load %arg12[%c0_10, %c0_11] : memref<16x128xf32, #tpu.memory_space<vmem>>, vector<16x128xf32>
    %23 = arith.truncf %22 : vector<16x128xf32> to vector<16x128xbf16>
    %cst_12 = arith.constant dense<0.000000e+00> : vector<128x128xf32>
    %24 = tpu.matmul %16, %23, %cst_12 {dimension_numbers = #tpu.dot_dimension_numbers<[0], [0], [1], [1], [0, 1, 1, 1], [], []>} : vector<16x128xbf16>, vector<16x128xbf16>, vector<128x128xf32> -> vector<128x128xf32>
    %25 = arith.mulf %8, %24 : vector<128x128xf32>
    %26 = arith.truncf %25 : vector<128x128xf32> to vector<128x128xbf16>
    %c0_13 = arith.constant 0 : index
    %c0_14 = arith.constant 0 : index
    %27 = vector.load %arg13[%c0_13, %c0_14] : memref<16x128xf32, #tpu.memory_space<vmem>>, vector<16x128xf32>
    %cst_15 = arith.constant dense<0.000000e+00> : vector<16x128xf32>
    %28 = tpu.matmul %21, %26, %cst_15 {dimension_numbers = #tpu.dot_dimension_numbers<[1], [0], [0], [1], [0, 0, 1, 1], [], []>} : vector<16x128xbf16>, vector<128x128xbf16>, vector<16x128xf32> -> vector<16x128xf32>
    %29 = arith.addf %27, %28 : vector<16x128xf32>
    %c0_16 = arith.constant 0 : index
    %c0_17 = arith.constant 0 : index
    %30 = vector.load %arg13[%c0_16, %c0_17] : memref<16x128xf32, #tpu.memory_space<vmem>>, vector<16x128xf32>
    tpu.vector_store %arg13[%c0_16, %c0_17], %29 {strides = array<i32>} : memref<16x128xf32, #tpu.memory_space<vmem>>, vector<16x128xf32>,
    %c1_i32 = arith.constant 1 : i32
    %31 = arith.cmpi eq, %arg0, %c1_i32 : i32
    %32 = arith.extui %31 : i1 to i32
    %c0_i32_18 = arith.constant 0 : i32
    %33 = arith.cmpi ne, %32, %c0_i32_18 : i32
    scf.if %33 {
      %c0_19 = arith.constant 0 : index
      %c0_20 = arith.constant 0 : index
      %34 = vector.load %arg13[%c0_19, %c0_20] : memref<16x128xf32, #tpu.memory_space<vmem>>, vector<16x128xf32>
      %35 = arith.negf %34 : vector<16x128xf32>
      %36 = math.exp %35 : vector<16x128xf32>
      %cst_21 = arith.constant 1.000000e+00 : f32
      %37 = vector.broadcast %cst_21 : f32 to vector<16x128xf32>
      %38 = arith.addf %37, %36 : vector<16x128xf32>
      %39 = arith.divf %37, %38 : vector<16x128xf32>
      %40 = arith.mulf %34, %39 : vector<16x128xf32>
      %c0_22 = arith.constant 0 : index
      %c0_23 = arith.constant 0 : index
      %41 = vector.load %arg9[%c0_22, %c0_23] : memref<128x128xf32, #tpu.memory_space<vmem>>, vector<128x128xf32>
      %cst_24 = arith.constant dense<0.000000e+00> : vector<16x128xf32>
      %42 = tpu.matmul %40, %41, %cst_24 {dimension_numbers = #tpu.dot_dimension_numbers<[1], [0], [0], [1], [0, 0, 1, 1], [], []>} : vector<16x128xf32>, vector<128x128xf32>, vector<16x128xf32> -> vector<16x128xf32>
      %cst_25 = arith.constant -2.500000e+00 : f32
      %43 = vector.broadcast %cst_25 : f32 to vector<16x128xf32>
      %44 = arith.cmpf oge, %34, %43 : vector<16x128xf32>
      %cst_26 = arith.constant -2.000000e+00 : f32
      %45 = vector.broadcast %cst_26 : f32 to vector<16x128xf32>
      %46 = arith.cmpf olt, %34, %45 : vector<16x128xf32>
      %47 = arith.andi %44, %46 : vector<16x128xi1>
      %cst_27 = arith.constant 1.000000e+00 : f32
      %cst_28 = arith.constant 0.000000e+00 : f32
      %48 = vector.broadcast %cst_27 : f32 to vector<16x128xf32>
      %49 = vector.broadcast %cst_28 : f32 to vector<16x128xf32>
      %50 = arith.select %47, %48, %49 : vector<16x128xi1>, vector<16x128xf32>
      %cst_29 = arith.constant -2.000000e+00 : f32
      %51 = vector.broadcast %cst_29 : f32 to vector<16x128xf32>
      %52 = arith.cmpf oge, %34, %51 : vector<16x128xf32>
      %cst_30 = arith.constant -1.500000e+00 : f32
      %53 = vector.broadcast %cst_30 : f32 to vector<16x128xf32>
      %54 = arith.cmpf olt, %34, %53 : vector<16x128xf32>
      %55 = arith.andi %52, %54 : vector<16x128xi1>
      %cst_31 = arith.constant 1.000000e+00 : f32
      %cst_32 = arith.constant 0.000000e+00 : f32
      %56 = vector.broadcast %cst_31 : f32 to vector<16x128xf32>
      %57 = vector.broadcast %cst_32 : f32 to vector<16x128xf32>
      %58 = arith.select %55, %56, %57 : vector<16x128xi1>, vector<16x128xf32>
      %cst_33 = arith.constant -1.500000e+00 : f32
      %59 = vector.broadcast %cst_33 : f32 to vector<16x128xf32>
      %60 = arith.cmpf oge, %34, %59 : vector<16x128xf32>
      %cst_34 = arith.constant -1.000000e+00 : f32
      %61 = vector.broadcast %cst_34 : f32 to vector<16x128xf32>
      %62 = arith.cmpf olt, %34, %61 : vector<16x128xf32>
      %63 = arith.andi %60, %62 : vector<16x128xi1>
      %cst_35 = arith.constant 1.000000e+00 : f32
      %cst_36 = arith.constant 0.000000e+00 : f32
      %64 = vector.broadcast %cst_35 : f32 to vector<16x128xf32>
      %65 = vector.broadcast %cst_36 : f32 to vector<16x128xf32>
      %66 = arith.select %63, %64, %65 : vector<16x128xi1>, vector<16x128xf32>
      %cst_37 = arith.constant -1.000000e+00 : f32
      %67 = vector.broadcast %cst_37 : f32 to vector<16x128xf32>
      %68 = arith.cmpf oge, %34, %67 : vector<16x128xf32>
      %cst_38 = arith.constant -5.000000e-01 : f32
      %69 = vector.broadcast %cst_38 : f32 to vector<16x128xf32>
      %70 = arith.cmpf olt, %34, %69 : vector<16x128xf32>
      %71 = arith.andi %68, %70 : vector<16x128xi1>
      %cst_39 = arith.constant 1.000000e+00 : f32
      %cst_40 = arith.constant 0.000000e+00 : f32
      %72 = vector.broadcast %cst_39 : f32 to vector<16x128xf32>
      %73 = vector.broadcast %cst_40 : f32 to vector<16x128xf32>
      %74 = arith.select %71, %72, %73 : vector<16x128xi1>, vector<16x128xf32>
      %cst_41 = arith.constant -5.000000e-01 : f32
      %75 = vector.broadcast %cst_41 : f32 to vector<16x128xf32>
      %76 = arith.cmpf oge, %34, %75 : vector<16x128xf32>
      %cst_42 = arith.constant 0.000000e+00 : f32
      %77 = vector.broadcast %cst_42 : f32 to vector<16x128xf32>
      %78 = arith.cmpf olt, %34, %77 : vector<16x128xf32>
      %79 = arith.andi %76, %78 : vector<16x128xi1>
      %cst_43 = arith.constant 1.000000e+00 : f32
      %cst_44 = arith.constant 0.000000e+00 : f32
      %80 = vector.broadcast %cst_43 : f32 to vector<16x128xf32>
      %81 = vector.broadcast %cst_44 : f32 to vector<16x128xf32>
      %82 = arith.select %79, %80, %81 : vector<16x128xi1>, vector<16x128xf32>
      %cst_45 = arith.constant 0.000000e+00 : f32
      %83 = vector.broadcast %cst_45 : f32 to vector<16x128xf32>
      %84 = arith.cmpf oge, %34, %83 : vector<16x128xf32>
      %cst_46 = arith.constant 5.000000e-01 : f32
      %85 = vector.broadcast %cst_46 : f32 to vector<16x128xf32>
      %86 = arith.cmpf olt, %34, %85 : vector<16x128xf32>
      %87 = arith.andi %84, %86 : vector<16x128xi1>
      %cst_47 = arith.constant 1.000000e+00 : f32
      %cst_48 = arith.constant 0.000000e+00 : f32
      %88 = vector.broadcast %cst_47 : f32 to vector<16x128xf32>
      %89 = vector.broadcast %cst_48 : f32 to vector<16x128xf32>
      %90 = arith.select %87, %88, %89 : vector<16x128xi1>, vector<16x128xf32>
      %cst_49 = arith.constant 5.000000e-01 : f32
      %91 = vector.broadcast %cst_49 : f32 to vector<16x128xf32>
      %92 = arith.cmpf oge, %34, %91 : vector<16x128xf32>
      %cst_50 = arith.constant 1.000000e+00 : f32
      %93 = vector.broadcast %cst_50 : f32 to vector<16x128xf32>
      %94 = arith.cmpf olt, %34, %93 : vector<16x128xf32>
      %95 = arith.andi %92, %94 : vector<16x128xi1>
      %cst_51 = arith.constant 1.000000e+00 : f32
      %cst_52 = arith.constant 0.000000e+00 : f32
      %96 = vector.broadcast %cst_51 : f32 to vector<16x128xf32>
      %97 = vector.broadcast %cst_52 : f32 to vector<16x128xf32>
      %98 = arith.select %95, %96, %97 : vector<16x128xi1>, vector<16x128xf32>
      %cst_53 = arith.constant 1.000000e+00 : f32
      %99 = vector.broadcast %cst_53 : f32 to vector<16x128xf32>
      %100 = arith.cmpf oge, %34, %99 : vector<16x128xf32>
      %cst_54 = arith.constant 1.500000e+00 : f32
      %101 = vector.broadcast %cst_54 : f32 to vector<16x128xf32>
      %102 = arith.cmpf olt, %34, %101 : vector<16x128xf32>
      %103 = arith.andi %100, %102 : vector<16x128xi1>
      %cst_55 = arith.constant 1.000000e+00 : f32
      %cst_56 = arith.constant 0.000000e+00 : f32
      %104 = vector.broadcast %cst_55 : f32 to vector<16x128xf32>
      %105 = vector.broadcast %cst_56 : f32 to vector<16x128xf32>
      %106 = arith.select %103, %104, %105 : vector<16x128xi1>, vector<16x128xf32>
      %cst_57 = arith.constant 1.500000e+00 : f32
      %107 = vector.broadcast %cst_57 : f32 to vector<16x128xf32>
      %108 = arith.cmpf oge, %34, %107 : vector<16x128xf32>
      %cst_58 = arith.constant 2.000000e+00 : f32
      %109 = vector.broadcast %cst_58 : f32 to vector<16x128xf32>
      %110 = arith.cmpf olt, %34, %109 : vector<16x128xf32>
      %111 = arith.andi %108, %110 : vector<16x128xi1>
      %cst_59 = arith.constant 1.000000e+00 : f32
      %cst_60 = arith.constant 0.000000e+00 : f32
      %112 = vector.broadcast %cst_59 : f32 to vector<16x128xf32>
      %113 = vector.broadcast %cst_60 : f32 to vector<16x128xf32>
      %114 = arith.select %111, %112, %113 : vector<16x128xi1>, vector<16x128xf32>
      %cst_61 = arith.constant 2.000000e+00 : f32
      %115 = vector.broadcast %cst_61 : f32 to vector<16x128xf32>
      %116 = arith.cmpf oge, %34, %115 : vector<16x128xf32>
      %cst_62 = arith.constant 2.500000e+00 : f32
      %117 = vector.broadcast %cst_62 : f32 to vector<16x128xf32>
      %118 = arith.cmpf olt, %34, %117 : vector<16x128xf32>
      %119 = arith.andi %116, %118 : vector<16x128xi1>
      %cst_63 = arith.constant 1.000000e+00 : f32
      %cst_64 = arith.constant 0.000000e+00 : f32
      %120 = vector.broadcast %cst_63 : f32 to vector<16x128xf32>
      %121 = vector.broadcast %cst_64 : f32 to vector<16x128xf32>
      %122 = arith.select %119, %120, %121 : vector<16x128xi1>, vector<16x128xf32>
      %cst_65 = arith.constant -2.500000e+00 : f32
      %123 = vector.broadcast %cst_65 : f32 to vector<16x128xf32>
      %124 = arith.subf %34, %123 : vector<16x128xf32>
      %cst_66 = arith.constant 2.000000e+00 : f32
      %125 = vector.broadcast %cst_66 : f32 to vector<16x128xf32>
      %126 = arith.mulf %124, %125 : vector<16x128xf32>
      %127 = arith.mulf %126, %50 : vector<16x128xf32>
      %cst_67 = arith.constant -1.500000e+00 : f32
      %128 = vector.broadcast %cst_67 : f32 to vector<16x128xf32>
      %129 = arith.subf %128, %34 : vector<16x128xf32>
      %cst_68 = arith.constant 2.000000e+00 : f32
      %130 = vector.broadcast %cst_68 : f32 to vector<16x128xf32>
      %131 = arith.mulf %129, %130 : vector<16x128xf32>
      %132 = arith.mulf %131, %58 : vector<16x128xf32>
      %133 = arith.addf %127, %132 : vector<16x128xf32>
      %cst_69 = arith.constant -2.000000e+00 : f32
      %134 = vector.broadcast %cst_69 : f32 to vector<16x128xf32>
      %135 = arith.subf %34, %134 : vector<16x128xf32>
      %cst_70 = arith.constant 2.000000e+00 : f32
      %136 = vector.broadcast %cst_70 : f32 to vector<16x128xf32>
      %137 = arith.mulf %135, %136 : vector<16x128xf32>
      %138 = arith.mulf %137, %58 : vector<16x128xf32>
      %cst_71 = arith.constant -1.000000e+00 : f32
      %139 = vector.broadcast %cst_71 : f32 to vector<16x128xf32>
      %140 = arith.subf %139, %34 : vector<16x128xf32>
      %cst_72 = arith.constant 2.000000e+00 : f32
      %141 = vector.broadcast %cst_72 : f32 to vector<16x128xf32>
      %142 = arith.mulf %140, %141 : vector<16x128xf32>
      %143 = arith.mulf %142, %66 : vector<16x128xf32>
      %144 = arith.addf %138, %143 : vector<16x128xf32>
      %cst_73 = arith.constant -1.500000e+00 : f32
      %145 = vector.broadcast %cst_73 : f32 to vector<16x128xf32>
      %146 = arith.subf %34, %145 : vector<16x128xf32>
      %cst_74 = arith.constant 2.000000e+00 : f32
      %147 = vector.broadcast %cst_74 : f32 to vector<16x128xf32>
      %148 = arith.mulf %146, %147 : vector<16x128xf32>
      %149 = arith.mulf %148, %66 : vector<16x128xf32>
      %cst_75 = arith.constant -5.000000e-01 : f32
      %150 = vector.broadcast %cst_75 : f32 to vector<16x128xf32>
      %151 = arith.subf %150, %34 : vector<16x128xf32>
      %cst_76 = arith.constant 2.000000e+00 : f32
      %152 = vector.broadcast %cst_76 : f32 to vector<16x128xf32>
      %153 = arith.mulf %151, %152 : vector<16x128xf32>
      %154 = arith.mulf %153, %74 : vector<16x128xf32>
      %155 = arith.addf %149, %154 : vector<16x128xf32>
      %cst_77 = arith.constant -1.000000e+00 : f32
      %156 = vector.broadcast %cst_77 : f32 to vector<16x128xf32>
      %157 = arith.subf %34, %156 : vector<16x128xf32>
      %cst_78 = arith.constant 2.000000e+00 : f32
      %158 = vector.broadcast %cst_78 : f32 to vector<16x128xf32>
      %159 = arith.mulf %157, %158 : vector<16x128xf32>
      %160 = arith.mulf %159, %74 : vector<16x128xf32>
      %cst_79 = arith.constant 0.000000e+00 : f32
      %161 = vector.broadcast %cst_79 : f32 to vector<16x128xf32>
      %162 = arith.subf %161, %34 : vector<16x128xf32>
      %cst_80 = arith.constant 2.000000e+00 : f32
      %163 = vector.broadcast %cst_80 : f32 to vector<16x128xf32>
      %164 = arith.mulf %162, %163 : vector<16x128xf32>
      %165 = arith.mulf %164, %82 : vector<16x128xf32>
      %166 = arith.addf %160, %165 : vector<16x128xf32>
      %cst_81 = arith.constant -5.000000e-01 : f32
      %167 = vector.broadcast %cst_81 : f32 to vector<16x128xf32>
      %168 = arith.subf %34, %167 : vector<16x128xf32>
      %cst_82 = arith.constant 2.000000e+00 : f32
      %169 = vector.broadcast %cst_82 : f32 to vector<16x128xf32>
      %170 = arith.mulf %168, %169 : vector<16x128xf32>
      %171 = arith.mulf %170, %82 : vector<16x128xf32>
      %cst_83 = arith.constant 5.000000e-01 : f32
      %172 = vector.broadcast %cst_83 : f32 to vector<16x128xf32>
      %173 = arith.subf %172, %34 : vector<16x128xf32>
      %cst_84 = arith.constant 2.000000e+00 : f32
      %174 = vector.broadcast %cst_84 : f32 to vector<16x128xf32>
      %175 = arith.mulf %173, %174 : vector<16x128xf32>
      %176 = arith.mulf %175, %90 : vector<16x128xf32>
      %177 = arith.addf %171, %176 : vector<16x128xf32>
      %cst_85 = arith.constant 0.000000e+00 : f32
      %178 = vector.broadcast %cst_85 : f32 to vector<16x128xf32>
      %179 = arith.subf %34, %178 : vector<16x128xf32>
      %cst_86 = arith.constant 2.000000e+00 : f32
      %180 = vector.broadcast %cst_86 : f32 to vector<16x128xf32>
      %181 = arith.mulf %179, %180 : vector<16x128xf32>
      %182 = arith.mulf %181, %90 : vector<16x128xf32>
      %cst_87 = arith.constant 1.000000e+00 : f32
      %183 = vector.broadcast %cst_87 : f32 to vector<16x128xf32>
      %184 = arith.subf %183, %34 : vector<16x128xf32>
      %cst_88 = arith.constant 2.000000e+00 : f32
      %185 = vector.broadcast %cst_88 : f32 to vector<16x128xf32>
      %186 = arith.mulf %184, %185 : vector<16x128xf32>
      %187 = arith.mulf %186, %98 : vector<16x128xf32>
      %188 = arith.addf %182, %187 : vector<16x128xf32>
      %cst_89 = arith.constant 5.000000e-01 : f32
      %189 = vector.broadcast %cst_89 : f32 to vector<16x128xf32>
      %190 = arith.subf %34, %189 : vector<16x128xf32>
      %cst_90 = arith.constant 2.000000e+00 : f32
      %191 = vector.broadcast %cst_90 : f32 to vector<16x128xf32>
      %192 = arith.mulf %190, %191 : vector<16x128xf32>
      %193 = arith.mulf %192, %98 : vector<16x128xf32>
      %cst_91 = arith.constant 1.500000e+00 : f32
      %194 = vector.broadcast %cst_91 : f32 to vector<16x128xf32>
      %195 = arith.subf %194, %34 : vector<16x128xf32>
      %cst_92 = arith.constant 2.000000e+00 : f32
      %196 = vector.broadcast %cst_92 : f32 to vector<16x128xf32>
      %197 = arith.mulf %195, %196 : vector<16x128xf32>
      %198 = arith.mulf %197, %106 : vector<16x128xf32>
      %199 = arith.addf %193, %198 : vector<16x128xf32>
      %cst_93 = arith.constant 1.000000e+00 : f32
      %200 = vector.broadcast %cst_93 : f32 to vector<16x128xf32>
      %201 = arith.subf %34, %200 : vector<16x128xf32>
      %cst_94 = arith.constant 2.000000e+00 : f32
      %202 = vector.broadcast %cst_94 : f32 to vector<16x128xf32>
      %203 = arith.mulf %201, %202 : vector<16x128xf32>
      %204 = arith.mulf %203, %106 : vector<16x128xf32>
      %cst_95 = arith.constant 2.000000e+00 : f32
      %205 = vector.broadcast %cst_95 : f32 to vector<16x128xf32>
      %206 = arith.subf %205, %34 : vector<16x128xf32>
      %cst_96 = arith.constant 2.000000e+00 : f32
      %207 = vector.broadcast %cst_96 : f32 to vector<16x128xf32>
      %208 = arith.mulf %206, %207 : vector<16x128xf32>
      %209 = arith.mulf %208, %114 : vector<16x128xf32>
      %210 = arith.addf %204, %209 : vector<16x128xf32>
      %cst_97 = arith.constant 1.500000e+00 : f32
      %211 = vector.broadcast %cst_97 : f32 to vector<16x128xf32>
      %212 = arith.subf %34, %211 : vector<16x128xf32>
      %cst_98 = arith.constant 2.000000e+00 : f32
      %213 = vector.broadcast %cst_98 : f32 to vector<16x128xf32>
      %214 = arith.mulf %212, %213 : vector<16x128xf32>
      %215 = arith.mulf %214, %114 : vector<16x128xf32>
      %cst_99 = arith.constant 2.500000e+00 : f32
      %216 = vector.broadcast %cst_99 : f32 to vector<16x128xf32>
      %217 = arith.subf %216, %34 : vector<16x128xf32>
      %cst_100 = arith.constant 2.000000e+00 : f32
      %218 = vector.broadcast %cst_100 : f32 to vector<16x128xf32>
      %219 = arith.mulf %217, %218 : vector<16x128xf32>
      %220 = arith.mulf %219, %122 : vector<16x128xf32>
      %221 = arith.addf %215, %220 : vector<16x128xf32>
      %cst_101 = arith.constant -2.500000e+00 : f32
      %222 = vector.broadcast %cst_101 : f32 to vector<16x128xf32>
      %223 = arith.subf %34, %222 : vector<16x128xf32>
      %cst_102 = arith.constant 1.000000e+00 : f32
      %224 = vector.broadcast %cst_102 : f32 to vector<16x128xf32>
      %225 = arith.mulf %223, %224 : vector<16x128xf32>
      %226 = arith.mulf %225, %133 : vector<16x128xf32>
      %cst_103 = arith.constant -1.000000e+00 : f32
      %227 = vector.broadcast %cst_103 : f32 to vector<16x128xf32>
      %228 = arith.subf %227, %34 : vector<16x128xf32>
      %cst_104 = arith.constant 1.000000e+00 : f32
      %229 = vector.broadcast %cst_104 : f32 to vector<16x128xf32>
      %230 = arith.mulf %228, %229 : vector<16x128xf32>
      %231 = arith.mulf %230, %144 : vector<16x128xf32>
      %232 = arith.addf %226, %231 : vector<16x128xf32>
      %cst_105 = arith.constant -2.000000e+00 : f32
      %233 = vector.broadcast %cst_105 : f32 to vector<16x128xf32>
      %234 = arith.subf %34, %233 : vector<16x128xf32>
      %cst_106 = arith.constant 1.000000e+00 : f32
      %235 = vector.broadcast %cst_106 : f32 to vector<16x128xf32>
      %236 = arith.mulf %234, %235 : vector<16x128xf32>
      %237 = arith.mulf %236, %144 : vector<16x128xf32>
      %cst_107 = arith.constant -5.000000e-01 : f32
      %238 = vector.broadcast %cst_107 : f32 to vector<16x128xf32>
      %239 = arith.subf %238, %34 : vector<16x128xf32>
      %cst_108 = arith.constant 1.000000e+00 : f32
      %240 = vector.broadcast %cst_108 : f32 to vector<16x128xf32>
      %241 = arith.mulf %239, %240 : vector<16x128xf32>
      %242 = arith.mulf %241, %155 : vector<16x128xf32>
      %243 = arith.addf %237, %242 : vector<16x128xf32>
      %cst_109 = arith.constant -1.500000e+00 : f32
      %244 = vector.broadcast %cst_109 : f32 to vector<16x128xf32>
      %245 = arith.subf %34, %244 : vector<16x128xf32>
      %cst_110 = arith.constant 1.000000e+00 : f32
      %246 = vector.broadcast %cst_110 : f32 to vector<16x128xf32>
      %247 = arith.mulf %245, %246 : vector<16x128xf32>
      %248 = arith.mulf %247, %155 : vector<16x128xf32>
      %cst_111 = arith.constant 0.000000e+00 : f32
      %249 = vector.broadcast %cst_111 : f32 to vector<16x128xf32>
      %250 = arith.subf %249, %34 : vector<16x128xf32>
      %cst_112 = arith.constant 1.000000e+00 : f32
      %251 = vector.broadcast %cst_112 : f32 to vector<16x128xf32>
      %252 = arith.mulf %250, %251 : vector<16x128xf32>
      %253 = arith.mulf %252, %166 : vector<16x128xf32>
      %254 = arith.addf %248, %253 : vector<16x128xf32>
      %cst_113 = arith.constant -1.000000e+00 : f32
      %255 = vector.broadcast %cst_113 : f32 to vector<16x128xf32>
      %256 = arith.subf %34, %255 : vector<16x128xf32>
      %cst_114 = arith.constant 1.000000e+00 : f32
      %257 = vector.broadcast %cst_114 : f32 to vector<16x128xf32>
      %258 = arith.mulf %256, %257 : vector<16x128xf32>
      %259 = arith.mulf %258, %166 : vector<16x128xf32>
      %cst_115 = arith.constant 5.000000e-01 : f32
      %260 = vector.broadcast %cst_115 : f32 to vector<16x128xf32>
      %261 = arith.subf %260, %34 : vector<16x128xf32>
      %cst_116 = arith.constant 1.000000e+00 : f32
      %262 = vector.broadcast %cst_116 : f32 to vector<16x128xf32>
      %263 = arith.mulf %261, %262 : vector<16x128xf32>
      %264 = arith.mulf %263, %177 : vector<16x128xf32>
      %265 = arith.addf %259, %264 : vector<16x128xf32>
      %cst_117 = arith.constant -5.000000e-01 : f32
      %266 = vector.broadcast %cst_117 : f32 to vector<16x128xf32>
      %267 = arith.subf %34, %266 : vector<16x128xf32>
      %cst_118 = arith.constant 1.000000e+00 : f32
      %268 = vector.broadcast %cst_118 : f32 to vector<16x128xf32>
      %269 = arith.mulf %267, %268 : vector<16x128xf32>
      %270 = arith.mulf %269, %177 : vector<16x128xf32>
      %cst_119 = arith.constant 1.000000e+00 : f32
      %271 = vector.broadcast %cst_119 : f32 to vector<16x128xf32>
      %272 = arith.subf %271, %34 : vector<16x128xf32>
      %cst_120 = arith.constant 1.000000e+00 : f32
      %273 = vector.broadcast %cst_120 : f32 to vector<16x128xf32>
      %274 = arith.mulf %272, %273 : vector<16x128xf32>
      %275 = arith.mulf %274, %188 : vector<16x128xf32>
      %276 = arith.addf %270, %275 : vector<16x128xf32>
      %cst_121 = arith.constant 0.000000e+00 : f32
      %277 = vector.broadcast %cst_121 : f32 to vector<16x128xf32>
      %278 = arith.subf %34, %277 : vector<16x128xf32>
      %cst_122 = arith.constant 1.000000e+00 : f32
      %279 = vector.broadcast %cst_122 : f32 to vector<16x128xf32>
      %280 = arith.mulf %278, %279 : vector<16x128xf32>
      %281 = arith.mulf %280, %188 : vector<16x128xf32>
      %cst_123 = arith.constant 1.500000e+00 : f32
      %282 = vector.broadcast %cst_123 : f32 to vector<16x128xf32>
      %283 = arith.subf %282, %34 : vector<16x128xf32>
      %cst_124 = arith.constant 1.000000e+00 : f32
      %284 = vector.broadcast %cst_124 : f32 to vector<16x128xf32>
      %285 = arith.mulf %283, %284 : vector<16x128xf32>
      %286 = arith.mulf %285, %199 : vector<16x128xf32>
      %287 = arith.addf %281, %286 : vector<16x128xf32>
      %cst_125 = arith.constant 5.000000e-01 : f32
      %288 = vector.broadcast %cst_125 : f32 to vector<16x128xf32>
      %289 = arith.subf %34, %288 : vector<16x128xf32>
      %cst_126 = arith.constant 1.000000e+00 : f32
      %290 = vector.broadcast %cst_126 : f32 to vector<16x128xf32>
      %291 = arith.mulf %289, %290 : vector<16x128xf32>
      %292 = arith.mulf %291, %199 : vector<16x128xf32>
      %cst_127 = arith.constant 2.000000e+00 : f32
      %293 = vector.broadcast %cst_127 : f32 to vector<16x128xf32>
      %294 = arith.subf %293, %34 : vector<16x128xf32>
      %cst_128 = arith.constant 1.000000e+00 : f32
      %295 = vector.broadcast %cst_128 : f32 to vector<16x128xf32>
      %296 = arith.mulf %294, %295 : vector<16x128xf32>
      %297 = arith.mulf %296, %210 : vector<16x128xf32>
      %298 = arith.addf %292, %297 : vector<16x128xf32>
      %cst_129 = arith.constant 1.000000e+00 : f32
      %299 = vector.broadcast %cst_129 : f32 to vector<16x128xf32>
      %300 = arith.subf %34, %299 : vector<16x128xf32>
      %cst_130 = arith.constant 1.000000e+00 : f32
      %301 = vector.broadcast %cst_130 : f32 to vector<16x128xf32>
      %302 = arith.mulf %300, %301 : vector<16x128xf32>
      %303 = arith.mulf %302, %210 : vector<16x128xf32>
      %cst_131 = arith.constant 2.500000e+00 : f32
      %304 = vector.broadcast %cst_131 : f32 to vector<16x128xf32>
      %305 = arith.subf %304, %34 : vector<16x128xf32>
      %cst_132 = arith.constant 1.000000e+00 : f32
      %306 = vector.broadcast %cst_132 : f32 to vector<16x128xf32>
      %307 = arith.mulf %305, %306 : vector<16x128xf32>
      %308 = arith.mulf %307, %221 : vector<16x128xf32>
      %309 = arith.addf %303, %308 : vector<16x128xf32>
      %cst_133 = arith.constant -2.500000e+00 : f32
      %310 = vector.broadcast %cst_133 : f32 to vector<16x128xf32>
      %311 = arith.subf %34, %310 : vector<16x128xf32>
      %cst_134 = arith.constant 0.666666686 : f32
      %312 = vector.broadcast %cst_134 : f32 to vector<16x128xf32>
      %313 = arith.mulf %311, %312 : vector<16x128xf32>
      %314 = arith.mulf %313, %232 : vector<16x128xf32>
      %cst_135 = arith.constant -5.000000e-01 : f32
      %315 = vector.broadcast %cst_135 : f32 to vector<16x128xf32>
      %316 = arith.subf %315, %34 : vector<16x128xf32>
      %cst_136 = arith.constant 0.666666686 : f32
      %317 = vector.broadcast %cst_136 : f32 to vector<16x128xf32>
      %318 = arith.mulf %316, %317 : vector<16x128xf32>
      %319 = arith.mulf %318, %243 : vector<16x128xf32>
      %320 = arith.addf %314, %319 : vector<16x128xf32>
      %cst_137 = arith.constant -2.000000e+00 : f32
      %321 = vector.broadcast %cst_137 : f32 to vector<16x128xf32>
      %322 = arith.subf %34, %321 : vector<16x128xf32>
      %cst_138 = arith.constant 0.666666686 : f32
      %323 = vector.broadcast %cst_138 : f32 to vector<16x128xf32>
      %324 = arith.mulf %322, %323 : vector<16x128xf32>
      %325 = arith.mulf %324, %243 : vector<16x128xf32>
      %cst_139 = arith.constant 0.000000e+00 : f32
      %326 = vector.broadcast %cst_139 : f32 to vector<16x128xf32>
      %327 = arith.subf %326, %34 : vector<16x128xf32>
      %cst_140 = arith.constant 0.666666686 : f32
      %328 = vector.broadcast %cst_140 : f32 to vector<16x128xf32>
      %329 = arith.mulf %327, %328 : vector<16x128xf32>
      %330 = arith.mulf %329, %254 : vector<16x128xf32>
      %331 = arith.addf %325, %330 : vector<16x128xf32>
      %cst_141 = arith.constant -1.500000e+00 : f32
      %332 = vector.broadcast %cst_141 : f32 to vector<16x128xf32>
      %333 = arith.subf %34, %332 : vector<16x128xf32>
      %cst_142 = arith.constant 0.666666686 : f32
      %334 = vector.broadcast %cst_142 : f32 to vector<16x128xf32>
      %335 = arith.mulf %333, %334 : vector<16x128xf32>
      %336 = arith.mulf %335, %254 : vector<16x128xf32>
      %cst_143 = arith.constant 5.000000e-01 : f32
      %337 = vector.broadcast %cst_143 : f32 to vector<16x128xf32>
      %338 = arith.subf %337, %34 : vector<16x128xf32>
      %cst_144 = arith.constant 0.666666686 : f32
      %339 = vector.broadcast %cst_144 : f32 to vector<16x128xf32>
      %340 = arith.mulf %338, %339 : vector<16x128xf32>
      %341 = arith.mulf %340, %265 : vector<16x128xf32>
      %342 = arith.addf %336, %341 : vector<16x128xf32>
      %cst_145 = arith.constant -1.000000e+00 : f32
      %343 = vector.broadcast %cst_145 : f32 to vector<16x128xf32>
      %344 = arith.subf %34, %343 : vector<16x128xf32>
      %cst_146 = arith.constant 0.666666686 : f32
      %345 = vector.broadcast %cst_146 : f32 to vector<16x128xf32>
      %346 = arith.mulf %344, %345 : vector<16x128xf32>
      %347 = arith.mulf %346, %265 : vector<16x128xf32>
      %cst_147 = arith.constant 1.000000e+00 : f32
      %348 = vector.broadcast %cst_147 : f32 to vector<16x128xf32>
      %349 = arith.subf %348, %34 : vector<16x128xf32>
      %cst_148 = arith.constant 0.666666686 : f32
      %350 = vector.broadcast %cst_148 : f32 to vector<16x128xf32>
      %351 = arith.mulf %349, %350 : vector<16x128xf32>
      %352 = arith.mulf %351, %276 : vector<16x128xf32>
      %353 = arith.addf %347, %352 : vector<16x128xf32>
      %cst_149 = arith.constant -5.000000e-01 : f32
      %354 = vector.broadcast %cst_149 : f32 to vector<16x128xf32>
      %355 = arith.subf %34, %354 : vector<16x128xf32>
      %cst_150 = arith.constant 0.666666686 : f32
      %356 = vector.broadcast %cst_150 : f32 to vector<16x128xf32>
      %357 = arith.mulf %355, %356 : vector<16x128xf32>
      %358 = arith.mulf %357, %276 : vector<16x128xf32>
      %cst_151 = arith.constant 1.500000e+00 : f32
      %359 = vector.broadcast %cst_151 : f32 to vector<16x128xf32>
      %360 = arith.subf %359, %34 : vector<16x128xf32>
      %cst_152 = arith.constant 0.666666686 : f32
      %361 = vector.broadcast %cst_152 : f32 to vector<16x128xf32>
      %362 = arith.mulf %360, %361 : vector<16x128xf32>
      %363 = arith.mulf %362, %287 : vector<16x128xf32>
      %364 = arith.addf %358, %363 : vector<16x128xf32>
      %cst_153 = arith.constant 0.000000e+00 : f32
      %365 = vector.broadcast %cst_153 : f32 to vector<16x128xf32>
      %366 = arith.subf %34, %365 : vector<16x128xf32>
      %cst_154 = arith.constant 0.666666686 : f32
      %367 = vector.broadcast %cst_154 : f32 to vector<16x128xf32>
      %368 = arith.mulf %366, %367 : vector<16x128xf32>
      %369 = arith.mulf %368, %287 : vector<16x128xf32>
      %cst_155 = arith.constant 2.000000e+00 : f32
      %370 = vector.broadcast %cst_155 : f32 to vector<16x128xf32>
      %371 = arith.subf %370, %34 : vector<16x128xf32>
      %cst_156 = arith.constant 0.666666686 : f32
      %372 = vector.broadcast %cst_156 : f32 to vector<16x128xf32>
      %373 = arith.mulf %371, %372 : vector<16x128xf32>
      %374 = arith.mulf %373, %298 : vector<16x128xf32>
      %375 = arith.addf %369, %374 : vector<16x128xf32>
      %cst_157 = arith.constant 5.000000e-01 : f32
      %376 = vector.broadcast %cst_157 : f32 to vector<16x128xf32>
      %377 = arith.subf %34, %376 : vector<16x128xf32>
      %cst_158 = arith.constant 0.666666686 : f32
      %378 = vector.broadcast %cst_158 : f32 to vector<16x128xf32>
      %379 = arith.mulf %377, %378 : vector<16x128xf32>
      %380 = arith.mulf %379, %298 : vector<16x128xf32>
      %cst_159 = arith.constant 2.500000e+00 : f32
      %381 = vector.broadcast %cst_159 : f32 to vector<16x128xf32>
      %382 = arith.subf %381, %34 : vector<16x128xf32>
      %cst_160 = arith.constant 0.666666686 : f32
      %383 = vector.broadcast %cst_160 : f32 to vector<16x128xf32>
      %384 = arith.mulf %382, %383 : vector<16x128xf32>
      %385 = arith.mulf %384, %309 : vector<16x128xf32>
      %386 = arith.addf %380, %385 : vector<16x128xf32>
      %387 = tpu.concatenate %320, %331, %342, %353, %364, %375, %386 in 1 : vector<16x128xf32>, vector<16x128xf32>, vector<16x128xf32>, vector<16x128xf32>, vector<16x128xf32>, vector<16x128xf32>, vector<16x128xf32> -> vector<16x896xf32>
      %c0_161 = arith.constant 0 : index
      %c0_162 = arith.constant 0 : index
      %388 = vector.load %arg10[%c0_161, %c0_162] : memref<896x128xf32, #tpu.memory_space<vmem>>, vector<896x128xf32>
      %cst_163 = arith.constant dense<0.000000e+00> : vector<16x128xf32>
      %389 = tpu.matmul %387, %388, %cst_163 {dimension_numbers = #tpu.dot_dimension_numbers<[1], [0], [0], [1], [0, 0, 1, 1], [], []>} : vector<16x896xf32>, vector<896x128xf32>, vector<16x128xf32> -> vector<16x128xf32>
      %390 = arith.addf %42, %389 : vector<16x128xf32>
      %c0_164 = arith.constant 0 : index
      %c0_165 = arith.constant 0 : index
      %391 = vector.load %arg11[%c0_164, %c0_165] : memref<16x128xf32, #tpu.memory_space<vmem>>, vector<16x128xf32>
      tpu.vector_store %arg11[%c0_164, %c0_165], %390 {strides = array<i32>} : memref<16x128xf32, #tpu.memory_space<vmem>>, vector<16x128xf32>,
    } else {
    }
    return
  }
  func.func @transform_0(%arg0: i32) -> (i32, i32) {
    %c0_i32 = arith.constant 0 : i32
    %c0_i32_0 = arith.constant 0 : i32
    return %c0_i32, %arg0 : i32, i32
  }
  func.func @transform_1(%arg0: i32) -> (i32, i32) {
    %c0_i32 = arith.constant 0 : i32
    %c0_i32_0 = arith.constant 0 : i32
    return %c0_i32, %arg0 : i32, i32
  }
  func.func @transform_2(%arg0: i32) -> (i32, i32) {
    %c0_i32 = arith.constant 0 : i32
    %c0_i32_0 = arith.constant 0 : i32
    return %arg0, %c0_i32 : i32, i32
  }
  func.func @transform_3(%arg0: i32) -> (i32, i32) {
    %c0_i32 = arith.constant 0 : i32
    %c0_i32_0 = arith.constant 0 : i32
    %c0_i32_1 = arith.constant 0 : i32
    return %c0_i32, %c0_i32_0 : i32, i32
  }
  func.func @transform_4(%arg0: i32) -> (i32, i32) {
    %c0_i32 = arith.constant 0 : i32
    %c0_i32_0 = arith.constant 0 : i32
    %c0_i32_1 = arith.constant 0 : i32
    return %c0_i32, %c0_i32_0 : i32, i32
  }
  func.func @transform_5(%arg0: i32) -> (i32, i32) {
    %c0_i32 = arith.constant 0 : i32
    %c0_i32_0 = arith.constant 0 : i32
    %c0_i32_1 = arith.constant 0 : i32
    return %c0_i32, %c0_i32_0 : i32, i32
  }
  func.func @transform_6(%arg0: i32) -> (i32, i32) {
    %c0_i32 = arith.constant 0 : i32
    %c0_i32_0 = arith.constant 0 : i32
    %c0_i32_1 = arith.constant 0 : i32
    return %c0_i32, %c0_i32_0 : i32, i32
  }
  func.func @transform_7(%arg0: i32) -> (i32, i32) {
    %c0_i32 = arith.constant 0 : i32
    %c0_i32_0 = arith.constant 0 : i32
    %c0_i32_1 = arith.constant 0 : i32
    return %c0_i32, %c0_i32_0 : i32, i32
  }
  func.func @transform_8(%arg0: i32) -> (i32, i32) {
    %c0_i32 = arith.constant 0 : i32
    %c0_i32_0 = arith.constant 0 : i32
    %c0_i32_1 = arith.constant 0 : i32
    return %c0_i32, %c0_i32_0 : i32, i32
  }
  func.func @transform_9(%arg0: i32) -> (i32, i32) {
    %c0_i32 = arith.constant 0 : i32
    %c0_i32_0 = arith.constant 0 : i32
    %c0_i32_1 = arith.constant 0 : i32
    return %c0_i32, %c0_i32_0 : i32, i32
  }
  func.func @transform_10(%arg0: i32) -> (i32, i32) {
    %c0_i32 = arith.constant 0 : i32
    %c0_i32_0 = arith.constant 0 : i32
    %c0_i32_1 = arith.constant 0 : i32
    return %c0_i32, %c0_i32_0 : i32, i32
  }
}

</mosaic_0001>

<bundles_post_ra>
// kernel: gkan_nodes_forward.3
= control target key start
LH: loop header
LB: loop body
LE: loop exit
PB: predicated region body
PF: predicated region fallthrough
CT: control target
= control target key end

     0   :  { %s1764_s13 = smov 0   ;;  %s2799_s0 = inlined_call_operand.vmem [shape: s32[1,256], index: 0, kind: input, shape index: {}]   ;;  %s2800_s1 = inlined_call_operand.vmem [shape: s32[1,256], index: 1, kind: input, shape index: {}]   ;;  %s2801_s2 = inlined_call_operand.vmem [shape: f32[256,384], index: 2, kind: input, shape index: {}]   ;;  %s2802_s3 = inlined_call_operand.vmem [shape: f32[16,128], index: 3, kind: input, shape index: {}]   ;;  %s2803_s4 = inlined_call_operand.vmem [shape: f32[128,128], index: 4, kind: input, shape index: {}]   ;;  %s2804_s5 = inlined_call_operand.vmem [shape: f32[1,128], index: 5, kind: input, shape index: {}]   ;;  %s2805_s6 = inlined_call_operand.vmem [shape: f32[384,128], index: 6, kind: input, shape index: {}]   ;;  %s2806_s7 = inlined_call_operand.vmem [shape: f32[1,128], index: 7, kind: input, shape index: {}]   ;;  %s2807_s8 = inlined_call_operand.vmem [shape: f32[128,128], index: 8, kind: input, shape index: {}]   ;;  %s2808_s9 = inlined_call_operand.vmem [shape: f32[896,128], index: 9, kind: input, shape index: {}]   ;;  %s2809_s10 = inlined_call_operand.vmem [shape: f32[16,128], index: 10, kind: output, shape index: {}]  }
   0x1 LB: > { %s1770_s14 = sadd.s32 4294967295, %s1703_s13   ;;  %p1616_p0 = scmp.ge.s32.totalorder %s1703_s13, 1  ;;  %s1703_s13 = sphi %s1764_s13, %s20_s13  }
   0x2   : > { %p325_p1 = scmp.lt.s32.totalorder %s1703_s13, 3 }
   0x4   : > { %p326_p2 = pnand %p1616_p0, %p325_p1 }
   0x5   : > { %p365_p3 = scmp.lt.s32.totalorder (!%p326_p2), %s1770_s14, 1  ;;  %s1617_s15 = sshll.u32 (!%p326_p2), %s1770_s14, 4 }
   0x6   : > { %329 = sbr.rel (%p326_p2) target bundleno = 1053 (0x41d), region = 60  ;;  %p372_p4 = scmp.lt.s32.totalorder (!%p326_p2), %s1617_s15, 31 }
   0x7   : > { %p1619_p5 = scmp.ne.s32.totalorder (!%p326_p2), %s1770_s14, 0 }
   0xb   : > { %s1777_s16 = scalar_select %p365_p3, %s1770_s14, 1 }
   0xc   : > { %s2813_s15 = smov (!%p372_p4, %s1617_s15), 31  ;;  %382 = sbr.rel (%p1619_p5) target bundleno = 179 (0xb3), region = 64 }
   0xd   : > { %s367_s19 = scalar_lea.vmem %s2799_s0, %s1777_s16  ;;  %s370_s22 = scalar_lea.vmem %s2800_s1, %s1777_s16 }
   0xe   : > { %s1671_s23 = smul.u32 24, %s2813_s15 }
  0x10   : > { %s1790_s26 = scalar_lea.vmem %s2801_s2, %s1671_s23 }
  0x11   : > { %v400_v0 = vld [vmem:[%s2803_s4 + $0x78] sm:$0xff]  ;;  %v399_v1 = vld [vmem:[%s2803_s4 + $0x70] sm:$0xff]  ;;  %v398_v2 = vld [vmem:[%s2803_s4 + $0x68] sm:$0xff]  ;;  %v1705_v18 = vmov 0.0  }
  0x12   : > { %405 = vmatpush.msra.mxu0 %v400_v0  ;;  %1655 = vmatpush.msra.mxu1 %v400_v0  ;;  %v397_v3 = vld [vmem:[%s2803_s4 + $0x60] sm:$0xff]  ;;  %v396_v4 = vld [vmem:[%s2803_s4 + $0x58] sm:$0xff]  ;;  %v395_v5 = vld [vmem:[%s2803_s4 + $0x50] sm:$0xff]  ;;  %430 = vst [vmem:[#allocation3 + $0x8] sm:$0xff] %v1705_v18 }
  0x13   : > { %v394_v6 = vld [vmem:[%s2803_s4 + $0x48] sm:$0xff]  ;;  %v393_v7 = vld [vmem:[%s2803_s4 + $0x40] sm:$0xff]  ;;  %v392_v8 = vld [vmem:[%s2803_s4 + $0x38] sm:$0xff]  ;;  %431 = vst [vmem:[#allocation3] sm:$0xff] %v1705_v18 }
  0x14   : > { %406 = vmatpush.msra.mxu0 %v399_v1  ;;  %1656 = vmatpush.msra.mxu1 %v399_v1  ;;  %v391_v9 = vld [vmem:[%s2803_s4 + $0x30] sm:$0xff]  ;;  %v390_v10 = vld [vmem:[%s2803_s4 + $0x28] sm:$0xff]  ;;  %v389_v11 = vld [vmem:[%s2803_s4 + $0x20] sm:$0xff] }
  0x15   : > { %v388_v12 = vld [vmem:[%s2803_s4 + $0x18] sm:$0xff]  ;;  %v387_v13 = vld [vmem:[%s2803_s4 + $0x10] sm:$0xff]  ;;  %v386_v14 = vld [vmem:[%s2803_s4 + $0x8] sm:$0xff] }
  0x16   : > { %407 = vmatpush.msra.mxu0 %v398_v2  ;;  %1657 = vmatpush.msra.mxu1 %v398_v2  ;;  %v385_v15 = vld [vmem:[%s2803_s4] sm:$0xff]  ;;  %v384_v17 = vld [vmem:[%s2802_s3 + $0x8] sm:$0xff] }
  0x17   : > { %v383_v16 = vld [vmem:[%s2802_s3] sm:$0xff] }
  0x18   : > { %408 = vmatpush.msra.mxu0 %v397_v3  ;;  %1658 = vmatpush.msra.mxu1 %v397_v3  ;;  %v1685_v19 = vld [vmem:[%s2804_s5] ss:$0 sm:$0xff] }
  0x1a   : > { %409 = vmatpush.msra.mxu0 %v396_v4  ;;  %1659 = vmatpush.msra.mxu1 %v396_v4 }
  0x1c   : > { %410 = vmatpush.msra.mxu0 %v395_v5  ;;  %1660 = vmatpush.msra.mxu1 %v395_v5 }
  0x1e   : > { %411 = vmatpush.msra.mxu0 %v394_v6  ;;  %1661 = vmatpush.msra.mxu1 %v394_v6 }
  0x20   : > { %412 = vmatpush.msra.mxu0 %v393_v7  ;;  %1662 = vmatpush.msra.mxu1 %v393_v7 }
  0x22   : > { %413 = vmatpush.msra.mxu0 %v392_v8  ;;  %1663 = vmatpush.msra.mxu1 %v392_v8 }
  0x24   : > { %414 = vmatpush.msra.mxu0 %v391_v9  ;;  %1664 = vmatpush.msra.mxu1 %v391_v9 }
  0x26   : > { %415 = vmatpush.msra.mxu0 %v390_v10  ;;  %1665 = vmatpush.msra.mxu1 %v390_v10 }
  0x28   : > { %416 = vmatpush.msra.mxu0 %v389_v11  ;;  %1666 = vmatpush.msra.mxu1 %v389_v11 }
  0x2a   : > { %417 = vmatpush.msra.mxu0 %v388_v12  ;;  %1667 = vmatpush.msra.mxu1 %v388_v12 }
  0x2c   : > { %418 = vmatpush.msra.mxu0 %v387_v13  ;;  %1668 = vmatpush.msra.mxu1 %v387_v13 }
  0x2e   : > { %419 = vmatpush.msra.mxu0 %v386_v14  ;;  %1669 = vmatpush.msra.mxu1 %v386_v14 }
  0x30   : > { %420 = vmatpush.msra.mxu0 %v385_v15  ;;  %1670 = vmatpush.msra.mxu1 %v385_v15 }
  0x31   : > { %421 = vmatmul.f32.vlgmr.msra.gmra.mxu0 %v383_v16  ;;  %424 = vmatmul.f32.vlgmr.msra.gmra.mxu1 %v384_v17 }
  0xae   : > { %v422_v20 = vpop.f32.mrf.mxu0  ;;  %v425_v21 = vpop.f32.mrf.mxu1 }
  0xaf   : > { %v423_v22 = vadd.f32 %v1685_v19, %v422_v20  ;;  %v426_v23 = vadd.f32 %v1685_v19, %v425_v21 }
  0xb1   : > { %428 = vst [vmem:[#allocation2] sm:$0xff] %v423_v22 }
  0xb2   : > { %429 = vst [vmem:[#allocation2 + $0x8] sm:$0xff] %v426_v23 }
  0xb3 PF: > { %v729_v24 = vlaneseq  ;;  %v1686_v25 = vld [vmem:[%s367_s19] ss:$0 sm:$0xff]  ;;  %v527_v26 = vld [vmem:[%s2805_s6 + $0x178] sm:$0xff]  ;;  %v526_v28 = vld [vmem:[%s2805_s6 + $0x170] sm:$0xff]  ;;  %v1706_v38 = vmov 0.0   ;;  %vm767_vm2 = vcmask 130048  }
  0xb4   : > { %662 = vmatpush.msra.mxu2 %v527_v26  ;;  %v495_v27 = vld [vmem:[%s2805_s6 + $0x78] sm:$0xff]  ;;  %v494_v29 = vld [vmem:[%s2805_s6 + $0x70] sm:$0xff]  ;;  %v525_v32 = vld [vmem:[%s2805_s6 + $0x168] sm:$0xff]  ;;  %p1634_p6 = scmp.ne.s32.totalorder %s1770_s14, 1 }
  0xb5   : > { %v1867_v30 = vshrl.u32 %v729_v24, 7  ;;  %532 = vmatpush.msra.mxu0 %v495_v27  ;;  %v511_v31 = vld [vmem:[%s2805_s6 + $0xf8] sm:$0xff]  ;;  %v493_v33 = vld [vmem:[%s2805_s6 + $0x68] sm:$0xff]  ;;  %v510_v34 = vld [vmem:[%s2805_s6 + $0xf0] sm:$0xff] }
  0xb6   : > { %663 = vmatpush.msra.mxu2 %v526_v28  ;;  %597 = vmatpush.msra.mxu1 %v511_v31  ;;  %v524_v36 = vld [vmem:[%s2805_s6 + $0x160] sm:$0xff]  ;;  %v509_v37 = vld [vmem:[%s2805_s6 + $0xe8] sm:$0xff]  ;;  %v523_v41 = vld [vmem:[%s2805_s6 + $0x158] sm:$0xff] }
  0xb7   : > { %v1882_v35 = vadd.s32 8, %v1867_v30  ;;  %vm733_vm0 = vcmp.eq.s32.totalorder %v1867_v30, %v1686_v25  ;;  %533 = vmatpush.msra.mxu0 %v494_v29  ;;  %v492_v40 = vld [vmem:[%s2805_s6 + $0x60] sm:$0xff]  ;;  %v491_v44 = vld [vmem:[%s2805_s6 + $0x58] sm:$0xff]  ;;  %v522_v46 = vld [vmem:[%s2805_s6 + $0x150] sm:$0xff] }
  0xb8   : > { %v1620_v39 = vsel %vm733_vm0, 1.0, %v1706_v38  ;;  %664 = vmatpush.msra.mxu2 %v525_v32  ;;  %598 = vmatpush.msra.mxu1 %v510_v34  ;;  %v508_v42 = vld [vmem:[%s2805_s6 + $0xe0] sm:$0xff]  ;;  %v507_v47 = vld [vmem:[%s2805_s6 + $0xd8] sm:$0xff]  ;;  %v490_v48 = vld [vmem:[%s2805_s6 + $0x50] sm:$0xff] }
  0xb9   : > { %vm734_vm1 = vcmp.eq.s32.totalorder %v1882_v35, %v1686_v25  ;;  %534 = vmatpush.msra.mxu0 %v493_v33  ;;  %v521_v49 = vld [vmem:[%s2805_s6 + $0x148] sm:$0xff]  ;;  %v506_v50 = vld [vmem:[%s2805_s6 + $0xd0] sm:$0xff]  ;;  %v520_v52 = vld [vmem:[%s2805_s6 + $0x140] sm:$0xff] }
  0xba   : > { %v1621_v43 = vsel %vm734_vm1, 1.0, %v1706_v38  ;;  %665 = vmatpush.msra.mxu2 %v524_v36  ;;  %599 = vmatpush.msra.mxu1 %v509_v37  ;;  %v489_v51 = vld [vmem:[%s2805_s6 + $0x48] sm:$0xff]  ;;  %v488_v54 = vld [vmem:[%s2805_s6 + $0x40] sm:$0xff]  ;;  %v519_v55 = vld [vmem:[%s2805_s6 + $0x138] sm:$0xff] }
  0xbb   : > { %v739_v45 = vpack.c.bf16 %v1621_v43, %v1620_v39  ;;  %535 = vmatpush.msra.mxu0 %v492_v40  ;;  %v505_v53 = vld [vmem:[%s2805_s6 + $0xc8] sm:$0xff]  ;;  %v504_v56 = vld [vmem:[%s2805_s6 + $0xc0] sm:$0xff]  ;;  %v487_v57 = vld [vmem:[%s2805_s6 + $0x38] sm:$0xff] }
  0xbc   : > { %666 = vmatpush.msra.mxu2 %v523_v41  ;;  %600 = vmatpush.msra.mxu1 %v508_v42  ;;  %v518_v58 = vld [vmem:[%s2805_s6 + $0x130] sm:$0xff]  ;;  %v748_v59 = vld [vmem:[#allocation2] sm:$0xff]  ;;  %v503_v60 = vld [vmem:[%s2805_s6 + $0xb8] sm:$0xff] }
  0xbd   : > { %751 = vxpose.xlu0.c.b16.start.end [1/1] (short) %v739_v45, 128  ;;  %536 = vmatpush.msra.mxu0 %v491_v44  ;;  %v749_v61 = vld [vmem:[#allocation2 + $0x8] sm:$0xff]  ;;  %v486_v62 = vld [vmem:[%s2805_s6 + $0x30] sm:$0xff]  ;;  %v516_v3 = vld [vmem:[%s2805_s6 + $0x120] sm:$0xff] }
  0xbe   : > { %667 = vmatpush.msra.mxu2 %v522_v46  ;;  %601 = vmatpush.msra.mxu1 %v507_v47  ;;  %v750_v63 = vpack.c.bf16 %v749_v61, %v748_v59  ;;  %v517_v0 = vld [vmem:[%s2805_s6 + $0x128] sm:$0xff]  ;;  %v502_v1 = vld [vmem:[%s2805_s6 + $0xb0] sm:$0xff]  ;;  %v484_v5 = vld [vmem:[%s2805_s6 + $0x20] sm:$0xff] }
  0xbf   : > { %537 = vmatpush.msra.mxu0 %v490_v48  ;;  %v485_v2 = vld [vmem:[%s2805_s6 + $0x28] sm:$0xff]  ;;  %v515_v6 = vld [vmem:[%s2805_s6 + $0x118] sm:$0xff]  ;;  %v500_v7 = vld [vmem:[%s2805_s6 + $0xa0] sm:$0xff] }
  0xc0   : > { %668 = vmatpush.msra.mxu2 %v521_v49  ;;  %602 = vmatpush.msra.mxu1 %v506_v50  ;;  %v501_v4 = vld [vmem:[%s2805_s6 + $0xa8] sm:$0xff]  ;;  %v483_v8 = vld [vmem:[%s2805_s6 + $0x18] sm:$0xff]  ;;  %v514_v9 = vld [vmem:[%s2805_s6 + $0x110] sm:$0xff] }
  0xc1   : > { %538 = vmatpush.msra.mxu0 %v489_v51  ;;  %799 = vmatpush.bf16.msra.mxu3 %v750_v63  ;;  %v499_v10 = vld [vmem:[%s2805_s6 + $0x98] sm:$0xff]  ;;  %v482_v11 = vld [vmem:[%s2805_s6 + $0x10] sm:$0xff]  ;;  %v513_v12 = vld [vmem:[%s2805_s6 + $0x108] sm:$0xff] }
  0xc2   : > { %669 = vmatpush.msra.mxu2 %v520_v52  ;;  %603 = vmatpush.msra.mxu1 %v505_v53  ;;  %v498_v13 = vld [vmem:[%s2805_s6 + $0x90] sm:$0xff]  ;;  %v481_v14 = vld [vmem:[%s2805_s6 + $0x8] sm:$0xff]  ;;  %v512_v15 = vld [vmem:[%s2805_s6 + $0x100] sm:$0xff] }
  0xc3   : > { %539 = vmatpush.msra.mxu0 %v488_v54  ;;  %v434_v16 = vld [vmem:[%s1790_s26 + $0x10] sm:$0xff]  ;;  %v480_v17 = vld [vmem:[%s2805_s6] sm:$0xff]  ;;  %v497_v18 = vld [vmem:[%s2805_s6 + $0x88] sm:$0xff] }
  0xc4   : > { %670 = vmatpush.msra.mxu2 %v519_v55  ;;  %604 = vmatpush.msra.mxu1 %v504_v56  ;;  %v432_v19 = vld [vmem:[%s1790_s26] sm:$0xff]  ;;  %v433_v21 = vld [vmem:[%s1790_s26 + $0x8] sm:$0xff]  ;;  %v435_v23 = vld [vmem:[%s1790_s26 + $0x18] sm:$0xff] }
  0xc5   : > { %540 = vmatpush.msra.mxu0 %v487_v57  ;;  %v496_v20 = vld [vmem:[%s2805_s6 + $0x80] sm:$0xff]  ;;  %v437_v22 = vld [vmem:[%s1790_s26 + $0x28] sm:$0xff]  ;;  %v438_v26 = vld [vmem:[%s1790_s26 + $0x30] sm:$0xff] }
  0xc6   : > { %671 = vmatpush.msra.mxu2 %v518_v58  ;;  %605 = vmatpush.msra.mxu1 %v503_v60  ;;  %v440_v24 = vld [vmem:[%s1790_s26 + $0x40] sm:$0xff]  ;;  %v439_v27 = vld [vmem:[%s1790_s26 + $0x38] sm:$0xff]  ;;  %v441_v29 = vld [vmem:[%s1790_s26 + $0x48] sm:$0xff] }
  0xc7   : > { %541 = vmatpush.msra.mxu0 %v486_v62  ;;  %v436_v25 = vld [vmem:[%s1790_s26 + $0x20] sm:$0xff]  ;;  %v443_v28 = vld [vmem:[%s1790_s26 + $0x58] sm:$0xff]  ;;  %v446_v31 = vld [vmem:[%s1790_s26 + $0x70] sm:$0xff] }
  0xc8   : > { %672 = vmatpush.msra.mxu2 %v517_v0  ;;  %606 = vmatpush.msra.mxu1 %v502_v1  ;;  %v442_v32 = vld [vmem:[%s1790_s26 + $0x50] sm:$0xff]  ;;  %v444_v34 = vld [vmem:[%s1790_s26 + $0x60] sm:$0xff]  ;;  %v445_v36 = vld [vmem:[%s1790_s26 + $0x68] sm:$0xff] }
  0xc9   : > { %542 = vmatpush.msra.mxu0 %v485_v2  ;;  %v449_v37 = vld [vmem:[%s1790_s26 + $0x88] sm:$0xff]  ;;  %v447_v38 = vld [vmem:[%s1790_s26 + $0x78] sm:$0xff]  ;;  %v452_v39 = vld [vmem:[%s1790_s26 + $0xa0] sm:$0xff] }
  0xca   : > { %673 = vmatpush.msra.mxu2 %v516_v3  ;;  %607 = vmatpush.msra.mxu1 %v501_v4  ;;  %v448_v40 = vld [vmem:[%s1790_s26 + $0x80] sm:$0xff]  ;;  %v450_v42 = vld [vmem:[%s1790_s26 + $0x90] sm:$0xff]  ;;  %v451_v43 = vld [vmem:[%s1790_s26 + $0x98] sm:$0xff] }
  0xcb   : > { %543 = vmatpush.msra.mxu0 %v484_v5  ;;  %v455_v44 = vld [vmem:[%s1790_s26 + $0xb8] sm:$0xff]  ;;  %v453_v45 = vld [vmem:[%s1790_s26 + $0xa8] sm:$0xff]  ;;  %v458_v46 = vld [vmem:[%s1790_s26 + $0xd0] sm:$0xff] }
  0xcc   : > { %674 = vmatpush.msra.mxu2 %v515_v6  ;;  %608 = vmatpush.msra.mxu1 %v500_v7  ;;  %v454_v47 = vld [vmem:[%s1790_s26 + $0xb0] sm:$0xff]  ;;  %v456_v49 = vld [vmem:[%s1790_s26 + $0xc0] sm:$0xff]  ;;  %v457_v50 = vld [vmem:[%s1790_s26 + $0xc8] sm:$0xff] }
  0xcd   : > { %544 = vmatpush.msra.mxu0 %v483_v8  ;;  %v461_v51 = vld [vmem:[%s1790_s26 + $0xe8] sm:$0xff]  ;;  %v459_v52 = vld [vmem:[%s1790_s26 + $0xd8] sm:$0xff]  ;;  %v464_v53 = vld [vmem:[%s1790_s26 + $0x100] sm:$0xff] }
  0xce   : > { %675 = vmatpush.msra.mxu2 %v514_v9  ;;  %609 = vmatpush.msra.mxu1 %v499_v10  ;;  %v460_v54 = vld [vmem:[%s1790_s26 + $0xe0] sm:$0xff]  ;;  %v462_v56 = vld [vmem:[%s1790_s26 + $0xf0] sm:$0xff]  ;;  %v463_v57 = vld [vmem:[%s1790_s26 + $0xf8] sm:$0xff] }
  0xcf   : > { %545 = vmatpush.msra.mxu0 %v482_v11  ;;  %v467_v58 = vld [vmem:[%s1790_s26 + $0x118] sm:$0xff]  ;;  %v465_v59 = vld [vmem:[%s1790_s26 + $0x108] sm:$0xff]  ;;  %v470_v60 = vld [vmem:[%s1790_s26 + $0x130] sm:$0xff] }
  0xd0   : > { %676 = vmatpush.msra.mxu2 %v513_v12  ;;  %610 = vmatpush.msra.mxu1 %v498_v13  ;;  %v466_v61 = vld [vmem:[%s1790_s26 + $0x110] sm:$0xff]  ;;  %v468_v63 = vld [vmem:[%s1790_s26 + $0x120] sm:$0xff]  ;;  %v469_v0 = vld [vmem:[%s1790_s26 + $0x128] sm:$0xff] }
  0xd1   : > { %546 = vmatpush.msra.mxu0 %v481_v14  ;;  %v473_v1 = vld [vmem:[%s1790_s26 + $0x148] sm:$0xff]  ;;  %v471_v2 = vld [vmem:[%s1790_s26 + $0x138] sm:$0xff]  ;;  %v476_v3 = vld [vmem:[%s1790_s26 + $0x160] sm:$0xff] }
  0xd2   : > { %677 = vmatpush.msra.mxu2 %v512_v15  ;;  %611 = vmatpush.msra.mxu1 %v497_v18  ;;  %v472_v4 = vld [vmem:[%s1790_s26 + $0x140] sm:$0xff]  ;;  %v474_v6 = vld [vmem:[%s1790_s26 + $0x150] sm:$0xff]  ;;  %v475_v7 = vld [vmem:[%s1790_s26 + $0x158] sm:$0xff] }
  0xd3   : > { %678 = vmatmul.f32.vlgmr.msra.gmra.mxu2 %v434_v16  ;;  %547 = vmatpush.msra.mxu0 %v480_v17  ;;  %v479_v8 = vld [vmem:[%s1790_s26 + $0x178] sm:$0xff]  ;;  %v477_v9 = vld [vmem:[%s1790_s26 + $0x168] sm:$0xff]  ;;  %v478_v10 = vld [vmem:[%s1790_s26 + $0x170] sm:$0xff] }
  0xd4   : > { %548 = vmatmul.f32.vlgmr.msra.gmra.mxu0 %v432_v19  ;;  %612 = vmatpush.msra.mxu1 %v496_v20  ;;  %v2063_v11 = vld [vmem:[%s2806_s7] ss:$0 sm:$0xff] }
  0xd5   : > { %613 = vmatmul.f32.vlgmr.msra.gmra.mxu1 %v433_v21 }
  0xdb   : > { %681 = vmatmul.f32.gmra.mxu2 %v437_v22 }
  0xdc   : > { %551 = vmatmul.f32.gmra.mxu0 %v435_v23 }
  0xdd   : > { %616 = vmatmul.f32.gmra.mxu1 %v436_v25 }
  0xe3   : > { %684 = vmatmul.f32.gmra.mxu2 %v440_v24 }
  0xe4   : > { %554 = vmatmul.f32.gmra.mxu0 %v438_v26 }
  0xe5   : > { %619 = vmatmul.f32.gmra.mxu1 %v439_v27 }
  0xeb   : > { %687 = vmatmul.f32.gmra.mxu2 %v443_v28 }
  0xec   : > { %557 = vmatmul.f32.gmra.mxu0 %v441_v29 }
  0xed   : > { %622 = vmatmul.f32.gmra.mxu1 %v442_v32 }
  0xf3   : > { %690 = vmatmul.f32.gmra.mxu2 %v446_v31 }
  0xf4   : > { %560 = vmatmul.f32.gmra.mxu0 %v444_v34 }
  0xf5   : > { %625 = vmatmul.f32.gmra.mxu1 %v445_v36 }
  0xfb   : > { %693 = vmatmul.f32.gmra.mxu2 %v449_v37 }
  0xfc   : > { %563 = vmatmul.f32.gmra.mxu0 %v447_v38 }
  0xfd   : > { %628 = vmatmul.f32.gmra.mxu1 %v448_v40 }
 0x103   : > { %696 = vmatmul.f32.gmra.mxu2 %v452_v39 }
 0x104   : > { %566 = vmatmul.f32.gmra.mxu0 %v450_v42 }
 0x105   : > { %631 = vmatmul.f32.gmra.mxu1 %v451_v43 }
 0x10b   : > { %699 = vmatmul.f32.gmra.mxu2 %v455_v44 }
 0x10c   : > { %569 = vmatmul.f32.gmra.mxu0 %v453_v45 }
 0x10d   : > { %634 = vmatmul.f32.gmra.mxu1 %v454_v47 }
 0x113   : > { %702 = vmatmul.f32.gmra.mxu2 %v458_v46 }
 0x114   : > { %572 = vmatmul.f32.gmra.mxu0 %v456_v49 }
 0x115   : > { %637 = vmatmul.f32.gmra.mxu1 %v457_v50 }
 0x11b   : > { %705 = vmatmul.f32.gmra.mxu2 %v461_v51 }
 0x11c   : > { %575 = vmatmul.f32.gmra.mxu0 %v459_v52 }
 0x11d   : > { %640 = vmatmul.f32.gmra.mxu1 %v460_v54 }
 0x123   : > { %708 = vmatmul.f32.gmra.mxu2 %v464_v53 }
 0x124   : > { %578 = vmatmul.f32.gmra.mxu0 %v462_v56 }
 0x125   : > { %643 = vmatmul.f32.gmra.mxu1 %v463_v57 }
 0x12b   : > { %711 = vmatmul.f32.gmra.mxu2 %v467_v58 }
 0x12c   : > { %581 = vmatmul.f32.gmra.mxu0 %v465_v59 }
 0x12d   : > { %646 = vmatmul.f32.gmra.mxu1 %v466_v61 }
 0x133   : > { %714 = vmatmul.f32.gmra.mxu2 %v470_v60 }
 0x134   : > { %584 = vmatmul.f32.gmra.mxu0 %v468_v63 }
 0x135   : > { %649 = vmatmul.f32.gmra.mxu1 %v469_v0 }
 0x13b   : > { %717 = vmatmul.f32.gmra.mxu2 %v473_v1 }
 0x13c   : > { %587 = vmatmul.f32.gmra.mxu0 %v471_v2 }
 0x13d   : > { %652 = vmatmul.f32.gmra.mxu1 %v472_v4 }
 0x143   : > { %720 = vmatmul.f32.gmra.mxu2 %v476_v3 }
 0x144   : > { %590 = vmatmul.f32.gmra.mxu0 %v474_v6 }
 0x145   : > { %655 = vmatmul.f32.gmra.mxu1 %v475_v7 }
 0x14b   : > { %723 = vmatmul.f32.gmra.mxu2 %v479_v8 }
 0x14c   : > { %593 = vmatmul.f32.gmra.mxu0 %v477_v9 }
 0x14d   : > { %658 = vmatmul.f32.gmra.mxu1 %v478_v10 }
 0x151   : > { %v549_v13 = vpop.f32.mrf.mxu0 }
 0x152   : > { %v550_v14 = vadd.f32 %v2063_v11, %v549_v13  ;;  %v614_v16 = vpop.f32.mrf.mxu1 }
 0x154   : > { %v615_v17 = vadd.f32 %v614_v16, %v550_v14 }
 0x156   : > { %v679_v12 = vpop.f32.mrf.mxu2 }
 0x157   : > { %v680_v18 = vadd.f32 %v679_v12, %v615_v17 }
 0x159   : > { %v552_v20 = vpop.f32.mrf.mxu0 }
 0x15a   : > { %v553_v21 = vadd.f32 %v2063_v11, %v552_v20  ;;  %v617_v22 = vpop.f32.mrf.mxu1 }
 0x15c   : > { %v618_v23 = vadd.f32 %v617_v22, %v553_v21 }
 0x15e   : > { %v682_v19 = vpop.f32.mrf.mxu2 }
 0x15f   : > { %v683_v24 = vadd.f32 %v682_v19, %v618_v23 }
 0x161   : > { %v555_v26 = vpop.f32.mrf.mxu0 }
 0x162   : > { %v556_v27 = vadd.f32 %v2063_v11, %v555_v26  ;;  %v620_v29 = vpop.f32.mrf.mxu1 }
 0x164   : > { %v621_v31 = vadd.f32 %v620_v29, %v556_v27 }
 0x166   : > { %v685_v25 = vpop.f32.mrf.mxu2 }
 0x167   : > { %v686_v32 = vadd.f32 %v685_v25, %v621_v31 }
 0x169   : > { %v759_v33 = vpop.trf.xlu0  ;;  %v558_v34 = vpop.f32.mrf.mxu0 }
 0x16a   : > { %1624 = vmatmul.msk.bf16.vlgmr.msra.gmra.mxu3 %vm767_vm2, %v759_v33  ;;  %v559_v36 = vadd.f32 %v2063_v11, %v558_v34  ;;  %v623_v37 = vpop.f32.mrf.mxu1 }
 0x16c   : > { %v624_v38 = vadd.f32 %v623_v37, %v559_v36 }
 0x16e   : > { %v688_v33 = vpop.f32.mrf.mxu2 }
 0x16f   : > { %v689_v39 = vadd.f32 %v688_v33, %v624_v38 }
 0x172   : > { %v626_v43 = vpop.f32.mrf.mxu1 }
 0x176   : > { %v691_v40 = vpop.f32.mrf.mxu2 }
 0x179   : > { %v760_v41 = vpop.trf.xlu0 }
 0x17a   : > { %1625 = vmatmul.msk.bf16.gmra.mxu3 %vm767_vm2, %v760_v41  ;;  %v561_v41 = vpop.f32.mrf.mxu0  ;;  %v629_v51 = vpop.f32.mrf.mxu1 }
 0x17b   : > { %v562_v42 = vadd.f32 %v2063_v11, %v561_v41 }
 0x17d   : > { %v627_v44 = vadd.f32 %v626_v43, %v562_v42 }
 0x17f   : > { %v692_v45 = vadd.f32 %v691_v40, %v627_v44 }
 0x182   : > { %v564_v49 = vpop.f32.mrf.mxu0  ;;  %v632_v60 = vpop.f32.mrf.mxu1 }
 0x183   : > { %v565_v50 = vadd.f32 %v2063_v11, %v564_v49 }
 0x185   : > { %v630_v52 = vadd.f32 %v629_v51, %v565_v50 }
 0x189   : > { %v761_v48 = vpop.trf.xlu0 }
 0x18a   : > { %1626 = vmatmul.msk.bf16.gmra.mxu3 %vm767_vm2, %v761_v48  ;;  %v694_v48 = vpop.f32.mrf.mxu2  ;;  %v567_v57 = vpop.f32.mrf.mxu0 }
 0x18b   : > { %v695_v53 = vadd.f32 %v694_v48, %v630_v52  ;;  %v568_v58 = vadd.f32 %v2063_v11, %v567_v57  ;;  %v635_v4 = vpop.f32.mrf.mxu1 }
 0x18d   : > { %v633_v61 = vadd.f32 %v632_v60, %v568_v58 }
 0x192   : > { %v697_v56 = vpop.f32.mrf.mxu2  ;;  %v570_v1 = vpop.f32.mrf.mxu0 }
 0x193   : > { %v571_v3 = vadd.f32 %v2063_v11, %v570_v1  ;;  %v638_v13 = vpop.f32.mrf.mxu1 }
 0x199   : > { %v762_v55 = vpop.trf.xlu0 }
 0x19a   : > { %1627 = vmatmul.msk.bf16.gmra.mxu3 %vm767_vm2, %v762_v55  ;;  %v700_v2 = vpop.f32.mrf.mxu2  ;;  %v573_v9 = vpop.f32.mrf.mxu0 }
 0x19b   : > { %v574_v10 = vadd.f32 %v2063_v11, %v573_v9  ;;  %v641_v25 = vpop.f32.mrf.mxu1 }
 0x1a2   : > { %v703_v14 = vpop.f32.mrf.mxu2  ;;  %v576_v22 = vpop.f32.mrf.mxu0 }
 0x1a9   : > { %v763_v62 = vpop.trf.xlu0 }
 0x1aa   : > { %1628 = vmatmul.msk.bf16.gmra.mxu3 %vm767_vm2, %v763_v62  ;;  %v698_v62 = vadd.f32 %v697_v56, %v633_v61  ;;  %v706_v26 = vpop.f32.mrf.mxu2 }
 0x1b2   : > { %v709_v34 = vpop.f32.mrf.mxu2 }
 0x1b9   : > { %v764_v5 = vpop.trf.xlu0 }
 0x1ba   : > { %1629 = vmatmul.msk.bf16.gmra.mxu3 %vm767_vm2, %v764_v5  ;;  %v636_v5 = vadd.f32 %v635_v4, %v571_v3  ;;  %v712_v40 = vpop.f32.mrf.mxu2 }
 0x1bc   : > { %v701_v6 = vadd.f32 %v700_v2, %v636_v5 }
 0x1c2   : > { %v715_v44 = vpop.f32.mrf.mxu2 }
 0x1c9   : > { %v765_v15 = vpop.trf.xlu0 }
 0x1ca   : > { %1630 = vmatmul.msk.bf16.gmra.mxu3 %vm767_vm2, %v765_v15  ;;  %v639_v15 = vadd.f32 %v638_v13, %v574_v10  ;;  %v718_v49 = vpop.f32.mrf.mxu2  ;;  %v577_v13 = vadd.f32 %v2063_v11, %v576_v22 }
 0x1cc   : > { %v704_v16 = vadd.f32 %v703_v14, %v639_v15 }
 0x1d9   : > { %v766_v28 = vpop.trf.xlu0 }
 0x1da   : > { %1631 = vmatmul.msk.bf16.gmra.mxu3 %vm767_vm2, %v766_v28  ;;  %v579_v28 = vpop.f32.mrf.mxu0 }
 0x1e2   : > { %v582_v37 = vpop.f32.mrf.mxu0 }
 0x1e3   : > { %v583_v4 = vadd.f32 %v2063_v11, %v582_v37 }
 0x1ea   : > { %v585_v41 = vpop.f32.mrf.mxu0 }
 0x1ed   : > { %v801_v46 = vpop.f32.mrf.mxu3 }
 0x1ee   : > { %v2072_v47 = vmul.f32 %v801_v46, %v680_v18 }
 0x1f5   : > { %v803_v54 = vpop.f32.mrf.mxu3 }
 0x1f6   : > { %v2075_v55 = vmul.f32 %v803_v54, %v683_v24  ;;  %v721_v54 = vpop.f32.mrf.mxu2 }
 0x1f8   : > { %v857_v59 = vpack.c.bf16 %v2075_v55, %v2072_v47 }
 0x1fd   : > { %v806_v63 = vpop.f32.mrf.mxu3 }
 0x1fe   : > { %v2080_v0 = vmul.f32 %v806_v63, %v686_v32  ;;  %v644_v32 = vpop.f32.mrf.mxu1  ;;  %v586_v63 = vadd.f32 %v2063_v11, %v585_v41  ;;  %v724_v3 = vpop.f32.mrf.mxu2 }
 0x205   : > { %v808_v7 = vpop.f32.mrf.mxu3 }
 0x206   : > { %v2083_v8 = vmul.f32 %v808_v7, %v689_v39  ;;  %v647_v38 = vpop.f32.mrf.mxu1 }
 0x207   : > { %v648_v14 = vadd.f32 %v647_v38, %v583_v4 }
 0x208   : > { %v858_v12 = vpack.c.bf16 %v2083_v8, %v2080_v0 }
 0x20d   : > { %v811_v17 = vpop.f32.mrf.mxu3 }
 0x20e   : > { %v2088_v18 = vmul.f32 %v811_v17, %v692_v45  ;;  %v650_v43 = vpop.f32.mrf.mxu1  ;;  %v588_v45 = vpop.f32.mrf.mxu0 }
 0x20f   : > { %v589_v61 = vadd.f32 %v2063_v11, %v588_v45  ;;  %v651_v7 = vadd.f32 %v650_v43, %v586_v63 }
 0x215   : > { %v813_v19 = vpop.f32.mrf.mxu3 }
 0x216   : > { %v2090_v20 = vmul.f32 %v813_v19, %v695_v53  ;;  %v653_v48 = vpop.f32.mrf.mxu1  ;;  %v591_v51 = vpop.f32.mrf.mxu0  ;;  %v716_v19 = vadd.f32 %v715_v44, %v651_v7 }
 0x217   : > { %v592_v57 = vadd.f32 %v2063_v11, %v591_v51  ;;  %v654_v5 = vadd.f32 %v653_v48, %v589_v61 }
 0x218   : > { %v859_v21 = vpack.c.bf16 %v2090_v20, %v2088_v18  ;;  %v1707_v18 = vmov 1.0|1.0   ;;  %v865_v20 = vld [vmem:[#allocation3 + $0x8] sm:$0xff] }
 0x219   : > { %v719_v15 = vadd.f32 %v718_v49, %v654_v5 }
 0x21d   : > { %v816_v23 = vpop.f32.mrf.mxu3 }
 0x21e   : > { %v2094_v24 = vmul.f32 %v816_v23, %v698_v62  ;;  %v656_v52 = vpop.f32.mrf.mxu1  ;;  %v594_v56 = vpop.f32.mrf.mxu0 }
 0x21f   : > { %v595_v58 = vadd.f32 %v2063_v11, %v594_v56  ;;  %v657_v1 = vadd.f32 %v656_v52, %v592_v57 }
 0x221   : > { %v722_v9 = vadd.f32 %v721_v54, %v657_v1 }
 0x225   : > { %v818_v27 = vpop.f32.mrf.mxu3 }
 0x226   : > { %v2096_v29 = vmul.f32 %v818_v27, %v701_v6  ;;  %v659_v60 = vpop.f32.mrf.mxu1  ;;  %v580_v6 = vadd.f32 %v2063_v11, %v579_v28  ;;  %v642_v27 = vadd.f32 %v641_v25, %v577_v13  ;;  %v1688_v25 = vld [vmem:[%s370_s22] ss:$0 sm:$0xff] }
 0x227   : > { %v660_v2 = vadd.f32 %v659_v60, %v595_v58  ;;  %vm741_vm3 = vcmp.eq.s32.totalorder %v1867_v30, %v1688_v25  ;;  %vm742_vm4 = vcmp.eq.s32.totalorder %v1882_v35, %v1688_v25 }
 0x228   : > { %v860_v31 = vpack.c.bf16 %v2096_v29, %v2094_v24  ;;  %v645_v17 = vadd.f32 %v644_v32, %v580_v6  ;;  %v713_v29 = vadd.f32 %v712_v40, %v648_v14  ;;  %v707_v28 = vadd.f32 %v706_v26, %v642_v27  ;;  %vm1632_vm5 = vmpackc.low %vm742_vm4, %vm741_vm3 }
 0x229   : > { %v725_v10 = vadd.f32 %v724_v3, %v660_v2 }
 0x22a   : > { %v710_v37 = vadd.f32 %v709_v34, %v645_v17 }
 0x22d   : > { %v821_v33 = vpop.f32.mrf.mxu3 }
 0x22e   : > { %v849_v36 = vmul.f32 %v821_v33, %v704_v16 }
 0x235   : > { %v823_v39 = vpop.f32.mrf.mxu3 }
 0x236   : > { %v850_v11 = vmul.f32 %v823_v39, %v707_v28 }
 0x238   : > { %v861_v32 = vpack.c.bf16 %v850_v11, %v849_v36 }
 0x23d   : > { %v826_v42 = vpop.f32.mrf.mxu3 }
 0x23e   : > { %v851_v51 = vmul.f32 %v826_v42, %v710_v37 }
 0x245   : > { %v828_v46 = vpop.f32.mrf.mxu3 }
 0x246   : > { %v852_v43 = vmul.f32 %v828_v46, %v713_v29 }
 0x248   : > { %v862_v22 = vpack.c.bf16 %v852_v43, %v851_v51 }
 0x24d   : > { %v831_v50 = vpop.f32.mrf.mxu3 }
 0x24e   : > { %v853_v45 = vmul.f32 %v831_v50, %v716_v19 }
 0x255   : > { %v833_v53 = vpop.f32.mrf.mxu3 }
 0x256   : > { %v854_v33 = vmul.f32 %v833_v53, %v719_v15 }
 0x258   : > { %v863_v48 = vpack.c.bf16 %v854_v33, %v853_v45 }
 0x25d   : > { %v836_v62 = vpop.f32.mrf.mxu3 }
 0x25e   : > { %v855_v23 = vmul.f32 %v836_v62, %v722_v9 }
 0x265   : > { %v838_v16 = vpop.f32.mrf.mxu3 }
 0x266   : > { %v856_v24 = vmul.f32 %v838_v16, %v725_v10 }
 0x268   : > { %v864_v41 = vpack.c.bf16 %v856_v24, %v855_v23 }
 0x26a   : > { %867 = vmatpush.bf16.msrb.mxu3 %v864_v41 }
 0x26e   : > { %868 = vmatpush.bf16.msrb.mxu3 %v863_v48 }
 0x272   : > { %869 = vmatpush.bf16.msrb.mxu3 %v862_v22 }
 0x276   : > { %870 = vmatpush.bf16.msrb.mxu3 %v861_v32 }
 0x27a   : > { %871 = vmatpush.bf16.msrb.mxu3 %v860_v31  ;;  %v866_v31 = vld [vmem:[#allocation3] sm:$0xff] }
 0x27e   : > { %872 = vmatpush.bf16.msrb.mxu3 %v859_v21 }
 0x282   : > { %873 = vmatpush.bf16.msrb.mxu3 %v858_v12 }
 0x286   : > { %874 = vmatpush.bf16.msrb.mxu3 %v857_v59 }
 0x289   : > { %1633 = vmatmul.msk.bf16.vlgmr.msrb.gmra.mxu3 %vm1632_vm5, %v1707_v18 }
 0x30c   : > { %v876_v21 = vpop.f32.mrf.mxu3 }
 0x30d   : > { %v881_v26 = vadd.f32 %v876_v21, %v865_v20 }
 0x30f   : > { %883 = vst [vmem:[#allocation3 + $0x8] sm:$0xff] %v881_v26 }
 0x313   : > { %888 = sbr.rel (%p1634_p6) target bundleno = 1053 (0x41d), region = 68 }
 0x314   : > { %v878_v34 = vpop.f32.mrf.mxu3 }
 0x315   : > { %v882_v36 = vadd.f32 %v878_v34, %v866_v31 }
 0x317   : > { %884 = vst [vmem:[#allocation3] sm:$0xff] %v882_v36 }
 0x318   : > { %v1284_v30 = vld [vmem:[%s2808_s9 + $0x78] sm:$0xff]  ;;  %v1283_v47 = vld [vmem:[%s2808_s9 + $0x70] sm:$0xff]  ;;  %v1282_v8 = vld [vmem:[%s2808_s9 + $0x68] sm:$0xff] }
 0x319   : > { %v1316_v35 = vld [vmem:[%s2808_s9 + $0x178] sm:$0xff]  ;;  %1381 = vmatpush.msra.mxu0 %v1284_v30  ;;  %v1315_v59 = vld [vmem:[%s2808_s9 + $0x170] sm:$0xff]  ;;  %v1314_v38 = vld [vmem:[%s2808_s9 + $0x168] sm:$0xff] }
 0x31a   : > { %1427 = vmatpush.msra.mxu2 %v1316_v35  ;;  %v1300_v55 = vld [vmem:[%s2808_s9 + $0xf8] sm:$0xff]  ;;  %v1299_v12 = vld [vmem:[%s2808_s9 + $0xf0] sm:$0xff]  ;;  %v1298_v40 = vld [vmem:[%s2808_s9 + $0xe8] sm:$0xff] }
 0x31b   : > { %v1332_v0 = vld [vmem:[%s2808_s9 + $0x1f8] sm:$0xff]  ;;  %1404 = vmatpush.msra.mxu1 %v1300_v55  ;;  %1382 = vmatpush.msra.mxu0 %v1283_v47  ;;  %v1331_v39 = vld [vmem:[%s2808_s9 + $0x1f0] sm:$0xff]  ;;  %v1281_v42 = vld [vmem:[%s2808_s9 + $0x60] sm:$0xff] }
 0x31c   : > { %1450 = vmatpush.msra.mxu3 %v1332_v0  ;;  %1428 = vmatpush.msra.mxu2 %v1315_v59  ;;  %v1313_v44 = vld [vmem:[%s2808_s9 + $0x160] sm:$0xff]  ;;  %v1330_v46 = vld [vmem:[%s2808_s9 + $0x1e8] sm:$0xff]  ;;  %v1280_v52 = vld [vmem:[%s2808_s9 + $0x58] sm:$0xff] }
 0x31d   : > { %1405 = vmatpush.msra.mxu1 %v1299_v12  ;;  %1383 = vmatpush.msra.mxu0 %v1282_v8  ;;  %v1297_v49 = vld [vmem:[%s2808_s9 + $0xe0] sm:$0xff]  ;;  %v1312_v53 = vld [vmem:[%s2808_s9 + $0x158] sm:$0xff]  ;;  %v1279_v57 = vld [vmem:[%s2808_s9 + $0x50] sm:$0xff] }
 0x31e   : > { %1451 = vmatpush.msra.mxu3 %v1331_v39  ;;  %1429 = vmatpush.msra.mxu2 %v1314_v38  ;;  %v1329_v50 = vld [vmem:[%s2808_s9 + $0x1e0] sm:$0xff]  ;;  %v1296_v54 = vld [vmem:[%s2808_s9 + $0xd8] sm:$0xff]  ;;  %v1311_v58 = vld [vmem:[%s2808_s9 + $0x150] sm:$0xff]  ;;  %v1708_v39 = vmov 0.0  }
 0x31f   : > { %1406 = vmatpush.msra.mxu1 %v1298_v40  ;;  %1384 = vmatpush.msra.mxu0 %v1281_v42  ;;  %v1328_v56 = vld [vmem:[%s2808_s9 + $0x1d8] sm:$0xff]  ;;  %v1295_v60 = vld [vmem:[%s2808_s9 + $0xd0] sm:$0xff]  ;;  %v1278_v62 = vld [vmem:[%s2808_s9 + $0x48] sm:$0xff] }
 0x320   : > { %1452 = vmatpush.msra.mxu3 %v1330_v46  ;;  %1430 = vmatpush.msra.mxu2 %v1313_v44  ;;  %v1327_v61 = vld [vmem:[%s2808_s9 + $0x1d0] sm:$0xff]  ;;  %v1310_v63 = vld [vmem:[%s2808_s9 + $0x148] sm:$0xff]  ;;  %v1277_v3 = vld [vmem:[%s2808_s9 + $0x40] sm:$0xff] }
 0x321   : > { %1407 = vmatpush.msra.mxu1 %v1297_v49  ;;  %1385 = vmatpush.msra.mxu0 %v1280_v52  ;;  %v1294_v1 = vld [vmem:[%s2808_s9 + $0xc8] sm:$0xff]  ;;  %v1309_v4 = vld [vmem:[%s2808_s9 + $0x140] sm:$0xff]  ;;  %v1276_v7 = vld [vmem:[%s2808_s9 + $0x38] sm:$0xff] }
 0x322   : > { %1453 = vmatpush.msra.mxu3 %v1329_v50  ;;  %1431 = vmatpush.msra.mxu2 %v1312_v53  ;;  %v1326_v2 = vld [vmem:[%s2808_s9 + $0x1c8] sm:$0xff]  ;;  %v1293_v5 = vld [vmem:[%s2808_s9 + $0xc0] sm:$0xff]  ;;  %v1308_v9 = vld [vmem:[%s2808_s9 + $0x138] sm:$0xff] }
 0x323   : > { %1408 = vmatpush.msra.mxu1 %v1296_v54  ;;  %1386 = vmatpush.msra.mxu0 %v1279_v57  ;;  %v1325_v6 = vld [vmem:[%s2808_s9 + $0x1c0] sm:$0xff]  ;;  %v1292_v10 = vld [vmem:[%s2808_s9 + $0xb8] sm:$0xff]  ;;  %v1275_v14 = vld [vmem:[%s2808_s9 + $0x30] sm:$0xff] }
 0x324   : > { %1454 = vmatpush.msra.mxu3 %v1328_v56  ;;  %1432 = vmatpush.msra.mxu2 %v1311_v58  ;;  %v1324_v13 = vld [vmem:[%s2808_s9 + $0x1b8] sm:$0xff]  ;;  %v1307_v15 = vld [vmem:[%s2808_s9 + $0x130] sm:$0xff]  ;;  %v1274_v19 = vld [vmem:[%s2808_s9 + $0x28] sm:$0xff] }
 0x325   : > { %1409 = vmatpush.msra.mxu1 %v1295_v60  ;;  %1387 = vmatpush.msra.mxu0 %v1278_v62  ;;  %v1291_v16 = vld [vmem:[%s2808_s9 + $0xb0] sm:$0xff]  ;;  %v1306_v23 = vld [vmem:[%s2808_s9 + $0x128] sm:$0xff]  ;;  %v1273_v29 = vld [vmem:[%s2808_s9 + $0x20] sm:$0xff] }
 0x326   : > { %1455 = vmatpush.msra.mxu3 %v1327_v61  ;;  %1433 = vmatpush.msra.mxu2 %v1310_v63  ;;  %v1323_v17 = vld [vmem:[%s2808_s9 + $0x1b0] sm:$0xff]  ;;  %v1290_v24 = vld [vmem:[%s2808_s9 + $0xa8] sm:$0xff]  ;;  %v1305_v33 = vld [vmem:[%s2808_s9 + $0x120] sm:$0xff] }
 0x327   : > { %1410 = vmatpush.msra.mxu1 %v1294_v1  ;;  %1388 = vmatpush.msra.mxu0 %v1277_v3  ;;  %v1322_v27 = vld [vmem:[%s2808_s9 + $0x1a8] sm:$0xff]  ;;  %v1289_v41 = vld [vmem:[%s2808_s9 + $0xa0] sm:$0xff]  ;;  %v1272_v45 = vld [vmem:[%s2808_s9 + $0x18] sm:$0xff] }
 0x328   : > { %1456 = vmatpush.msra.mxu3 %v1326_v2  ;;  %1434 = vmatpush.msra.mxu2 %v1309_v4  ;;  %v1321_v37 = vld [vmem:[%s2808_s9 + $0x1a0] sm:$0xff]  ;;  %v1304_v28 = vld [vmem:[%s2808_s9 + $0x118] sm:$0xff]  ;;  %v1271_v51 = vld [vmem:[%s2808_s9 + $0x10] sm:$0xff] }
 0x329   : > { %1411 = vmatpush.msra.mxu1 %v1293_v5  ;;  %1389 = vmatpush.msra.mxu0 %v1276_v7  ;;  %v1288_v43 = vld [vmem:[%s2808_s9 + $0x98] sm:$0xff]  ;;  %v1303_v11 = vld [vmem:[%s2808_s9 + $0x110] sm:$0xff]  ;;  %v1270_v25 = vld [vmem:[%s2808_s9 + $0x8] sm:$0xff] }
 0x32a   : > { %1457 = vmatpush.msra.mxu3 %v1325_v6  ;;  %1435 = vmatpush.msra.mxu2 %v1308_v9  ;;  %v1320_v48 = vld [vmem:[%s2808_s9 + $0x198] sm:$0xff]  ;;  %v1287_v22 = vld [vmem:[%s2808_s9 + $0x90] sm:$0xff]  ;;  %v1302_v18 = vld [vmem:[%s2808_s9 + $0x108] sm:$0xff] }
 0x32b   : > { %1412 = vmatpush.msra.mxu1 %v1292_v10  ;;  %1390 = vmatpush.msra.mxu0 %v1275_v14  ;;  %v1319_v32 = vld [vmem:[%s2808_s9 + $0x190] sm:$0xff]  ;;  %v1286_v20 = vld [vmem:[%s2808_s9 + $0x88] sm:$0xff]  ;;  %v1269_v26 = vld [vmem:[%s2808_s9] sm:$0xff] }
 0x32c   : > { %1458 = vmatpush.msra.mxu3 %v1324_v13  ;;  %1436 = vmatpush.msra.mxu2 %v1307_v15  ;;  %v1318_v21 = vld [vmem:[%s2808_s9 + $0x188] sm:$0xff]  ;;  %v1301_v31 = vld [vmem:[%s2808_s9 + $0x100] sm:$0xff]  ;;  %v1348_v34 = vld [vmem:[%s2808_s9 + $0x278] sm:$0xff] }
 0x32d   : > { %1413 = vmatpush.msra.mxu1 %v1291_v16  ;;  %1391 = vmatpush.msra.mxu0 %v1274_v19  ;;  %v1380_v36 = vld [vmem:[%s2808_s9 + $0x378] sm:$0xff]  ;;  %v1285_v30 = vld [vmem:[%s2808_s9 + $0x80] sm:$0xff]  ;;  %v1347_v55 = vld [vmem:[%s2808_s9 + $0x270] sm:$0xff] }
 0x32e   : > { %1459 = vmatpush.msra.mxu3 %v1323_v17  ;;  %1437 = vmatpush.msra.mxu2 %v1306_v23  ;;  %v1317_v35 = vld [vmem:[%s2808_s9 + $0x180] sm:$0xff]  ;;  %v2322_v47 = vld [vmem:[#allocation3 + $0x8] sm:$0xff]  ;;  %v1379_v0 = vld [vmem:[%s2808_s9 + $0x370] sm:$0xff] }
 0x32f   : > { %1414 = vmatpush.msra.mxu1 %v1290_v24  ;;  %1392 = vmatpush.msra.mxu0 %v1273_v29  ;;  %v1364_v59 = vld [vmem:[%s2808_s9 + $0x2f8] sm:$0xff]  ;;  %vm963_vm6 = vcmp.ge.f32.partialorder %v2322_v47, -1.5  ;;  %vm965_vm7 = vcmp.lt.f32.partialorder %v2322_v47, -1.0  ;;  %vm971_vm8 = vcmp.ge.f32.partialorder %v2322_v47, -1.0  ;;  %vm973_vm9 = vcmp.lt.f32.partialorder %v2322_v47, -0.5  ;;  %v1346_v12 = vld [vmem:[%s2808_s9 + $0x268] sm:$0xff] }
 0x330   : > { %1460 = vmatpush.msra.mxu3 %v1322_v27  ;;  %1438 = vmatpush.msra.mxu2 %v1305_v33  ;;  %v946_v8 = vld [vmem:[%s2807_s8 + $0x78] sm:$0xff]  ;;  %vm967_vm10 = vmand %vm963_vm6, %vm965_vm7  ;;  %vm979_vm11 = vcmp.ge.f32.partialorder %v2322_v47, -0.5  ;;  %vm981_vm12 = vcmp.lt.f32.partialorder %v2322_v47, 0.0  ;;  %vm987_vm13 = vcmp.ge.f32.partialorder %v2322_v47, 0.0  ;;  %vm989_vm14 = vcmp.lt.f32.partialorder %v2322_v47, 0.5  ;;  %v1363_v38 = vld [vmem:[%s2808_s9 + $0x2f0] sm:$0xff] }
 0x331   : > { %1415 = vmatpush.msra.mxu1 %v1289_v41  ;;  %1393 = vmatpush.msra.mxu0 %v1272_v45  ;;  %v2351_v40 = vsel %vm967_vm10, 1.0, %v1708_v39  ;;  %vm975_vm15 = vmand %vm971_vm8, %vm973_vm9  ;;  %v2358_v42 = vadd.f32 1.5, %v2322_v47  ;;  %v2361_v44 = vsub.f32 -0.5, %v2322_v47  ;;  %v2364_v46 = vadd.f32 1.0, %v2322_v47  ;;  %v1378_v49 = vld [vmem:[%s2808_s9 + $0x368] sm:$0xff]  ;;  %v945_v50 = vld [vmem:[%s2807_s8 + $0x70] sm:$0xff] }
 0x332   : > { %1461 = vmatpush.msra.mxu3 %v1321_v37  ;;  %1439 = vmatpush.msra.mxu2 %v1304_v28  ;;  %v977_v52 = vsel %vm975_vm15, 1.0, %v1708_v39  ;;  %vm983_vm0 = vmand %vm979_vm11, %vm981_vm12  ;;  %v2378_v53 = vsub.f32 0.0, %v2322_v47  ;;  %v2381_v54 = vadd.f32 0.5, %v2322_v47  ;;  %v2384_v56 = vsub.f32 0.5, %v2322_v47  ;;  %v1345_v57 = vld [vmem:[%s2808_s9 + $0x260] sm:$0xff]  ;;  %v1362_v58 = vld [vmem:[%s2808_s9 + $0x2e8] sm:$0xff] }
 0x333   : > { %1416 = vmatpush.msra.mxu1 %v1288_v43  ;;  %1394 = vmatpush.msra.mxu0 %v1271_v51  ;;  %v985_v60 = vsel %vm983_vm0, 1.0, %v1708_v39  ;;  %vm991_vm1 = vmand %vm987_vm13, %vm989_vm14  ;;  %v1057_v61 = vmul.f32 2.0, %v2358_v42  ;;  %v1063_v62 = vmul.f32 2.0, %v2361_v44  ;;  %v1071_v63 = vmul.f32 2.0, %v2364_v46  ;;  %v1377_v1 = vld [vmem:[%s2808_s9 + $0x360] sm:$0xff]  ;;  %v944_v2 = vld [vmem:[%s2807_s8 + $0x68] sm:$0xff] }
 0x334   : > { %1462 = vmatpush.msra.mxu3 %v1320_v48  ;;  %1440 = vmatpush.msra.mxu2 %v1303_v11  ;;  %v2407_v3 = vsel %vm991_vm1, 1.0, %v1708_v39  ;;  %v1077_v4 = vmul.f32 2.0, %v2378_v53  ;;  %v1085_v5 = vmul.f32 2.0, %v2381_v54  ;;  %v1091_v6 = vmul.f32 2.0, %v2384_v56  ;;  %v1344_v7 = vld [vmem:[%s2808_s9 + $0x258] sm:$0xff]  ;;  %v1361_v9 = vld [vmem:[%s2808_s9 + $0x2e0] sm:$0xff] }
 0x335   : > { %1417 = vmatpush.msra.mxu1 %v1287_v22  ;;  %1395 = vmatpush.msra.mxu0 %v1270_v25  ;;  %v1059_v10 = vmul.f32 %v1057_v61, %v2351_v40  ;;  %v1065_v13 = vmul.f32 %v1063_v62, %v977_v52  ;;  %v1073_v14 = vmul.f32 %v1071_v63, %v977_v52  ;;  %v2420_v15 = vmul.f32 0.6666667, %v2358_v42  ;;  %v1376_v16 = vld [vmem:[%s2808_s9 + $0x358] sm:$0xff]  ;;  %v943_v17 = vld [vmem:[%s2807_s8 + $0x60] sm:$0xff]  ;;  %v1343_v29 = vld [vmem:[%s2808_s9 + $0x250] sm:$0xff] }
 0x336   : > { %1463 = vmatpush.msra.mxu3 %v1319_v32  ;;  %1441 = vmatpush.msra.mxu2 %v1302_v18  ;;  %v1079_v19 = vmul.f32 %v1077_v4, %v985_v60  ;;  %v1087_v23 = vmul.f32 %v1085_v5, %v985_v60  ;;  %v1093_v24 = vmul.f32 %v1091_v6, %v2407_v3  ;;  %v1223_v27 = vmul.f32 0.6666667, %v2384_v56  ;;  %v1360_v33 = vld [vmem:[%s2808_s9 + $0x2d8] sm:$0xff]  ;;  %v1375_v37 = vld [vmem:[%s2808_s9 + $0x350] sm:$0xff]  ;;  %v1342_v51 = vld [vmem:[%s2808_s9 + $0x248] sm:$0xff] }
 0x337   : > { %1418 = vmatpush.msra.mxu1 %v1286_v20  ;;  %1396 = vmatpush.msra.mxu0 %v1269_v26  ;;  %v1067_v41 = vadd.f32 %v1065_v13, %v1059_v10  ;;  %vm947_vm2 = vcmp.ge.f32.partialorder %v2322_v47, -2.5  ;;  %vm949_vm3 = vcmp.lt.f32.partialorder %v2322_v47, -2.0  ;;  %vm955_vm4 = vcmp.ge.f32.partialorder %v2322_v47, -2.0  ;;  %v942_v45 = vld [vmem:[%s2807_s8 + $0x58] sm:$0xff]  ;;  %v1359_v11 = vld [vmem:[%s2808_s9 + $0x2d0] sm:$0xff]  ;;  %v1374_v20 = vld [vmem:[%s2808_s9 + $0x348] sm:$0xff] }
 0x338   : > { %1464 = vmatpush.msra.mxu3 %v1318_v21  ;;  %1442 = vmatpush.msra.mxu2 %v1301_v31  ;;  %v1081_v28 = vadd.f32 %v1079_v19, %v1073_v14  ;;  %v2445_v43 = vadd.f32 %v1093_v24, %v1087_v23  ;;  %vm951_vm5 = vmand %vm947_vm2, %vm949_vm3  ;;  %vm957_vm6 = vcmp.lt.f32.partialorder %v2322_v47, -1.5  ;;  %v2449_v48 = vadd.f32 2.5, %v2322_v47  ;;  %v941_v21 = vld [vmem:[%s2807_s8 + $0x50] sm:$0xff]  ;;  %v1340_v61 = vld [vmem:[%s2808_s9 + $0x238] sm:$0xff] }
 0x339   : > { %1473 = vmatpush.msrb.mxu0 %v1348_v34  ;;  %1419 = vmatpush.msra.mxu1 %v1285_v30  ;;  %v1163_v22 = vmul.f32 %v2358_v42, %v1067_v41  ;;  %v953_v32 = vsel %vm951_vm5, 1.0, %v1708_v39  ;;  %vm959_vm7 = vmand %vm955_vm4, %vm957_vm6  ;;  %v1033_v25 = vsub.f32 -1.5, %v2322_v47  ;;  %v2463_v18 = vadd.f32 2.0, %v2322_v47  ;;  %v1341_v30 = vld [vmem:[%s2808_s9 + $0x240] sm:$0xff]  ;;  %v1372_v4 = vld [vmem:[%s2808_s9 + $0x338] sm:$0xff] }
 0x33a   : > { %1519 = vmatpush.msrb.mxu2 %v1380_v36  ;;  %1465 = vmatpush.msra.mxu3 %v1317_v35  ;;  %v1165_v26 = vmul.f32 %v1081_v28, %v2378_v53  ;;  %v1169_v31 = vmul.f32 %v2364_v46, %v1081_v28  ;;  %v1171_v34 = vmul.f32 %v2445_v43, %v2384_v56  ;;  %v961_v36 = vsel %vm959_vm7, 1.0, %v1708_v39  ;;  %v1358_v35 = vld [vmem:[%s2808_s9 + $0x2c8] sm:$0xff]  ;;  %v1373_v42 = vld [vmem:[%s2808_s9 + $0x340] sm:$0xff]  ;;  %v1356_v10 = vld [vmem:[%s2808_s9 + $0x2b8] sm:$0xff] }
 0x33b   : > { %1474 = vmatpush.msrb.mxu0 %v1347_v55  ;;  %1496 = vmatpush.msrb.mxu1 %v1364_v59  ;;  %v1029_v55 = vmul.f32 2.0, %v2449_v48  ;;  %v1035_v59 = vmul.f32 2.0, %v1033_v25  ;;  %v2499_v52 = vmul.f32 0.6666667, %v2449_v48  ;;  %v1357_v62 = vld [vmem:[%s2808_s9 + $0x2c0] sm:$0xff]  ;;  %vm995_vm8 = vcmp.ge.f32.partialorder %v2322_v47, 0.5 }
 0x33c   : > { %1520 = vmatpush.msrb.mxu2 %v1379_v0  ;;  %1542 = vmatpush.msrb.mxu3 %v946_v8  ;;  %v1043_v0 = vmul.f32 2.0, %v2463_v18  ;;  %v1047_v8 = vsub.f32 -1.0, %v2322_v47  ;;  %v939_v5 = vld [vmem:[%s2807_s8 + $0x40] sm:$0xff]  ;;  %vm997_vm9 = vcmp.lt.f32.partialorder %v2322_v47, 1.0  ;;  %v1371_v13 = vld [vmem:[%s2808_s9 + $0x330] sm:$0xff]  ;;  %v1338_v19 = vld [vmem:[%s2808_s9 + $0x228] sm:$0xff] }
 0x33d   : > { %1475 = vmatpush.msrb.mxu0 %v1346_v12  ;;  %1497 = vmatpush.msrb.mxu1 %v1363_v38  ;;  %v2485_v12 = vadd.f32 %v1165_v26, %v1163_v22  ;;  %v2487_v38 = vadd.f32 %v1171_v34, %v1169_v31  ;;  %v1031_v56 = vmul.f32 %v1029_v55, %v953_v32  ;;  %vm999_vm10 = vmand %vm995_vm8, %vm997_vm9  ;;  %v1213_v22 = vmul.f32 0.6666667, %v2378_v53  ;;  %v937_v32 = vld [vmem:[%s2807_s8 + $0x30] sm:$0xff]  ;;  %v1354_v53 = vld [vmem:[%s2808_s9 + $0x2a8] sm:$0xff] }
 0x33e   : > { %1521 = vmatpush.msrb.mxu2 %v1378_v49  ;;  %1543 = vmatpush.msrb.mxu3 %v945_v50  ;;  %v940_v49 = vld [vmem:[%s2807_s8 + $0x48] sm:$0xff]  ;;  %v2496_v50 = vmul.f32 %v1067_v41, %v2361_v44  ;;  %v1049_v60 = vmul.f32 2.0, %v1047_v8 }
 0x33f   : > { %1476 = vmatpush.msrb.mxu0 %v1345_v57  ;;  %1498 = vmatpush.msrb.mxu1 %v1362_v58  ;;  %v1037_v57 = vmul.f32 %v1035_v59, %v961_v36  ;;  %v1045_v58 = vmul.f32 %v1043_v0, %v961_v36  ;;  %v1221_v63 = vmul.f32 %v2420_v15, %v2485_v12  ;;  %v2534_v15 = vadd.f32 -0.5, %v2322_v47  ;;  %v1370_v41 = vld [vmem:[%s2808_s9 + $0x328] sm:$0xff] }
 0x340   : > { %1522 = vmatpush.msrb.mxu2 %v1377_v1  ;;  %1544 = vmatpush.msrb.mxu3 %v944_v2  ;;  %v1225_v1 = vmul.f32 %v1223_v27, %v2487_v38  ;;  %v2511_v2 = vmul.f32 0.6666667, %v2361_v44  ;;  %v1097_v44 = vmul.f32 2.0, %v2322_v47  ;;  %v1001_v27 = vsel %vm999_vm10, 1.0, %v1708_v39  ;;  %v936_v36 = vld [vmem:[%s2807_s8 + $0x28] sm:$0xff] }
 0x341   : > { %1477 = vmatpush.msrb.mxu0 %v1344_v7  ;;  %1499 = vmatpush.msrb.mxu1 %v1361_v9  ;;  %v1039_v6 = vadd.f32 %v1037_v57, %v1031_v56  ;;  %v1051_v7 = vmul.f32 %v1049_v60, %v2351_v40  ;;  %v1339_v9 = vld [vmem:[%s2808_s9 + $0x230] sm:$0xff]  ;;  %v1101_v40 = vsub.f32 1.0, %v2322_v47  ;;  %v1111_v28 = vmul.f32 2.0, %v2534_v15 }
 0x342   : > { %1523 = vmatpush.msrb.mxu2 %v1376_v16  ;;  %1545 = vmatpush.msrb.mxu3 %v943_v17  ;;  %v1227_v14 = vadd.f32 %v1225_v1, %v1221_v63  ;;  %v2538_v16 = vmul.f32 %v2381_v54, %v2445_v43  ;;  %v938_v17 = vld [vmem:[%s2807_s8 + $0x38] sm:$0xff]  ;;  %v1229_v43 = vmul.f32 0.6666667, %v2364_v46  ;;  %v1337_v46 = vld [vmem:[%s2808_s9 + $0x220] sm:$0xff]  ;;  %v1215_v34 = vmul.f32 %v1213_v22, %v2485_v12 }
 0x343   : > { %1478 = vmatpush.msrb.mxu0 %v1343_v29  ;;  %1500 = vmatpush.msrb.mxu1 %v1360_v33  ;;  %v1053_v23 = vadd.f32 %v1051_v7, %v1045_v58  ;;  %v1151_v24 = vmul.f32 %v2449_v48, %v1039_v6  ;;  %v1099_v29 = vmul.f32 %v1097_v44, %v2407_v3  ;;  %v1355_v33 = vld [vmem:[%s2808_s9 + $0x2b0] sm:$0xff]  ;;  %v2559_v48 = vmul.f32 0.6666667, %v1101_v40  ;;  %v1352_v6 = vld [vmem:[%s2808_s9 + $0x298] sm:$0xff]  ;;  %v1365_v22 = vld [vmem:[%s2808_s9 + $0x300] sm:$0xff] }
 0x344   : > { %1524 = vmatpush.msrb.mxu2 %v1375_v37  ;;  %1546 = vmatpush.msrb.mxu3 %v942_v45  ;;  %v2555_v37 = vld [vmem:[#allocation3] sm:$0xff]  ;;  %v1103_v45 = vmul.f32 2.0, %v1101_v40 }
 0x345   : > { %1479 = vmatpush.msrb.mxu0 %v1342_v51  ;;  %1501 = vmatpush.msrb.mxu1 %v1359_v11  ;;  %v1153_v3 = vmul.f32 %v1053_v23, %v1047_v8  ;;  %v1157_v51 = vmul.f32 %v2463_v18, %v1053_v23  ;;  %v1209_v11 = vmul.f32 0.6666667, %v2463_v18  ;;  %vm964_vm11 = vcmp.ge.f32.partialorder %v2555_v37, -1.5  ;;  %v1369_v18 = vld [vmem:[%s2808_s9 + $0x320] sm:$0xff] }
 0x346   : > { %1525 = vmatpush.msrb.mxu2 %v1374_v20  ;;  %1547 = vmatpush.msrb.mxu3 %v941_v21  ;;  %v1105_v25 = vmul.f32 %v1103_v45, %v1001_v27  ;;  %v2570_v20 = vmul.f32 %v1111_v28, %v1001_v27  ;;  %v2573_v21 = vmul.f32 %v1229_v43, %v2487_v38  ;;  %vm966_vm12 = vcmp.lt.f32.partialorder %v2555_v37, -1.0  ;;  %v1366_v27 = vld [vmem:[%s2808_s9 + $0x308] sm:$0xff]  ;;  %v933_v28 = vld [vmem:[%s2807_s8 + $0x10] sm:$0xff]  ;;  %v1333_v43 = vld [vmem:[%s2808_s9 + $0x200] sm:$0xff] }
 0x347   : > { %1480 = vmatpush.msrb.mxu0 %v1341_v30  ;;  %1502 = vmatpush.msrb.mxu1 %v1358_v35  ;;  %v1155_v26 = vadd.f32 %v1153_v3, %v1151_v24  ;;  %v1161_v31 = vadd.f32 %v2496_v50, %v1157_v51  ;;  %vm968_vm13 = vmand %vm964_vm11, %vm966_vm12  ;;  %vm972_vm14 = vcmp.ge.f32.partialorder %v2555_v37, -1.0  ;;  %vm974_vm15 = vcmp.lt.f32.partialorder %v2555_v37, -0.5  ;;  %v1336_v50 = vld [vmem:[%s2808_s9 + $0x218] sm:$0xff]  ;;  %v1351_v24 = vld [vmem:[%s2808_s9 + $0x290] sm:$0xff] }
 0x348   : > { %1526 = vmatpush.msrb.mxu2 %v1373_v42  ;;  %1548 = vmatpush.msrb.mxu3 %v940_v49  ;;  %v2588_v30 = vadd.f32 %v1105_v25, %v1099_v29  ;;  %vm980_vm0 = vcmp.ge.f32.partialorder %v2555_v37, -0.5  ;;  %v2596_v0 = vsel %vm968_vm13, 1.0, %v1708_v39  ;;  %vm976_vm1 = vmand %vm972_vm14, %vm974_vm15  ;;  %vm982_vm2 = vcmp.lt.f32.partialorder %v2555_v37, 0.0  ;;  %v932_v25 = vld [vmem:[%s2807_s8 + $0x8] sm:$0xff] }
 0x349   : > { %1481 = vmatpush.msrb.mxu0 %v1340_v61  ;;  %1503 = vmatpush.msrb.mxu1 %v1357_v62  ;;  %v1201_v35 = vmul.f32 %v2499_v52, %v1155_v26  ;;  %v1205_v55 = vmul.f32 %v2511_v2, %v1161_v31  ;;  %v1211_v59 = vmul.f32 %v1209_v11, %v1161_v31  ;;  %v978_v12 = vsel %vm976_vm1, 1.0, %v1708_v39  ;;  %vm984_vm4 = vmand %vm980_vm0, %vm982_vm2  ;;  %v1353_v52 = vld [vmem:[%s2808_s9 + $0x2a0] sm:$0xff]  ;;  %v1368_v61 = vld [vmem:[%s2808_s9 + $0x318] sm:$0xff] }
 0x34a   : > { %1527 = vmatpush.msrb.mxu2 %v1372_v4  ;;  %1549 = vmatpush.msrb.mxu3 %v939_v5  ;;  %v1177_v8 = vmul.f32 %v2588_v30, %v1101_v40  ;;  %vm988_vm3 = vcmp.ge.f32.partialorder %v2555_v37, 0.0  ;;  %vm990_vm5 = vcmp.lt.f32.partialorder %v2555_v37, 0.5  ;;  %v2606_v49 = vadd.f32 1.5, %v2555_v37  ;;  %v935_v62 = vld [vmem:[%s2807_s8 + $0x20] sm:$0xff]  ;;  %v1335_v5 = vld [vmem:[%s2808_s9 + $0x210] sm:$0xff]  ;;  %v1334_v40 = vld [vmem:[%s2808_s9 + $0x208] sm:$0xff] }
 0x34b   : > { %1443 = vmatmul.f32.vlgmr.msra.gmra.mxu2 %v1227_v14  ;;  %1482 = vmatpush.msrb.mxu0 %v1339_v9  ;;  %v1207_v38 = vadd.f32 %v1205_v55, %v1201_v35  ;;  %v1217_v42 = vadd.f32 %v1215_v34, %v1211_v59  ;;  %v986_v57 = vsel %vm984_vm4, 1.0, %v1708_v39  ;;  %vm992_vm6 = vmand %vm988_vm3, %vm990_vm5  ;;  %v2619_v58 = vsub.f32 -0.5, %v2555_v37  ;;  %v934_v14 = vld [vmem:[%s2807_s8 + $0x18] sm:$0xff]  ;;  %v1350_v11 = vld [vmem:[%s2808_s9 + $0x288] sm:$0xff] }
 0x34c   : > { %1504 = vmatpush.msrb.mxu1 %v1356_v10  ;;  %1528 = vmatpush.msrb.mxu2 %v1371_v13  ;;  %v2615_v56 = vadd.f32 %v1177_v8, %v2538_v16  ;;  %v2622_v60 = vadd.f32 1.0, %v2555_v37  ;;  %v2631_v63 = vsel %vm992_vm6, 1.0, %v1708_v39  ;;  %v1058_v1 = vmul.f32 2.0, %v2606_v49  ;;  %v1367_v13 = vld [vmem:[%s2808_s9 + $0x310] sm:$0xff] }
 0x34d   : > { %1550 = vmatpush.msrb.mxu3 %v938_v17  ;;  %1483 = vmatpush.msrb.mxu0 %v1338_v19  ;;  %v2635_v2 = vsub.f32 0.0, %v2555_v37  ;;  %v2638_v4 = vadd.f32 0.5, %v2555_v37  ;;  %v1064_v44 = vmul.f32 2.0, %v2619_v58  ;;  %v1090_v10 = vsub.f32 0.5, %v2555_v37 }
 0x34e   : > { %1505 = vmatpush.msrb.mxu1 %v1355_v33  ;;  %1529 = vmatpush.msrb.mxu2 %v1370_v41  ;;  %v1235_v7 = vmul.f32 %v2559_v48, %v2615_v56  ;;  %v1072_v9 = vmul.f32 2.0, %v2622_v60  ;;  %v1060_v16 = vmul.f32 %v1058_v1, %v2596_v0  ;;  %v1220_v23 = vmul.f32 0.6666667, %v2606_v49 }
 0x34f   : > { %1551 = vmatpush.msrb.mxu3 %v937_v32  ;;  %1484 = vmatpush.msrb.mxu0 %v1337_v46  ;;  %v1078_v17 = vmul.f32 2.0, %v2635_v2  ;;  %v1086_v19 = vmul.f32 2.0, %v2638_v4  ;;  %v1066_v33 = vmul.f32 %v1064_v44, %v978_v12  ;;  %v1092_v45 = vmul.f32 2.0, %v1090_v10 }
 0x350   : > { %1506 = vmatpush.msrb.mxu1 %v1354_v53  ;;  %1530 = vmatpush.msrb.mxu2 %v1369_v18  ;;  %v1237_v29 = vadd.f32 %v1235_v7, %v2573_v21  ;;  %v1074_v41 = vmul.f32 %v1072_v9, %v978_v12  ;;  %v1224_v51 = vmul.f32 0.6666667, %v1090_v10  ;;  %vm948_vm7 = vcmp.ge.f32.partialorder %v2555_v37, -2.5 }
 0x351   : > { %1552 = vmatpush.msrb.mxu3 %v936_v36  ;;  %1485 = vmatpush.msrb.mxu0 %v1336_v50  ;;  %v1080_v48 = vmul.f32 %v1078_v17, %v986_v57  ;;  %v1088_v3 = vmul.f32 %v1086_v19, %v986_v57  ;;  %v1068_v32 = vadd.f32 %v1066_v33, %v1060_v16  ;;  %vm950_vm8 = vcmp.lt.f32.partialorder %v2555_v37, -2.0  ;;  %v1349_v50 = vld [vmem:[%s2808_s9 + $0x280] sm:$0xff] }
 0x352   : > { %1507 = vmatpush.msrb.mxu1 %v1353_v52  ;;  %1397 = vmatmul.f32.vlgmr.msra.gmra.mxu0 %v1207_v38  ;;  %v1094_v46 = vmul.f32 %v1092_v45, %v2631_v63  ;;  %vm956_vm9 = vcmp.ge.f32.partialorder %v2555_v37, -2.0  ;;  %vm952_vm10 = vmand %vm948_vm7, %vm950_vm8  ;;  %vm958_vm11 = vcmp.lt.f32.partialorder %v2555_v37, -1.5  ;;  %v1638_v53 = vadd.f32 2.5, %v2555_v37  ;;  %v931_v52 = vld [vmem:[%s2807_s8] sm:$0xff] }
 0x353   : > { %1420 = vmatmul.f32.vlgmr.msra.gmra.mxu1 %v1217_v42  ;;  %1531 = vmatpush.msrb.mxu2 %v1368_v61  ;;  %v1082_v21 = vadd.f32 %v1080_v48, %v1074_v41  ;;  %v1034_v18 = vsub.f32 -1.5, %v2555_v37  ;;  %v1164_v31 = vmul.f32 %v2606_v49, %v1068_v32  ;;  %v954_v34 = vsel %vm952_vm10, 1.0, %v1708_v39  ;;  %vm960_vm12 = vmand %vm956_vm9, %vm958_vm11 }
 0x354   : > { %1553 = vmatpush.msrb.mxu3 %v935_v62  ;;  %1486 = vmatpush.msrb.mxu0 %v1335_v5  ;;  %v1096_v26 = vadd.f32 %v1094_v46, %v1088_v3  ;;  %v1640_v36 = vadd.f32 2.0, %v2555_v37  ;;  %v962_v59 = vsel %vm960_vm12, 1.0, %v1708_v39  ;;  %v1030_v8 = vmul.f32 2.0, %v1638_v53 }
 0x355   : > { %1508 = vmatpush.msrb.mxu1 %v1352_v6  ;;  %1532 = vmatpush.msrb.mxu2 %v1367_v13  ;;  %v1166_v35 = vmul.f32 %v1082_v21, %v2635_v2  ;;  %v1170_v55 = vmul.f32 %v2622_v60, %v1082_v21  ;;  %v1036_v38 = vmul.f32 2.0, %v1034_v18  ;;  %v1048_v49 = vsub.f32 -1.0, %v2555_v37 }
 0x356   : > { %1554 = vmatpush.msrb.mxu3 %v934_v14  ;;  %1487 = vmatpush.msrb.mxu0 %v1334_v40  ;;  %v1172_v12 = vmul.f32 %v1096_v26, %v1090_v10  ;;  %v1044_v42 = vmul.f32 2.0, %v1640_v36  ;;  %v1032_v61 = vmul.f32 %v1030_v8, %v954_v34  ;;  %v1160_v62 = vmul.f32 %v1068_v32, %v2619_v58 }
 0x357   : > { %1509 = vmatpush.msrb.mxu1 %v1351_v24  ;;  %1466 = vmatmul.f32.vlgmr.msra.gmra.mxu3 %v1237_v29  ;;  %v1168_v57 = vadd.f32 %v1166_v35, %v1164_v31  ;;  %v1038_v5 = vmul.f32 %v1036_v38, %v962_v59  ;;  %v1050_v7 = vmul.f32 2.0, %v1048_v49  ;;  %v1200_v9 = vmul.f32 0.6666667, %v1638_v53 }
 0x358   : > { %1533 = vmatpush.msrb.mxu2 %v1366_v27  ;;  %1555 = vmatpush.msrb.mxu3 %v933_v28  ;;  %v1174_v1 = vadd.f32 %v1172_v12, %v1170_v55  ;;  %v1046_v6 = vmul.f32 %v1044_v42, %v962_v59  ;;  %vm996_vm13 = vcmp.ge.f32.partialorder %v2555_v37, 0.5  ;;  %vm998_vm14 = vcmp.lt.f32.partialorder %v2555_v37, 1.0 }
 0x359   : > { %1488 = vmatpush.msrb.mxu0 %v1333_v43  ;;  %1510 = vmatpush.msrb.mxu1 %v1350_v11  ;;  %v1222_v44 = vmul.f32 %v1220_v23, %v1168_v57  ;;  %v1040_v13 = vadd.f32 %v1038_v5, %v1032_v61  ;;  %v1052_v14 = vmul.f32 %v1050_v7, %v2596_v0  ;;  %vm1000_vm15 = vmand %vm996_vm13, %vm998_vm14  ;;  %v1098_v40 = vmul.f32 2.0, %v2555_v37 }
 0x35a   : > { %1534 = vmatpush.msrb.mxu2 %v1365_v22  ;;  %1556 = vmatpush.msrb.mxu3 %v932_v25  ;;  %v1226_v10 = vmul.f32 %v1224_v51, %v1174_v1  ;;  %v1204_v16 = vmul.f32 0.6666667, %v2619_v58  ;;  %v2713_v17 = vsel %vm1000_vm15, 1.0, %v1708_v39  ;;  %v1102_v19 = vsub.f32 1.0, %v2555_v37 }
 0x35b   : > { %1511 = vmatpush.msrb.mxu1 %v1349_v50  ;;  %v1230_v23 = vmul.f32 0.6666667, %v2622_v60  ;;  %v1054_v27 = vadd.f32 %v1052_v14, %v1046_v6  ;;  %v1152_v29 = vmul.f32 %v1638_v53, %v1040_v13  ;;  %v1176_v33 = vmul.f32 %v2638_v4, %v1096_v26 }
 0x35c   : > { %1557 = vmatpush.msrb.mxu3 %v931_v52  ;;  %v1228_v24 = vadd.f32 %v1226_v10, %v1222_v44  ;;  %v1100_v41 = vmul.f32 %v1098_v40, %v2631_v63  ;;  %v1104_v0 = vmul.f32 2.0, %v1102_v19  ;;  %v1210_v28 = vmul.f32 0.6666667, %v1640_v36 }
 0x35d   : > { %v1232_v45 = vmul.f32 %v1230_v23, %v1174_v1  ;;  %v1154_v43 = vmul.f32 %v1054_v27, %v1048_v49  ;;  %v1158_v58 = vmul.f32 %v1640_v36, %v1054_v27  ;;  %v1214_v48 = vmul.f32 0.6666667, %v2635_v2 }
 0x35e   : > { %1446 = vmatmul.f32.gmra.mxu2 %v1228_v24  ;;  %vm1003_vm0 = vcmp.ge.f32.partialorder %v2322_v47, 1.0  ;;  %v1106_v3 = vmul.f32 %v1104_v0, %v2713_v17  ;;  %v1234_v60 = vmul.f32 0.6666667, %v1102_v19  ;;  %vm1005_vm1 = vcmp.lt.f32.partialorder %v2322_v47, 1.5 }
 0x35f   : > { %v1115_v51 = vsub.f32 1.5, %v2322_v47  ;;  %v1156_v11 = vadd.f32 %v1154_v43, %v1152_v29  ;;  %v1162_v22 = vadd.f32 %v1160_v62, %v1158_v58  ;;  %v1216_v63 = vmul.f32 %v1214_v48, %v1168_v57  ;;  %vm1007_vm2 = vmand %vm1003_vm0, %vm1005_vm1 }
 0x360   : > { %v1181_v32 = vmul.f32 %v2588_v30, %v2322_v47  ;;  %v2726_v46 = vadd.f32 %v1106_v3, %v1100_v41  ;;  %v1009_v2 = vsel %vm1007_vm2, 1.0, %v1708_v39  ;;  %v1239_v21 = vmul.f32 0.6666667, %v2381_v54 }
 0x361   : > { %v1117_v25 = vmul.f32 2.0, %v1115_v51  ;;  %v1202_v53 = vmul.f32 %v1200_v9, %v1156_v11  ;;  %v1206_v18 = vmul.f32 %v1204_v16, %v1162_v22  ;;  %v1212_v26 = vmul.f32 %v1210_v28, %v1162_v22 }
 0x362   : > { %v1243_v31 = vmul.f32 0.6666667, %v1115_v51  ;;  %v1178_v34 = vmul.f32 %v2726_v46, %v1102_v19  ;;  %vm1011_vm3 = vcmp.ge.f32.partialorder %v2322_v47, 1.5  ;;  %vm1013_vm4 = vcmp.lt.f32.partialorder %v2322_v47, 2.0 }
 0x363   : > { %v1119_v36 = vmul.f32 %v1117_v25, %v1009_v2  ;;  %v1208_v35 = vadd.f32 %v1206_v18, %v1202_v53  ;;  %v1218_v30 = vadd.f32 %v1216_v63, %v1212_v26  ;;  %vm1015_vm5 = vmand %vm1011_vm3, %vm1013_vm4  ;;  %vm1019_vm6 = vcmp.ge.f32.partialorder %v2322_v47, 2.0 }
 0x364   : > { %vm1021_vm7 = vcmp.lt.f32.partialorder %v2322_v47, 2.5  ;;  %v2735_v55 = vadd.f32 %v1178_v34, %v1176_v33  ;;  %v1241_v59 = vmul.f32 %v1239_v21, %v2615_v56  ;;  %v1649_v8 = vadd.f32 -1.0, %v2322_v47 }
 0x365   : > { %v1121_v54 = vadd.f32 %v1119_v36, %v2570_v20  ;;  %vm1023_vm8 = vmand %vm1019_vm6, %vm1021_vm7  ;;  %1400 = vmatmul.f32.gmra.mxu0 %v1208_v35  ;;  %1423 = vmatmul.f32.gmra.mxu1 %v1218_v30  ;;  %v1017_v12 = vsel %vm1015_vm5, 1.0, %v1708_v39  ;;  %v1129_v38 = vsub.f32 2.0, %v2322_v47  ;;  %v1651_v42 = vadd.f32 -1.5, %v2322_v47 }
 0x366   : > { %v1143_v49 = vsub.f32 2.5, %v2322_v47  ;;  %v1236_v50 = vmul.f32 %v1234_v60, %v2735_v55  ;;  %v1025_v20 = vsel %vm1023_vm8, 1.0, %v1708_v39  ;;  %v1125_v57 = vmul.f32 2.0, %v1649_v8 }
 0x367   : > { %v1183_v52 = vmul.f32 %v1121_v54, %v1115_v51  ;;  %v1131_v56 = vmul.f32 2.0, %v1129_v38  ;;  %v1139_v61 = vmul.f32 2.0, %v1651_v42  ;;  %v1187_v1 = vmul.f32 %v2534_v15, %v1121_v54 }
 0x368   : > { %v1145_v62 = vmul.f32 2.0, %v1143_v49  ;;  %v1238_v5 = vadd.f32 %v1236_v50, %v1232_v45  ;;  %v1127_v7 = vmul.f32 %v1125_v57, %v1009_v2  ;;  %v1259_v44 = vmul.f32 0.6666667, %v2534_v15 }
 0x369   : > { %v1185_v6 = vadd.f32 %v1183_v52, %v1181_v32  ;;  %v1133_v9 = vmul.f32 %v1131_v56, %v1017_v12  ;;  %v1141_v10 = vmul.f32 %v1139_v61, %v1017_v12  ;;  %v1263_v14 = vmul.f32 0.6666667, %v1143_v49 }
 0x36a   : > { %v1147_v13 = vmul.f32 %v1145_v62, %v1025_v20  ;;  %1469 = vmatmul.f32.gmra.mxu3 %v1238_v5  ;;  %v1249_v16 = vmul.f32 0.6666667, %v2322_v47  ;;  %v1635_v19 = vmul.f32 -1.442695, %v2322_v47  ;;  %vm1004_vm9 = vcmp.ge.f32.partialorder %v2555_v37, 1.0 }
 0x36b   : > { %v1245_v40 = vmul.f32 %v1243_v31, %v1185_v6  ;;  %v1135_v23 = vadd.f32 %v1133_v9, %v1127_v7  ;;  %v1253_v27 = vmul.f32 0.6666667, %v1129_v38  ;;  %vm1006_vm10 = vcmp.lt.f32.partialorder %v2555_v37, 1.5 }
 0x36c   : > { %v1149_v24 = vadd.f32 %v1147_v13, %v1141_v10  ;;  %1689 = vpow2.f32 %v1635_v19  ;;  %vm1008_vm11 = vmand %vm1004_vm9, %vm1006_vm10  ;;  %v2753_v15 = vadd.f32 -0.5, %v2555_v37  ;;  %v1116_v33 = vsub.f32 1.5, %v2555_v37 }
 0x36d   : > { %v1247_v29 = vadd.f32 %v1245_v40, %v1241_v59  ;;  %v1189_v41 = vmul.f32 %v1135_v23, %v1129_v38  ;;  %v1193_v0 = vmul.f32 %v1649_v8, %v1135_v23  ;;  %v1010_v28 = vsel %vm1008_vm11, 1.0, %v1708_v39 }
 0x36e   : > { %v1195_v45 = vmul.f32 %v1149_v24, %v1143_v49  ;;  %v1112_v43 = vmul.f32 2.0, %v2753_v15  ;;  %v1118_v58 = vmul.f32 2.0, %v1116_v33  ;;  %v1251_v60 = vmul.f32 %v1249_v16, %v1185_v6 }
 0x36f   : > { %1489 = vmatmul.f32.vlgmr.msrb.gmra.mxu0 %v1247_v29  ;;  %v1191_v48 = vadd.f32 %v1189_v41, %v1187_v1  ;;  %vm1012_vm12 = vcmp.ge.f32.partialorder %v2555_v37, 1.5  ;;  %v1182_v22 = vmul.f32 %v2726_v46, %v2555_v37  ;;  %vm1014_vm13 = vcmp.lt.f32.partialorder %v2555_v37, 2.0 }
 0x370   : > { %v1197_v3 = vadd.f32 %v1195_v45, %v1193_v0  ;;  %v1114_v51 = vmul.f32 %v1112_v43, %v2713_v17  ;;  %v1120_v11 = vmul.f32 %v1118_v58, %v1010_v28  ;;  %v1240_v25 = vmul.f32 0.6666667, %v2638_v4  ;;  %vm2764_vm14 = vmand %vm1012_vm12, %vm1014_vm13 }
 0x371   : > { %v1261_v63 = vmul.f32 %v1259_v44, %v1191_v48  ;;  %v1255_v2 = vmul.f32 %v1253_v27, %v1191_v48  ;;  %vm1020_vm15 = vcmp.ge.f32.partialorder %v2555_v37, 2.0  ;;  %vm1022_vm0 = vcmp.lt.f32.partialorder %v2555_v37, 2.5 }
 0x372   : > { %v1265_v32 = vmul.f32 %v1263_v14, %v1197_v3  ;;  %v1690_v21 = vpop.eup %1689  ;;  %v1122_v53 = vadd.f32 %v1120_v11, %v1114_v51  ;;  %v1650_v17 = vadd.f32 -1.0, %v2555_v37  ;;  %v1130_v34 = vsub.f32 2.0, %v2555_v37  ;;  %vm1024_vm1 = vmand %vm1020_vm15, %vm1022_vm0 }
 0x373   : > { %v1257_v26 = vadd.f32 %v1255_v2, %v1251_v60  ;;  %v897_v31 = vadd.f32 1.0, %v1690_v21  ;;  %v1244_v35 = vmul.f32 0.6666667, %v1116_v33  ;;  %v1652_v30 = vadd.f32 -1.5, %v2555_v37 }
 0x374   : > { %v1267_v46 = vadd.f32 %v1265_v32, %v1261_v63  ;;  %v1184_v36 = vmul.f32 %v1122_v53, %v1116_v33  ;;  %v1126_v4 = vmul.f32 2.0, %v1650_v17  ;;  %v1242_v54 = vmul.f32 %v1240_v25, %v2735_v55 }
 0x375   : > { %1512 = vmatmul.f32.vlgmr.msrb.gmra.mxu1 %v1257_v26  ;;  %1691 = vrcp.f32 %v897_v31  ;;  %v1018_v59 = vsel %vm2764_vm14, 1.0, %v1708_v39  ;;  %v1132_v38 = vmul.f32 2.0, %v1130_v34  ;;  %v1140_v42 = vmul.f32 2.0, %v1652_v30 }
 0x376   : > { %1535 = vmatmul.f32.vlgmr.msrb.gmra.mxu2 %v1267_v46  ;;  %v1186_v8 = vadd.f32 %v1184_v36, %v1182_v22  ;;  %v1128_v12 = vmul.f32 %v1126_v4, %v1010_v28  ;;  %v1144_v49 = vsub.f32 2.5, %v2555_v37  ;;  %v1026_v52 = vsel %vm1024_vm1, 1.0, %v1708_v39 }
 0x377   : > { %v1134_v20 = vmul.f32 %v1132_v38, %v1018_v59  ;;  %v1142_v55 = vmul.f32 %v1140_v42, %v1018_v59  ;;  %v1188_v56 = vmul.f32 %v2753_v15, %v1122_v53  ;;  %v1250_v1 = vmul.f32 0.6666667, %v2555_v37 }
 0x378   : > { %v1246_v50 = vmul.f32 %v1244_v35, %v1186_v8  ;;  %v1146_v57 = vmul.f32 2.0, %v1144_v49  ;;  %v1636_v5 = vmul.f32 -1.442695, %v2555_v37  ;;  %vm904_vm2 = vweird.f32 %v897_v31 }
 0x379   : > { %v1136_v62 = vadd.f32 %v1134_v20, %v1128_v12  ;;  %v908_v7 = vand.u32 2147483647, %v897_v31  ;;  %v910_v10 = vand.u32 2147483648, %v897_v31  ;;  %v1254_v39 = vmul.f32 0.6666667, %v1130_v34 }
 0x37a   : > { %v1248_v61 = vadd.f32 %v1246_v50, %v1242_v54  ;;  %v1148_v44 = vmul.f32 %v1146_v57, %v1026_v52  ;;  %v1260_v16 = vmul.f32 0.6666667, %v2753_v15  ;;  %1693 = vpow2.f32 %v1636_v5 }
 0x37b   : > { %v1692_v6 = vpop.eup %1691  ;;  %v1190_v13 = vmul.f32 %v1136_v62, %v1130_v34  ;;  %v1194_v40 = vmul.f32 %v1650_v17, %v1136_v62  ;;  %v1252_v24 = vmul.f32 %v1250_v1, %v1186_v8  ;;  %v1264_v29 = vmul.f32 0.6666667, %v1144_v49 }
 0x37c   : > { %v900_v9 = vmul.f32 %v1692_v6, %v897_v31  ;;  %1492 = vmatmul.f32.gmra.mxu0 %v1248_v61  ;;  %v1150_v14 = vadd.f32 %v1148_v44, %v1142_v55  ;;  %vm905_vm3 = vweird.f32 %v1692_v6  ;;  %v911_v0 = vor.u32 1.1754944e-38, %v910_v10 }
 0x37d   : > { %v1192_v23 = vadd.f32 %v1190_v13, %v1188_v56  ;;  %vm906_vm4 = vmor %vm904_vm2, %vm905_vm3  ;;  %vm909_vm5 = vcmp.eq.f32.partialorder %v908_v7, 8.507059e+37 }
 0x37e   : > { %v901_v19 = vsub.f32 1.0, %v900_v9  ;;  %v1196_v27 = vmul.f32 %v1150_v14, %v1144_v49 }
 0x37f   : > { %v1256_v41 = vmul.f32 %v1254_v39, %v1192_v23  ;;  %v1262_v28 = vmul.f32 %v1260_v16, %v1192_v23 }
 0x380   : > { %v902_v33 = vmul.f32 %v1692_v6, %v901_v19  ;;  %v1198_v45 = vadd.f32 %v1196_v27, %v1194_v40  ;;  %v1694_v48 = vpop.eup %1693 }
 0x381   : > { %v1258_v58 = vadd.f32 %v1256_v41, %v1252_v24  ;;  %v898_v60 = vadd.f32 1.0, %v1694_v48 }
 0x382   : > { %v903_v43 = vadd.f32 %v1692_v6, %v902_v33  ;;  %v1266_v3 = vmul.f32 %v1264_v29, %v1198_v45 }
 0x383   : > { %1515 = vmatmul.f32.gmra.mxu1 %v1258_v58  ;;  %1695 = vrcp.f32 %v898_v60  ;;  %v925_v2 = vand.u32 2147483648, %v898_v60  ;;  %vm919_vm6 = vweird.f32 %v898_v60  ;;  %v923_v21 = vand.u32 2147483647, %v898_v60 }
 0x384   : > { %v907_v15 = vsel %vm906_vm4, %v1692_v6, %v903_v43  ;;  %v1268_v11 = vadd.f32 %v1266_v3, %v1262_v28 }
 0x385   : > { %v912_v51 = vsel %vm909_vm5, %v911_v0, %v907_v15  ;;  %v926_v18 = vor.u32 1.1754944e-38, %v925_v2  ;;  %vm924_vm9 = vcmp.eq.f32.partialorder %v923_v21, 8.507059e+37 }
 0x386   : > { %v929_v22 = vmul.f32 %v912_v51, %v2322_v47  ;;  %1538 = vmatmul.f32.gmra.mxu2 %v1268_v11 }
 0x388   : > { %1558 = vmatmul.f32.vlgmr.msrb.gmra.mxu3 %v929_v22 }
 0x389   : > { %v1696_v63 = vpop.eup %1695 }
 0x38a   : > { %v915_v32 = vmul.f32 %v1696_v63, %v898_v60  ;;  %vm920_vm7 = vweird.f32 %v1696_v63 }
 0x38b   : > { %vm921_vm8 = vmor %vm919_vm6, %vm920_vm7 }
 0x38c   : > { %v916_v25 = vsub.f32 1.0, %v915_v32 }
 0x38e   : > { %v917_v53 = vmul.f32 %v1696_v63, %v916_v25 }
 0x390   : > { %v918_v17 = vadd.f32 %v1696_v63, %v917_v53 }
 0x392   : > { %v922_v46 = vsel %vm921_vm8, %v1696_v63, %v918_v17 }
 0x393   : > { %v927_v26 = vsel %vm924_vm9, %v926_v18, %v922_v46 }
 0x394   : > { %v930_v31 = vmul.f32 %v927_v26, %v2555_v37 }
 0x396   : > { %1561 = vmatmul.f32.gmra.mxu3 %v930_v31 }
 0x3ce   : > { %v1444_v36 = vpop.f32.mrf.mxu2 }
 0x3cf   : > { %v1398_v47 = vpop.f32.mrf.mxu0 }
 0x3d0   : > { %v1421_v34 = vpop.f32.mrf.mxu1 }
 0x3d1   : > { %v1422_v4 = vadd.f32 %v1421_v34, %v1398_v47 }
 0x3d3   : > { %v1445_v59 = vadd.f32 %v1444_v36, %v1422_v4 }
 0x3da   : > { %v1467_v30 = vpop.f32.mrf.mxu3 }
 0x3db   : > { %v1468_v38 = vadd.f32 %v1467_v30, %v1445_v59 }
 0x3e1   : > { %v1447_v8 = vpop.f32.mrf.mxu2 }
 0x3e2   : > { %v1401_v35 = vpop.f32.mrf.mxu0  ;;  %v1424_v54 = vpop.f32.mrf.mxu1 }
 0x3e3   : > { %v1425_v57 = vadd.f32 %v1424_v54, %v1401_v35 }
 0x3e5   : > { %v1448_v61 = vadd.f32 %v1447_v8, %v1425_v57 }
 0x3ec   : > { %v1490_v12 = vpop.f32.mrf.mxu0 }
 0x3ed   : > { %v1491_v42 = vadd.f32 %v1490_v12, %v1468_v38  ;;  %v1470_v49 = vpop.f32.mrf.mxu3 }
 0x3ee   : > { %v1471_v1 = vadd.f32 %v1470_v49, %v1448_v61 }
 0x3f2   : > { %v1513_v50 = vpop.f32.mrf.mxu1 }
 0x3f3   : > { %v1514_v20 = vadd.f32 %v1513_v50, %v1491_v42 }
 0x3f9   : > { %v1536_v52 = vpop.f32.mrf.mxu2  ;;  %v1493_v62 = vpop.f32.mrf.mxu0 }
 0x3fa   : > { %v1537_v55 = vadd.f32 %v1536_v52, %v1514_v20  ;;  %v1494_v5 = vadd.f32 %v1493_v62, %v1471_v1 }
 0x400   : > { %v1516_v6 = vpop.f32.mrf.mxu1 }
 0x401   : > { %v1517_v44 = vadd.f32 %v1516_v6, %v1494_v5 }
 0x409   : > { %v1539_v7 = vpop.f32.mrf.mxu2 }
 0x40a   : > { %v1540_v9 = vadd.f32 %v1539_v7, %v1517_v44 }
 0x40b   : > { %v1559_v37 = vpop.f32.mrf.mxu3 }
 0x40c   : > { %v1560_v56 = vadd.f32 %v1559_v37, %v1537_v55 }
 0x40e   : > { %1565 = vst [vmem:[%s2809_s10] sm:$0xff] %v1560_v56 }
 0x419   : > { %v1562_v10 = vpop.f32.mrf.mxu3 }
 0x41a   : > { %v1563_v13 = vadd.f32 %v1562_v10, %v1540_v9 }
 0x41c   : > { %1566 = vst [vmem:[%s2809_s10 + $0x8] sm:$0xff] %v1563_v13 }
 0x41d PF: > { %s20_s13 = sadd.s32 1, %s1703_s13  }
 0x41e   : > { %p17_p7 = scmp.ge.s32.totalorder %s20_s13, 4  }
 0x420   :  { %19 = sbr.rel (!%p17_p7) target bundleno = 1 (0x1), region = 100 }

// kernel: gkan_nodes_forward.2
= control target key start
LH: loop header
LB: loop body
LE: loop exit
PB: predicated region body
PF: predicated region fallthrough
CT: control target
= control target key end

     0   :  { %15 = vsyncpa [#allocation5], 0  ;;  %s1845_s13 = smov 0   ;;  %s2838_s0 = inlined_call_operand.vmem [shape: s32[1,256], index: 0, kind: input, shape index: {}]   ;;  %s2839_s1 = inlined_call_operand.vmem [shape: s32[1,256], index: 1, kind: input, shape index: {}]   ;;  %s2840_s2 = inlined_call_operand.vmem [shape: f32[256,384], index: 2, kind: input, shape index: {}]   ;;  %s2841_s3 = inlined_call_operand.vmem [shape: f32[16,128], index: 3, kind: input, shape index: {}]   ;;  %s2842_s4 = inlined_call_operand.vmem [shape: f32[128,128], index: 4, kind: input, shape index: {}]   ;;  %s2843_s5 = inlined_call_operand.vmem [shape: f32[1,128], index: 5, kind: input, shape index: {}]   ;;  %s2844_s6 = inlined_call_operand.vmem [shape: f32[384,128], index: 6, kind: input, shape index: {}]   ;;  %s2845_s7 = inlined_call_operand.vmem [shape: f32[1,128], index: 7, kind: input, shape index: {}]   ;;  %s2846_s8 = inlined_call_operand.hbm [shape: f32[128,128], index: 8, kind: input, shape index: {}]   ;;  %s2847_s9 = inlined_call_operand.vmem [shape: f32[896,128], index: 9, kind: input, shape index: {}]   ;;  %s2848_s10 = inlined_call_operand.vmem [shape: f32[16,128], index: 10, kind: output, shape index: {}]  }
   0x1 LB: > { %s298_s16 = sshll.u32 %s2846_s8, 4  ;;  %s1854_s17 = sadd.s32 4294967295, %s1781_s13   ;;  %s1781_s13 = sphi %s1845_s13, %s21_s13   ;;  %s299_s16 = int_to_ptr.hbm [resolvable:$true] %s298_s16 }
   0x2   : > { %p1643_p0 = scmp.ge.s32.totalorder %s1781_s13, 1  ;;  %p272_p1 = scmp.lt.s32.totalorder %s1781_s13, 3 }
   0x3   : > { %p1644_p2 = scmp.ne.s32.totalorder %s1854_s17, 0  ;;  %p1711_p3 = scmp.eq.s32.totalorder %s1854_s17, 0 }
   0x4   : > { %p273_p4 = pnand %p1643_p0, %p272_p1  ;;  %s1783_s18 = smov [#allocation4]  }
   0x5   : > { %s300_s19 = sshll.u32 %s1783_s18, 4  ;;  %s1784_s20 = smov 128   ;;  %s301_s19 = int_to_ptr.vmem [resolvable:$true] %s300_s19 }
   0x6   : > { %p1707_p5 = pneg %p273_p4  ;;  %s1785_s21 = smov 8  }
   0x7   : > { %341 = sbr.rel (%p273_p4) target bundleno = 1057 (0x421), region = 60 }
   0x8   : > { %p1708_p6 = pnand %p1711_p3, %p1707_p5 }
   0xa   : > { %1710 = dma.hbm_to_vmem [thread:$0]  (!%p1708_p6), %s299_s16, 2048, %s301_s19, [#allocation5], %s1784_s20, %s1784_s20, %s1785_s21  }
   0xc   : > { %1776 = dma.done.wait (%p1711_p3), [#allocation5], 2048  }
   0xd   : > { %1778 = vsyncadd (%p1711_p3), [#allocation5], 4294965248  ;;  %p382_p7 = scmp.lt.s32.totalorder %s1854_s17, 1  ;;  %s1648_s22 = sshll.u32 %s1854_s17, 4 }
   0xe   : > { %p389_p8 = scmp.lt.s32.totalorder %s1648_s22, 31 }
   0xf   : > { %s1863_s23 = scalar_select %p382_p7, %s1854_s17, 1 }
  0x10   : > { %s2852_s22 = smov (!%p389_p8, %s1648_s22), 31  ;;  %399 = sbr.rel (%p1644_p2) target bundleno = 183 (0xb7), region = 68 }
  0x11   : > { %s384_s26 = scalar_lea.vmem %s2838_s0, %s1863_s23  ;;  %s387_s29 = scalar_lea.vmem %s2839_s1, %s1863_s23 }
  0x12   : > { %s1702_s30 = smul.u32 24, %s2852_s22 }
  0x14   : > { %s1876_s14 = scalar_lea.vmem %s2840_s2, %s1702_s30 }
  0x15   : > { %v417_v0 = vld [vmem:[%s2842_s4 + $0x78] sm:$0xff]  ;;  %v416_v1 = vld [vmem:[%s2842_s4 + $0x70] sm:$0xff]  ;;  %v415_v2 = vld [vmem:[%s2842_s4 + $0x68] sm:$0xff]  ;;  %v1786_v18 = vmov 0.0  }
  0x16   : > { %422 = vmatpush.msra.mxu0 %v417_v0  ;;  %1686 = vmatpush.msra.mxu1 %v417_v0  ;;  %v414_v3 = vld [vmem:[%s2842_s4 + $0x60] sm:$0xff]  ;;  %v413_v4 = vld [vmem:[%s2842_s4 + $0x58] sm:$0xff]  ;;  %v412_v5 = vld [vmem:[%s2842_s4 + $0x50] sm:$0xff]  ;;  %447 = vst [vmem:[#allocation3 + $0x8] sm:$0xff] %v1786_v18 }
  0x17   : > { %v411_v6 = vld [vmem:[%s2842_s4 + $0x48] sm:$0xff]  ;;  %v410_v7 = vld [vmem:[%s2842_s4 + $0x40] sm:$0xff]  ;;  %v409_v8 = vld [vmem:[%s2842_s4 + $0x38] sm:$0xff]  ;;  %448 = vst [vmem:[#allocation3] sm:$0xff] %v1786_v18 }
  0x18   : > { %423 = vmatpush.msra.mxu0 %v416_v1  ;;  %1687 = vmatpush.msra.mxu1 %v416_v1  ;;  %v408_v9 = vld [vmem:[%s2842_s4 + $0x30] sm:$0xff]  ;;  %v407_v10 = vld [vmem:[%s2842_s4 + $0x28] sm:$0xff]  ;;  %v406_v11 = vld [vmem:[%s2842_s4 + $0x20] sm:$0xff] }
  0x19   : > { %v405_v12 = vld [vmem:[%s2842_s4 + $0x18] sm:$0xff]  ;;  %v404_v13 = vld [vmem:[%s2842_s4 + $0x10] sm:$0xff]  ;;  %v403_v14 = vld [vmem:[%s2842_s4 + $0x8] sm:$0xff] }
  0x1a   : > { %424 = vmatpush.msra.mxu0 %v415_v2  ;;  %1688 = vmatpush.msra.mxu1 %v415_v2  ;;  %v402_v15 = vld [vmem:[%s2842_s4] sm:$0xff]  ;;  %v401_v17 = vld [vmem:[%s2841_s3 + $0x8] sm:$0xff] }
  0x1b   : > { %v400_v16 = vld [vmem:[%s2841_s3] sm:$0xff] }
  0x1c   : > { %425 = vmatpush.msra.mxu0 %v414_v3  ;;  %1689 = vmatpush.msra.mxu1 %v414_v3  ;;  %v1729_v19 = vld [vmem:[%s2843_s5] ss:$0 sm:$0xff] }
  0x1e   : > { %426 = vmatpush.msra.mxu0 %v413_v4  ;;  %1690 = vmatpush.msra.mxu1 %v413_v4 }
  0x20   : > { %427 = vmatpush.msra.mxu0 %v412_v5  ;;  %1691 = vmatpush.msra.mxu1 %v412_v5 }
  0x22   : > { %428 = vmatpush.msra.mxu0 %v411_v6  ;;  %1692 = vmatpush.msra.mxu1 %v411_v6 }
  0x24   : > { %429 = vmatpush.msra.mxu0 %v410_v7  ;;  %1693 = vmatpush.msra.mxu1 %v410_v7 }
  0x26   : > { %430 = vmatpush.msra.mxu0 %v409_v8  ;;  %1694 = vmatpush.msra.mxu1 %v409_v8 }
  0x28   : > { %431 = vmatpush.msra.mxu0 %v408_v9  ;;  %1695 = vmatpush.msra.mxu1 %v408_v9 }
  0x2a   : > { %432 = vmatpush.msra.mxu0 %v407_v10  ;;  %1696 = vmatpush.msra.mxu1 %v407_v10 }
  0x2c   : > { %433 = vmatpush.msra.mxu0 %v406_v11  ;;  %1697 = vmatpush.msra.mxu1 %v406_v11 }
  0x2e   : > { %434 = vmatpush.msra.mxu0 %v405_v12  ;;  %1698 = vmatpush.msra.mxu1 %v405_v12 }
  0x30   : > { %435 = vmatpush.msra.mxu0 %v404_v13  ;;  %1699 = vmatpush.msra.mxu1 %v404_v13 }
  0x32   : > { %436 = vmatpush.msra.mxu0 %v403_v14  ;;  %1700 = vmatpush.msra.mxu1 %v403_v14 }
  0x34   : > { %437 = vmatpush.msra.mxu0 %v402_v15  ;;  %1701 = vmatpush.msra.mxu1 %v402_v15 }
  0x35   : > { %438 = vmatmul.f32.vlgmr.msra.gmra.mxu0 %v400_v16  ;;  %441 = vmatmul.f32.vlgmr.msra.gmra.mxu1 %v401_v17 }
  0xb2   : > { %v439_v20 = vpop.f32.mrf.mxu0  ;;  %v442_v21 = vpop.f32.mrf.mxu1 }
  0xb3   : > { %v440_v22 = vadd.f32 %v1729_v19, %v439_v20  ;;  %v443_v23 = vadd.f32 %v1729_v19, %v442_v21 }
  0xb5   : > { %445 = vst [vmem:[#allocation2] sm:$0xff] %v440_v22 }
  0xb6   : > { %446 = vst [vmem:[#allocation2 + $0x8] sm:$0xff] %v443_v23 }
  0xb7 PF: > { %v746_v24 = vlaneseq  ;;  %v1730_v25 = vld [vmem:[%s384_s26] ss:$0 sm:$0xff]  ;;  %v544_v26 = vld [vmem:[%s2844_s6 + $0x178] sm:$0xff]  ;;  %v543_v28 = vld [vmem:[%s2844_s6 + $0x170] sm:$0xff]  ;;  %v1787_v38 = vmov 0.0   ;;  %vm784_vm2 = vcmask 130048  }
  0xb8   : > { %679 = vmatpush.msra.mxu2 %v544_v26  ;;  %v512_v27 = vld [vmem:[%s2844_s6 + $0x78] sm:$0xff]  ;;  %v511_v29 = vld [vmem:[%s2844_s6 + $0x70] sm:$0xff]  ;;  %v542_v32 = vld [vmem:[%s2844_s6 + $0x168] sm:$0xff]  ;;  %p1665_p9 = scmp.ne.s32.totalorder %s1854_s17, 1 }
  0xb9   : > { %v1954_v30 = vshrl.u32 %v746_v24, 7  ;;  %549 = vmatpush.msra.mxu0 %v512_v27  ;;  %v528_v31 = vld [vmem:[%s2844_s6 + $0xf8] sm:$0xff]  ;;  %v510_v33 = vld [vmem:[%s2844_s6 + $0x68] sm:$0xff]  ;;  %v527_v34 = vld [vmem:[%s2844_s6 + $0xf0] sm:$0xff] }
  0xba   : > { %680 = vmatpush.msra.mxu2 %v543_v28  ;;  %614 = vmatpush.msra.mxu1 %v528_v31  ;;  %v541_v36 = vld [vmem:[%s2844_s6 + $0x160] sm:$0xff]  ;;  %v526_v37 = vld [vmem:[%s2844_s6 + $0xe8] sm:$0xff]  ;;  %v540_v41 = vld [vmem:[%s2844_s6 + $0x158] sm:$0xff] }
  0xbb   : > { %v1969_v35 = vadd.s32 8, %v1954_v30  ;;  %vm750_vm0 = vcmp.eq.s32.totalorder %v1954_v30, %v1730_v25  ;;  %550 = vmatpush.msra.mxu0 %v511_v29  ;;  %v509_v40 = vld [vmem:[%s2844_s6 + $0x60] sm:$0xff]  ;;  %v508_v44 = vld [vmem:[%s2844_s6 + $0x58] sm:$0xff]  ;;  %v539_v46 = vld [vmem:[%s2844_s6 + $0x150] sm:$0xff] }
  0xbc   : > { %v1651_v39 = vsel %vm750_vm0, 1.0, %v1787_v38  ;;  %681 = vmatpush.msra.mxu2 %v542_v32  ;;  %615 = vmatpush.msra.mxu1 %v527_v34  ;;  %v525_v42 = vld [vmem:[%s2844_s6 + $0xe0] sm:$0xff]  ;;  %v524_v47 = vld [vmem:[%s2844_s6 + $0xd8] sm:$0xff]  ;;  %v507_v48 = vld [vmem:[%s2844_s6 + $0x50] sm:$0xff] }
  0xbd   : > { %vm751_vm1 = vcmp.eq.s32.totalorder %v1969_v35, %v1730_v25  ;;  %551 = vmatpush.msra.mxu0 %v510_v33  ;;  %v538_v49 = vld [vmem:[%s2844_s6 + $0x148] sm:$0xff]  ;;  %v523_v50 = vld [vmem:[%s2844_s6 + $0xd0] sm:$0xff]  ;;  %v537_v52 = vld [vmem:[%s2844_s6 + $0x140] sm:$0xff] }
  0xbe   : > { %v1652_v43 = vsel %vm751_vm1, 1.0, %v1787_v38  ;;  %682 = vmatpush.msra.mxu2 %v541_v36  ;;  %616 = vmatpush.msra.mxu1 %v526_v37  ;;  %v506_v51 = vld [vmem:[%s2844_s6 + $0x48] sm:$0xff]  ;;  %v505_v54 = vld [vmem:[%s2844_s6 + $0x40] sm:$0xff]  ;;  %v536_v55 = vld [vmem:[%s2844_s6 + $0x138] sm:$0xff] }
  0xbf   : > { %v756_v45 = vpack.c.bf16 %v1652_v43, %v1651_v39  ;;  %552 = vmatpush.msra.mxu0 %v509_v40  ;;  %v522_v53 = vld [vmem:[%s2844_s6 + $0xc8] sm:$0xff]  ;;  %v521_v56 = vld [vmem:[%s2844_s6 + $0xc0] sm:$0xff]  ;;  %v504_v57 = vld [vmem:[%s2844_s6 + $0x38] sm:$0xff] }
  0xc0   : > { %683 = vmatpush.msra.mxu2 %v540_v41  ;;  %617 = vmatpush.msra.mxu1 %v525_v42  ;;  %v535_v58 = vld [vmem:[%s2844_s6 + $0x130] sm:$0xff]  ;;  %v765_v59 = vld [vmem:[#allocation2] sm:$0xff]  ;;  %v520_v60 = vld [vmem:[%s2844_s6 + $0xb8] sm:$0xff] }
  0xc1   : > { %768 = vxpose.xlu0.c.b16.start.end [1/1] (short) %v756_v45, 128  ;;  %553 = vmatpush.msra.mxu0 %v508_v44  ;;  %v766_v61 = vld [vmem:[#allocation2 + $0x8] sm:$0xff]  ;;  %v503_v62 = vld [vmem:[%s2844_s6 + $0x30] sm:$0xff]  ;;  %v533_v3 = vld [vmem:[%s2844_s6 + $0x120] sm:$0xff] }
  0xc2   : > { %684 = vmatpush.msra.mxu2 %v539_v46  ;;  %618 = vmatpush.msra.mxu1 %v524_v47  ;;  %v767_v63 = vpack.c.bf16 %v766_v61, %v765_v59  ;;  %v534_v0 = vld [vmem:[%s2844_s6 + $0x128] sm:$0xff]  ;;  %v519_v1 = vld [vmem:[%s2844_s6 + $0xb0] sm:$0xff]  ;;  %v501_v5 = vld [vmem:[%s2844_s6 + $0x20] sm:$0xff] }
  0xc3   : > { %554 = vmatpush.msra.mxu0 %v507_v48  ;;  %v502_v2 = vld [vmem:[%s2844_s6 + $0x28] sm:$0xff]  ;;  %v532_v6 = vld [vmem:[%s2844_s6 + $0x118] sm:$0xff]  ;;  %v517_v7 = vld [vmem:[%s2844_s6 + $0xa0] sm:$0xff] }
  0xc4   : > { %685 = vmatpush.msra.mxu2 %v538_v49  ;;  %619 = vmatpush.msra.mxu1 %v523_v50  ;;  %v518_v4 = vld [vmem:[%s2844_s6 + $0xa8] sm:$0xff]  ;;  %v500_v8 = vld [vmem:[%s2844_s6 + $0x18] sm:$0xff]  ;;  %v531_v9 = vld [vmem:[%s2844_s6 + $0x110] sm:$0xff] }
  0xc5   : > { %555 = vmatpush.msra.mxu0 %v506_v51  ;;  %816 = vmatpush.bf16.msra.mxu3 %v767_v63  ;;  %v516_v10 = vld [vmem:[%s2844_s6 + $0x98] sm:$0xff]  ;;  %v499_v11 = vld [vmem:[%s2844_s6 + $0x10] sm:$0xff]  ;;  %v530_v12 = vld [vmem:[%s2844_s6 + $0x108] sm:$0xff] }
  0xc6   : > { %686 = vmatpush.msra.mxu2 %v537_v52  ;;  %620 = vmatpush.msra.mxu1 %v522_v53  ;;  %v515_v13 = vld [vmem:[%s2844_s6 + $0x90] sm:$0xff]  ;;  %v498_v14 = vld [vmem:[%s2844_s6 + $0x8] sm:$0xff]  ;;  %v529_v15 = vld [vmem:[%s2844_s6 + $0x100] sm:$0xff] }
  0xc7   : > { %556 = vmatpush.msra.mxu0 %v505_v54  ;;  %v451_v16 = vld [vmem:[%s1876_s14 + $0x10] sm:$0xff]  ;;  %v497_v17 = vld [vmem:[%s2844_s6] sm:$0xff]  ;;  %v514_v18 = vld [vmem:[%s2844_s6 + $0x88] sm:$0xff] }
  0xc8   : > { %687 = vmatpush.msra.mxu2 %v536_v55  ;;  %621 = vmatpush.msra.mxu1 %v521_v56  ;;  %v449_v19 = vld [vmem:[%s1876_s14] sm:$0xff]  ;;  %v450_v21 = vld [vmem:[%s1876_s14 + $0x8] sm:$0xff]  ;;  %v452_v23 = vld [vmem:[%s1876_s14 + $0x18] sm:$0xff] }
  0xc9   : > { %557 = vmatpush.msra.mxu0 %v504_v57  ;;  %v513_v20 = vld [vmem:[%s2844_s6 + $0x80] sm:$0xff]  ;;  %v454_v22 = vld [vmem:[%s1876_s14 + $0x28] sm:$0xff]  ;;  %v455_v26 = vld [vmem:[%s1876_s14 + $0x30] sm:$0xff] }
  0xca   : > { %688 = vmatpush.msra.mxu2 %v535_v58  ;;  %622 = vmatpush.msra.mxu1 %v520_v60  ;;  %v457_v24 = vld [vmem:[%s1876_s14 + $0x40] sm:$0xff]  ;;  %v456_v27 = vld [vmem:[%s1876_s14 + $0x38] sm:$0xff]  ;;  %v458_v29 = vld [vmem:[%s1876_s14 + $0x48] sm:$0xff] }
  0xcb   : > { %558 = vmatpush.msra.mxu0 %v503_v62  ;;  %v453_v25 = vld [vmem:[%s1876_s14 + $0x20] sm:$0xff]  ;;  %v460_v28 = vld [vmem:[%s1876_s14 + $0x58] sm:$0xff]  ;;  %v463_v31 = vld [vmem:[%s1876_s14 + $0x70] sm:$0xff] }
  0xcc   : > { %689 = vmatpush.msra.mxu2 %v534_v0  ;;  %623 = vmatpush.msra.mxu1 %v519_v1  ;;  %v459_v32 = vld [vmem:[%s1876_s14 + $0x50] sm:$0xff]  ;;  %v461_v34 = vld [vmem:[%s1876_s14 + $0x60] sm:$0xff]  ;;  %v462_v36 = vld [vmem:[%s1876_s14 + $0x68] sm:$0xff] }
  0xcd   : > { %559 = vmatpush.msra.mxu0 %v502_v2  ;;  %v466_v37 = vld [vmem:[%s1876_s14 + $0x88] sm:$0xff]  ;;  %v464_v38 = vld [vmem:[%s1876_s14 + $0x78] sm:$0xff]  ;;  %v469_v39 = vld [vmem:[%s1876_s14 + $0xa0] sm:$0xff] }
  0xce   : > { %690 = vmatpush.msra.mxu2 %v533_v3  ;;  %624 = vmatpush.msra.mxu1 %v518_v4  ;;  %v465_v40 = vld [vmem:[%s1876_s14 + $0x80] sm:$0xff]  ;;  %v467_v42 = vld [vmem:[%s1876_s14 + $0x90] sm:$0xff]  ;;  %v468_v43 = vld [vmem:[%s1876_s14 + $0x98] sm:$0xff] }
  0xcf   : > { %560 = vmatpush.msra.mxu0 %v501_v5  ;;  %v472_v44 = vld [vmem:[%s1876_s14 + $0xb8] sm:$0xff]  ;;  %v470_v45 = vld [vmem:[%s1876_s14 + $0xa8] sm:$0xff]  ;;  %v475_v46 = vld [vmem:[%s1876_s14 + $0xd0] sm:$0xff] }
  0xd0   : > { %691 = vmatpush.msra.mxu2 %v532_v6  ;;  %625 = vmatpush.msra.mxu1 %v517_v7  ;;  %v471_v47 = vld [vmem:[%s1876_s14 + $0xb0] sm:$0xff]  ;;  %v473_v49 = vld [vmem:[%s1876_s14 + $0xc0] sm:$0xff]  ;;  %v474_v50 = vld [vmem:[%s1876_s14 + $0xc8] sm:$0xff] }
  0xd1   : > { %561 = vmatpush.msra.mxu0 %v500_v8  ;;  %v478_v51 = vld [vmem:[%s1876_s14 + $0xe8] sm:$0xff]  ;;  %v476_v52 = vld [vmem:[%s1876_s14 + $0xd8] sm:$0xff]  ;;  %v481_v53 = vld [vmem:[%s1876_s14 + $0x100] sm:$0xff] }
  0xd2   : > { %692 = vmatpush.msra.mxu2 %v531_v9  ;;  %626 = vmatpush.msra.mxu1 %v516_v10  ;;  %v477_v54 = vld [vmem:[%s1876_s14 + $0xe0] sm:$0xff]  ;;  %v479_v56 = vld [vmem:[%s1876_s14 + $0xf0] sm:$0xff]  ;;  %v480_v57 = vld [vmem:[%s1876_s14 + $0xf8] sm:$0xff] }
  0xd3   : > { %562 = vmatpush.msra.mxu0 %v499_v11  ;;  %v484_v58 = vld [vmem:[%s1876_s14 + $0x118] sm:$0xff]  ;;  %v482_v59 = vld [vmem:[%s1876_s14 + $0x108] sm:$0xff]  ;;  %v487_v60 = vld [vmem:[%s1876_s14 + $0x130] sm:$0xff] }
  0xd4   : > { %693 = vmatpush.msra.mxu2 %v530_v12  ;;  %627 = vmatpush.msra.mxu1 %v515_v13  ;;  %v483_v61 = vld [vmem:[%s1876_s14 + $0x110] sm:$0xff]  ;;  %v485_v63 = vld [vmem:[%s1876_s14 + $0x120] sm:$0xff]  ;;  %v486_v0 = vld [vmem:[%s1876_s14 + $0x128] sm:$0xff] }
  0xd5   : > { %563 = vmatpush.msra.mxu0 %v498_v14  ;;  %v490_v1 = vld [vmem:[%s1876_s14 + $0x148] sm:$0xff]  ;;  %v488_v2 = vld [vmem:[%s1876_s14 + $0x138] sm:$0xff]  ;;  %v493_v3 = vld [vmem:[%s1876_s14 + $0x160] sm:$0xff] }
  0xd6   : > { %694 = vmatpush.msra.mxu2 %v529_v15  ;;  %628 = vmatpush.msra.mxu1 %v514_v18  ;;  %v489_v4 = vld [vmem:[%s1876_s14 + $0x140] sm:$0xff]  ;;  %v491_v6 = vld [vmem:[%s1876_s14 + $0x150] sm:$0xff]  ;;  %v492_v7 = vld [vmem:[%s1876_s14 + $0x158] sm:$0xff] }
  0xd7   : > { %695 = vmatmul.f32.vlgmr.msra.gmra.mxu2 %v451_v16  ;;  %564 = vmatpush.msra.mxu0 %v497_v17  ;;  %v496_v8 = vld [vmem:[%s1876_s14 + $0x178] sm:$0xff]  ;;  %v494_v9 = vld [vmem:[%s1876_s14 + $0x168] sm:$0xff]  ;;  %v495_v10 = vld [vmem:[%s1876_s14 + $0x170] sm:$0xff] }
  0xd8   : > { %565 = vmatmul.f32.vlgmr.msra.gmra.mxu0 %v449_v19  ;;  %629 = vmatpush.msra.mxu1 %v513_v20  ;;  %v2150_v11 = vld [vmem:[%s2845_s7] ss:$0 sm:$0xff] }
  0xd9   : > { %630 = vmatmul.f32.vlgmr.msra.gmra.mxu1 %v450_v21 }
  0xdf   : > { %698 = vmatmul.f32.gmra.mxu2 %v454_v22 }
  0xe0   : > { %568 = vmatmul.f32.gmra.mxu0 %v452_v23 }
  0xe1   : > { %633 = vmatmul.f32.gmra.mxu1 %v453_v25 }
  0xe7   : > { %701 = vmatmul.f32.gmra.mxu2 %v457_v24 }
  0xe8   : > { %571 = vmatmul.f32.gmra.mxu0 %v455_v26 }
  0xe9   : > { %636 = vmatmul.f32.gmra.mxu1 %v456_v27 }
  0xef   : > { %704 = vmatmul.f32.gmra.mxu2 %v460_v28 }
  0xf0   : > { %574 = vmatmul.f32.gmra.mxu0 %v458_v29 }
  0xf1   : > { %639 = vmatmul.f32.gmra.mxu1 %v459_v32 }
  0xf7   : > { %707 = vmatmul.f32.gmra.mxu2 %v463_v31 }
  0xf8   : > { %577 = vmatmul.f32.gmra.mxu0 %v461_v34 }
  0xf9   : > { %642 = vmatmul.f32.gmra.mxu1 %v462_v36 }
  0xff   : > { %710 = vmatmul.f32.gmra.mxu2 %v466_v37 }
 0x100   : > { %580 = vmatmul.f32.gmra.mxu0 %v464_v38 }
 0x101   : > { %645 = vmatmul.f32.gmra.mxu1 %v465_v40 }
 0x107   : > { %713 = vmatmul.f32.gmra.mxu2 %v469_v39 }
 0x108   : > { %583 = vmatmul.f32.gmra.mxu0 %v467_v42 }
 0x109   : > { %648 = vmatmul.f32.gmra.mxu1 %v468_v43 }
 0x10f   : > { %716 = vmatmul.f32.gmra.mxu2 %v472_v44 }
 0x110   : > { %586 = vmatmul.f32.gmra.mxu0 %v470_v45 }
 0x111   : > { %651 = vmatmul.f32.gmra.mxu1 %v471_v47 }
 0x117   : > { %719 = vmatmul.f32.gmra.mxu2 %v475_v46 }
 0x118   : > { %589 = vmatmul.f32.gmra.mxu0 %v473_v49 }
 0x119   : > { %654 = vmatmul.f32.gmra.mxu1 %v474_v50 }
 0x11f   : > { %722 = vmatmul.f32.gmra.mxu2 %v478_v51 }
 0x120   : > { %592 = vmatmul.f32.gmra.mxu0 %v476_v52 }
 0x121   : > { %657 = vmatmul.f32.gmra.mxu1 %v477_v54 }
 0x127   : > { %725 = vmatmul.f32.gmra.mxu2 %v481_v53 }
 0x128   : > { %595 = vmatmul.f32.gmra.mxu0 %v479_v56 }
 0x129   : > { %660 = vmatmul.f32.gmra.mxu1 %v480_v57 }
 0x12f   : > { %728 = vmatmul.f32.gmra.mxu2 %v484_v58 }
 0x130   : > { %598 = vmatmul.f32.gmra.mxu0 %v482_v59 }
 0x131   : > { %663 = vmatmul.f32.gmra.mxu1 %v483_v61 }
 0x137   : > { %731 = vmatmul.f32.gmra.mxu2 %v487_v60 }
 0x138   : > { %601 = vmatmul.f32.gmra.mxu0 %v485_v63 }
 0x139   : > { %666 = vmatmul.f32.gmra.mxu1 %v486_v0 }
 0x13f   : > { %734 = vmatmul.f32.gmra.mxu2 %v490_v1 }
 0x140   : > { %604 = vmatmul.f32.gmra.mxu0 %v488_v2 }
 0x141   : > { %669 = vmatmul.f32.gmra.mxu1 %v489_v4 }
 0x147   : > { %737 = vmatmul.f32.gmra.mxu2 %v493_v3 }
 0x148   : > { %607 = vmatmul.f32.gmra.mxu0 %v491_v6 }
 0x149   : > { %672 = vmatmul.f32.gmra.mxu1 %v492_v7 }
 0x14f   : > { %740 = vmatmul.f32.gmra.mxu2 %v496_v8 }
 0x150   : > { %610 = vmatmul.f32.gmra.mxu0 %v494_v9 }
 0x151   : > { %675 = vmatmul.f32.gmra.mxu1 %v495_v10 }
 0x155   : > { %v566_v13 = vpop.f32.mrf.mxu0 }
 0x156   : > { %v567_v14 = vadd.f32 %v2150_v11, %v566_v13  ;;  %v631_v16 = vpop.f32.mrf.mxu1 }
 0x158   : > { %v632_v17 = vadd.f32 %v631_v16, %v567_v14 }
 0x15a   : > { %v696_v12 = vpop.f32.mrf.mxu2 }
 0x15b   : > { %v697_v18 = vadd.f32 %v696_v12, %v632_v17 }
 0x15d   : > { %v569_v20 = vpop.f32.mrf.mxu0 }
 0x15e   : > { %v570_v21 = vadd.f32 %v2150_v11, %v569_v20  ;;  %v634_v22 = vpop.f32.mrf.mxu1 }
 0x160   : > { %v635_v23 = vadd.f32 %v634_v22, %v570_v21 }
 0x162   : > { %v699_v19 = vpop.f32.mrf.mxu2 }
 0x163   : > { %v700_v24 = vadd.f32 %v699_v19, %v635_v23 }
 0x165   : > { %v572_v26 = vpop.f32.mrf.mxu0 }
 0x166   : > { %v573_v27 = vadd.f32 %v2150_v11, %v572_v26  ;;  %v637_v29 = vpop.f32.mrf.mxu1 }
 0x168   : > { %v638_v31 = vadd.f32 %v637_v29, %v573_v27 }
 0x16a   : > { %v702_v25 = vpop.f32.mrf.mxu2 }
 0x16b   : > { %v703_v32 = vadd.f32 %v702_v25, %v638_v31 }
 0x16d   : > { %v776_v33 = vpop.trf.xlu0  ;;  %v575_v34 = vpop.f32.mrf.mxu0 }
 0x16e   : > { %1655 = vmatmul.msk.bf16.vlgmr.msra.gmra.mxu3 %vm784_vm2, %v776_v33  ;;  %v576_v36 = vadd.f32 %v2150_v11, %v575_v34  ;;  %v640_v37 = vpop.f32.mrf.mxu1 }
 0x170   : > { %v641_v38 = vadd.f32 %v640_v37, %v576_v36 }
 0x172   : > { %v705_v33 = vpop.f32.mrf.mxu2 }
 0x173   : > { %v706_v39 = vadd.f32 %v705_v33, %v641_v38 }
 0x176   : > { %v643_v43 = vpop.f32.mrf.mxu1 }
 0x17a   : > { %v708_v40 = vpop.f32.mrf.mxu2 }
 0x17d   : > { %v777_v41 = vpop.trf.xlu0 }
 0x17e   : > { %1656 = vmatmul.msk.bf16.gmra.mxu3 %vm784_vm2, %v777_v41  ;;  %v578_v41 = vpop.f32.mrf.mxu0  ;;  %v646_v51 = vpop.f32.mrf.mxu1 }
 0x17f   : > { %v579_v42 = vadd.f32 %v2150_v11, %v578_v41 }
 0x181   : > { %v644_v44 = vadd.f32 %v643_v43, %v579_v42 }
 0x183   : > { %v709_v45 = vadd.f32 %v708_v40, %v644_v44 }
 0x186   : > { %v581_v49 = vpop.f32.mrf.mxu0  ;;  %v649_v60 = vpop.f32.mrf.mxu1 }
 0x187   : > { %v582_v50 = vadd.f32 %v2150_v11, %v581_v49 }
 0x189   : > { %v647_v52 = vadd.f32 %v646_v51, %v582_v50 }
 0x18d   : > { %v778_v48 = vpop.trf.xlu0 }
 0x18e   : > { %1657 = vmatmul.msk.bf16.gmra.mxu3 %vm784_vm2, %v778_v48  ;;  %v711_v48 = vpop.f32.mrf.mxu2  ;;  %v584_v57 = vpop.f32.mrf.mxu0 }
 0x18f   : > { %v712_v53 = vadd.f32 %v711_v48, %v647_v52  ;;  %v585_v58 = vadd.f32 %v2150_v11, %v584_v57  ;;  %v652_v4 = vpop.f32.mrf.mxu1 }
 0x191   : > { %v650_v61 = vadd.f32 %v649_v60, %v585_v58 }
 0x196   : > { %v714_v56 = vpop.f32.mrf.mxu2  ;;  %v587_v1 = vpop.f32.mrf.mxu0 }
 0x197   : > { %v588_v3 = vadd.f32 %v2150_v11, %v587_v1  ;;  %v655_v13 = vpop.f32.mrf.mxu1 }
 0x19d   : > { %v779_v55 = vpop.trf.xlu0 }
 0x19e   : > { %1658 = vmatmul.msk.bf16.gmra.mxu3 %vm784_vm2, %v779_v55  ;;  %v717_v2 = vpop.f32.mrf.mxu2  ;;  %v590_v9 = vpop.f32.mrf.mxu0 }
 0x19f   : > { %v591_v10 = vadd.f32 %v2150_v11, %v590_v9  ;;  %v658_v25 = vpop.f32.mrf.mxu1 }
 0x1a6   : > { %v720_v14 = vpop.f32.mrf.mxu2  ;;  %v593_v22 = vpop.f32.mrf.mxu0 }
 0x1ad   : > { %v780_v62 = vpop.trf.xlu0 }
 0x1ae   : > { %1659 = vmatmul.msk.bf16.gmra.mxu3 %vm784_vm2, %v780_v62  ;;  %v715_v62 = vadd.f32 %v714_v56, %v650_v61  ;;  %v723_v26 = vpop.f32.mrf.mxu2 }
 0x1b6   : > { %v726_v34 = vpop.f32.mrf.mxu2 }
 0x1bd   : > { %v781_v5 = vpop.trf.xlu0 }
 0x1be   : > { %1660 = vmatmul.msk.bf16.gmra.mxu3 %vm784_vm2, %v781_v5  ;;  %v653_v5 = vadd.f32 %v652_v4, %v588_v3  ;;  %v729_v40 = vpop.f32.mrf.mxu2 }
 0x1c0   : > { %v718_v6 = vadd.f32 %v717_v2, %v653_v5 }
 0x1c6   : > { %v732_v44 = vpop.f32.mrf.mxu2 }
 0x1cd   : > { %v782_v15 = vpop.trf.xlu0 }
 0x1ce   : > { %1661 = vmatmul.msk.bf16.gmra.mxu3 %vm784_vm2, %v782_v15  ;;  %v656_v15 = vadd.f32 %v655_v13, %v591_v10  ;;  %v735_v49 = vpop.f32.mrf.mxu2  ;;  %v594_v13 = vadd.f32 %v2150_v11, %v593_v22 }
 0x1d0   : > { %v721_v16 = vadd.f32 %v720_v14, %v656_v15 }
 0x1dd   : > { %v783_v28 = vpop.trf.xlu0 }
 0x1de   : > { %1662 = vmatmul.msk.bf16.gmra.mxu3 %vm784_vm2, %v783_v28  ;;  %v596_v28 = vpop.f32.mrf.mxu0 }
 0x1e6   : > { %v599_v37 = vpop.f32.mrf.mxu0 }
 0x1e7   : > { %v600_v4 = vadd.f32 %v2150_v11, %v599_v37 }
 0x1ee   : > { %v602_v41 = vpop.f32.mrf.mxu0 }
 0x1f1   : > { %v818_v46 = vpop.f32.mrf.mxu3 }
 0x1f2   : > { %v2159_v47 = vmul.f32 %v818_v46, %v697_v18 }
 0x1f9   : > { %v820_v54 = vpop.f32.mrf.mxu3 }
 0x1fa   : > { %v2162_v55 = vmul.f32 %v820_v54, %v700_v24  ;;  %v738_v54 = vpop.f32.mrf.mxu2 }
 0x1fc   : > { %v874_v59 = vpack.c.bf16 %v2162_v55, %v2159_v47 }
 0x201   : > { %v823_v63 = vpop.f32.mrf.mxu3 }
 0x202   : > { %v2167_v0 = vmul.f32 %v823_v63, %v703_v32  ;;  %v661_v32 = vpop.f32.mrf.mxu1  ;;  %v603_v63 = vadd.f32 %v2150_v11, %v602_v41  ;;  %v741_v3 = vpop.f32.mrf.mxu2 }
 0x209   : > { %v825_v7 = vpop.f32.mrf.mxu3 }
 0x20a   : > { %v2170_v8 = vmul.f32 %v825_v7, %v706_v39  ;;  %v664_v38 = vpop.f32.mrf.mxu1 }
 0x20b   : > { %v665_v14 = vadd.f32 %v664_v38, %v600_v4 }
 0x20c   : > { %v875_v12 = vpack.c.bf16 %v2170_v8, %v2167_v0 }
 0x211   : > { %v828_v17 = vpop.f32.mrf.mxu3 }
 0x212   : > { %v2175_v18 = vmul.f32 %v828_v17, %v709_v45  ;;  %v667_v43 = vpop.f32.mrf.mxu1  ;;  %v605_v45 = vpop.f32.mrf.mxu0 }
 0x213   : > { %v606_v61 = vadd.f32 %v2150_v11, %v605_v45  ;;  %v668_v7 = vadd.f32 %v667_v43, %v603_v63 }
 0x219   : > { %v830_v19 = vpop.f32.mrf.mxu3 }
 0x21a   : > { %v2177_v20 = vmul.f32 %v830_v19, %v712_v53  ;;  %v670_v48 = vpop.f32.mrf.mxu1  ;;  %v608_v51 = vpop.f32.mrf.mxu0  ;;  %v733_v19 = vadd.f32 %v732_v44, %v668_v7 }
 0x21b   : > { %v609_v57 = vadd.f32 %v2150_v11, %v608_v51  ;;  %v671_v5 = vadd.f32 %v670_v48, %v606_v61 }
 0x21c   : > { %v876_v21 = vpack.c.bf16 %v2177_v20, %v2175_v18  ;;  %v1788_v18 = vmov 1.0|1.0   ;;  %v882_v20 = vld [vmem:[#allocation3 + $0x8] sm:$0xff] }
 0x21d   : > { %v736_v15 = vadd.f32 %v735_v49, %v671_v5 }
 0x221   : > { %v833_v23 = vpop.f32.mrf.mxu3 }
 0x222   : > { %v2181_v24 = vmul.f32 %v833_v23, %v715_v62  ;;  %v673_v52 = vpop.f32.mrf.mxu1  ;;  %v611_v56 = vpop.f32.mrf.mxu0 }
 0x223   : > { %v612_v58 = vadd.f32 %v2150_v11, %v611_v56  ;;  %v674_v1 = vadd.f32 %v673_v52, %v609_v57 }
 0x225   : > { %v739_v9 = vadd.f32 %v738_v54, %v674_v1 }
 0x229   : > { %v835_v27 = vpop.f32.mrf.mxu3 }
 0x22a   : > { %v2183_v29 = vmul.f32 %v835_v27, %v718_v6  ;;  %v676_v60 = vpop.f32.mrf.mxu1  ;;  %v597_v6 = vadd.f32 %v2150_v11, %v596_v28  ;;  %v659_v27 = vadd.f32 %v658_v25, %v594_v13  ;;  %v1732_v25 = vld [vmem:[%s387_s29] ss:$0 sm:$0xff] }
 0x22b   : > { %v677_v2 = vadd.f32 %v676_v60, %v612_v58  ;;  %vm758_vm3 = vcmp.eq.s32.totalorder %v1954_v30, %v1732_v25  ;;  %vm759_vm4 = vcmp.eq.s32.totalorder %v1969_v35, %v1732_v25 }
 0x22c   : > { %v877_v31 = vpack.c.bf16 %v2183_v29, %v2181_v24  ;;  %v662_v17 = vadd.f32 %v661_v32, %v597_v6  ;;  %v730_v29 = vadd.f32 %v729_v40, %v665_v14  ;;  %v724_v28 = vadd.f32 %v723_v26, %v659_v27  ;;  %vm1663_vm5 = vmpackc.low %vm759_vm4, %vm758_vm3 }
 0x22d   : > { %v742_v10 = vadd.f32 %v741_v3, %v677_v2 }
 0x22e   : > { %v727_v37 = vadd.f32 %v726_v34, %v662_v17 }
 0x231   : > { %v838_v33 = vpop.f32.mrf.mxu3 }
 0x232   : > { %v866_v36 = vmul.f32 %v838_v33, %v721_v16 }
 0x239   : > { %v840_v39 = vpop.f32.mrf.mxu3 }
 0x23a   : > { %v867_v11 = vmul.f32 %v840_v39, %v724_v28 }
 0x23c   : > { %v878_v32 = vpack.c.bf16 %v867_v11, %v866_v36 }
 0x241   : > { %v843_v42 = vpop.f32.mrf.mxu3 }
 0x242   : > { %v868_v51 = vmul.f32 %v843_v42, %v727_v37 }
 0x249   : > { %v845_v46 = vpop.f32.mrf.mxu3 }
 0x24a   : > { %v869_v43 = vmul.f32 %v845_v46, %v730_v29 }
 0x24c   : > { %v879_v22 = vpack.c.bf16 %v869_v43, %v868_v51 }
 0x251   : > { %v848_v50 = vpop.f32.mrf.mxu3 }
 0x252   : > { %v870_v45 = vmul.f32 %v848_v50, %v733_v19 }
 0x259   : > { %v850_v53 = vpop.f32.mrf.mxu3 }
 0x25a   : > { %v871_v33 = vmul.f32 %v850_v53, %v736_v15 }
 0x25c   : > { %v880_v48 = vpack.c.bf16 %v871_v33, %v870_v45 }
 0x261   : > { %v853_v62 = vpop.f32.mrf.mxu3 }
 0x262   : > { %v872_v23 = vmul.f32 %v853_v62, %v739_v9 }
 0x269   : > { %v855_v16 = vpop.f32.mrf.mxu3 }
 0x26a   : > { %v873_v24 = vmul.f32 %v855_v16, %v742_v10 }
 0x26c   : > { %v881_v41 = vpack.c.bf16 %v873_v24, %v872_v23 }
 0x26e   : > { %884 = vmatpush.bf16.msrb.mxu3 %v881_v41 }
 0x272   : > { %885 = vmatpush.bf16.msrb.mxu3 %v880_v48 }
 0x276   : > { %886 = vmatpush.bf16.msrb.mxu3 %v879_v22 }
 0x27a   : > { %887 = vmatpush.bf16.msrb.mxu3 %v878_v32 }
 0x27e   : > { %888 = vmatpush.bf16.msrb.mxu3 %v877_v31  ;;  %v883_v31 = vld [vmem:[#allocation3] sm:$0xff] }
 0x282   : > { %889 = vmatpush.bf16.msrb.mxu3 %v876_v21 }
 0x286   : > { %890 = vmatpush.bf16.msrb.mxu3 %v875_v12 }
 0x28a   : > { %891 = vmatpush.bf16.msrb.mxu3 %v874_v59 }
 0x28d   : > { %1664 = vmatmul.msk.bf16.vlgmr.msrb.gmra.mxu3 %vm1663_vm5, %v1788_v18 }
 0x310   : > { %v893_v21 = vpop.f32.mrf.mxu3 }
 0x311   : > { %v898_v26 = vadd.f32 %v893_v21, %v882_v20 }
 0x313   : > { %900 = vst [vmem:[#allocation3 + $0x8] sm:$0xff] %v898_v26 }
 0x317   : > { %905 = sbr.rel (%p1665_p9) target bundleno = 1057 (0x421), region = 72 }
 0x318   : > { %v895_v34 = vpop.f32.mrf.mxu3 }
 0x319   : > { %v899_v36 = vadd.f32 %v895_v34, %v883_v31 }
 0x31b   : > { %901 = vst [vmem:[#allocation3] sm:$0xff] %v899_v36 }
 0x31c   : > { %v1301_v30 = vld [vmem:[%s2847_s9 + $0x78] sm:$0xff]  ;;  %v1300_v47 = vld [vmem:[%s2847_s9 + $0x70] sm:$0xff]  ;;  %v1299_v8 = vld [vmem:[%s2847_s9 + $0x68] sm:$0xff] }
 0x31d   : > { %v1333_v35 = vld [vmem:[%s2847_s9 + $0x178] sm:$0xff]  ;;  %1398 = vmatpush.msra.mxu0 %v1301_v30  ;;  %v1332_v59 = vld [vmem:[%s2847_s9 + $0x170] sm:$0xff]  ;;  %v1331_v38 = vld [vmem:[%s2847_s9 + $0x168] sm:$0xff] }
 0x31e   : > { %1444 = vmatpush.msra.mxu2 %v1333_v35  ;;  %v1317_v55 = vld [vmem:[%s2847_s9 + $0xf8] sm:$0xff]  ;;  %v1316_v12 = vld [vmem:[%s2847_s9 + $0xf0] sm:$0xff]  ;;  %v1315_v40 = vld [vmem:[%s2847_s9 + $0xe8] sm:$0xff] }
 0x31f   : > { %v1349_v0 = vld [vmem:[%s2847_s9 + $0x1f8] sm:$0xff]  ;;  %1421 = vmatpush.msra.mxu1 %v1317_v55  ;;  %1399 = vmatpush.msra.mxu0 %v1300_v47  ;;  %v1348_v39 = vld [vmem:[%s2847_s9 + $0x1f0] sm:$0xff]  ;;  %v1298_v42 = vld [vmem:[%s2847_s9 + $0x60] sm:$0xff] }
 0x320   : > { %1467 = vmatpush.msra.mxu3 %v1349_v0  ;;  %1445 = vmatpush.msra.mxu2 %v1332_v59  ;;  %v1330_v44 = vld [vmem:[%s2847_s9 + $0x160] sm:$0xff]  ;;  %v1347_v46 = vld [vmem:[%s2847_s9 + $0x1e8] sm:$0xff]  ;;  %v1297_v52 = vld [vmem:[%s2847_s9 + $0x58] sm:$0xff] }
 0x321   : > { %1422 = vmatpush.msra.mxu1 %v1316_v12  ;;  %1400 = vmatpush.msra.mxu0 %v1299_v8  ;;  %v1314_v49 = vld [vmem:[%s2847_s9 + $0xe0] sm:$0xff]  ;;  %v1329_v53 = vld [vmem:[%s2847_s9 + $0x158] sm:$0xff]  ;;  %v1296_v57 = vld [vmem:[%s2847_s9 + $0x50] sm:$0xff] }
 0x322   : > { %1468 = vmatpush.msra.mxu3 %v1348_v39  ;;  %1446 = vmatpush.msra.mxu2 %v1331_v38  ;;  %v1346_v50 = vld [vmem:[%s2847_s9 + $0x1e0] sm:$0xff]  ;;  %v1313_v54 = vld [vmem:[%s2847_s9 + $0xd8] sm:$0xff]  ;;  %v1328_v58 = vld [vmem:[%s2847_s9 + $0x150] sm:$0xff]  ;;  %v1789_v39 = vmov 0.0  }
 0x323   : > { %1423 = vmatpush.msra.mxu1 %v1315_v40  ;;  %1401 = vmatpush.msra.mxu0 %v1298_v42  ;;  %v1345_v56 = vld [vmem:[%s2847_s9 + $0x1d8] sm:$0xff]  ;;  %v1312_v60 = vld [vmem:[%s2847_s9 + $0xd0] sm:$0xff]  ;;  %v1295_v62 = vld [vmem:[%s2847_s9 + $0x48] sm:$0xff] }
 0x324   : > { %1469 = vmatpush.msra.mxu3 %v1347_v46  ;;  %1447 = vmatpush.msra.mxu2 %v1330_v44  ;;  %v1344_v61 = vld [vmem:[%s2847_s9 + $0x1d0] sm:$0xff]  ;;  %v1327_v63 = vld [vmem:[%s2847_s9 + $0x148] sm:$0xff]  ;;  %v1294_v3 = vld [vmem:[%s2847_s9 + $0x40] sm:$0xff] }
 0x325   : > { %1424 = vmatpush.msra.mxu1 %v1314_v49  ;;  %1402 = vmatpush.msra.mxu0 %v1297_v52  ;;  %v1311_v1 = vld [vmem:[%s2847_s9 + $0xc8] sm:$0xff]  ;;  %v1326_v4 = vld [vmem:[%s2847_s9 + $0x140] sm:$0xff]  ;;  %v1293_v7 = vld [vmem:[%s2847_s9 + $0x38] sm:$0xff] }
 0x326   : > { %1470 = vmatpush.msra.mxu3 %v1346_v50  ;;  %1448 = vmatpush.msra.mxu2 %v1329_v53  ;;  %v1343_v2 = vld [vmem:[%s2847_s9 + $0x1c8] sm:$0xff]  ;;  %v1310_v5 = vld [vmem:[%s2847_s9 + $0xc0] sm:$0xff]  ;;  %v1325_v9 = vld [vmem:[%s2847_s9 + $0x138] sm:$0xff] }
 0x327   : > { %1425 = vmatpush.msra.mxu1 %v1313_v54  ;;  %1403 = vmatpush.msra.mxu0 %v1296_v57  ;;  %v1342_v6 = vld [vmem:[%s2847_s9 + $0x1c0] sm:$0xff]  ;;  %v1309_v10 = vld [vmem:[%s2847_s9 + $0xb8] sm:$0xff]  ;;  %v1292_v14 = vld [vmem:[%s2847_s9 + $0x30] sm:$0xff] }
 0x328   : > { %1471 = vmatpush.msra.mxu3 %v1345_v56  ;;  %1449 = vmatpush.msra.mxu2 %v1328_v58  ;;  %v1341_v13 = vld [vmem:[%s2847_s9 + $0x1b8] sm:$0xff]  ;;  %v1324_v15 = vld [vmem:[%s2847_s9 + $0x130] sm:$0xff]  ;;  %v1291_v19 = vld [vmem:[%s2847_s9 + $0x28] sm:$0xff] }
 0x329   : > { %1426 = vmatpush.msra.mxu1 %v1312_v60  ;;  %1404 = vmatpush.msra.mxu0 %v1295_v62  ;;  %v1308_v16 = vld [vmem:[%s2847_s9 + $0xb0] sm:$0xff]  ;;  %v1323_v23 = vld [vmem:[%s2847_s9 + $0x128] sm:$0xff]  ;;  %v1290_v29 = vld [vmem:[%s2847_s9 + $0x20] sm:$0xff] }
 0x32a   : > { %1472 = vmatpush.msra.mxu3 %v1344_v61  ;;  %1450 = vmatpush.msra.mxu2 %v1327_v63  ;;  %v1340_v17 = vld [vmem:[%s2847_s9 + $0x1b0] sm:$0xff]  ;;  %v1307_v24 = vld [vmem:[%s2847_s9 + $0xa8] sm:$0xff]  ;;  %v1322_v33 = vld [vmem:[%s2847_s9 + $0x120] sm:$0xff] }
 0x32b   : > { %1427 = vmatpush.msra.mxu1 %v1311_v1  ;;  %1405 = vmatpush.msra.mxu0 %v1294_v3  ;;  %v1339_v27 = vld [vmem:[%s2847_s9 + $0x1a8] sm:$0xff]  ;;  %v1306_v41 = vld [vmem:[%s2847_s9 + $0xa0] sm:$0xff]  ;;  %v1289_v45 = vld [vmem:[%s2847_s9 + $0x18] sm:$0xff] }
 0x32c   : > { %1473 = vmatpush.msra.mxu3 %v1343_v2  ;;  %1451 = vmatpush.msra.mxu2 %v1326_v4  ;;  %v1338_v37 = vld [vmem:[%s2847_s9 + $0x1a0] sm:$0xff]  ;;  %v1321_v28 = vld [vmem:[%s2847_s9 + $0x118] sm:$0xff]  ;;  %v1288_v51 = vld [vmem:[%s2847_s9 + $0x10] sm:$0xff] }
 0x32d   : > { %1428 = vmatpush.msra.mxu1 %v1310_v5  ;;  %1406 = vmatpush.msra.mxu0 %v1293_v7  ;;  %v1305_v43 = vld [vmem:[%s2847_s9 + $0x98] sm:$0xff]  ;;  %v1320_v11 = vld [vmem:[%s2847_s9 + $0x110] sm:$0xff]  ;;  %v1287_v25 = vld [vmem:[%s2847_s9 + $0x8] sm:$0xff] }
 0x32e   : > { %1474 = vmatpush.msra.mxu3 %v1342_v6  ;;  %1452 = vmatpush.msra.mxu2 %v1325_v9  ;;  %v1337_v48 = vld [vmem:[%s2847_s9 + $0x198] sm:$0xff]  ;;  %v1304_v22 = vld [vmem:[%s2847_s9 + $0x90] sm:$0xff]  ;;  %v1319_v18 = vld [vmem:[%s2847_s9 + $0x108] sm:$0xff] }
 0x32f   : > { %1429 = vmatpush.msra.mxu1 %v1309_v10  ;;  %1407 = vmatpush.msra.mxu0 %v1292_v14  ;;  %v1336_v32 = vld [vmem:[%s2847_s9 + $0x190] sm:$0xff]  ;;  %v1303_v20 = vld [vmem:[%s2847_s9 + $0x88] sm:$0xff]  ;;  %v1286_v26 = vld [vmem:[%s2847_s9] sm:$0xff] }
 0x330   : > { %1475 = vmatpush.msra.mxu3 %v1341_v13  ;;  %1453 = vmatpush.msra.mxu2 %v1324_v15  ;;  %v1335_v21 = vld [vmem:[%s2847_s9 + $0x188] sm:$0xff]  ;;  %v1318_v31 = vld [vmem:[%s2847_s9 + $0x100] sm:$0xff]  ;;  %v1365_v34 = vld [vmem:[%s2847_s9 + $0x278] sm:$0xff] }
 0x331   : > { %1430 = vmatpush.msra.mxu1 %v1308_v16  ;;  %1408 = vmatpush.msra.mxu0 %v1291_v19  ;;  %v1397_v36 = vld [vmem:[%s2847_s9 + $0x378] sm:$0xff]  ;;  %v1302_v30 = vld [vmem:[%s2847_s9 + $0x80] sm:$0xff]  ;;  %v1364_v55 = vld [vmem:[%s2847_s9 + $0x270] sm:$0xff] }
 0x332   : > { %1476 = vmatpush.msra.mxu3 %v1340_v17  ;;  %1454 = vmatpush.msra.mxu2 %v1323_v23  ;;  %v1334_v35 = vld [vmem:[%s2847_s9 + $0x180] sm:$0xff]  ;;  %v2409_v47 = vld [vmem:[#allocation3 + $0x8] sm:$0xff]  ;;  %v1396_v0 = vld [vmem:[%s2847_s9 + $0x370] sm:$0xff] }
 0x333   : > { %1431 = vmatpush.msra.mxu1 %v1307_v24  ;;  %1409 = vmatpush.msra.mxu0 %v1290_v29  ;;  %v1381_v59 = vld [vmem:[%s2847_s9 + $0x2f8] sm:$0xff]  ;;  %vm980_vm6 = vcmp.ge.f32.partialorder %v2409_v47, -1.5  ;;  %vm982_vm7 = vcmp.lt.f32.partialorder %v2409_v47, -1.0  ;;  %vm988_vm8 = vcmp.ge.f32.partialorder %v2409_v47, -1.0  ;;  %vm990_vm9 = vcmp.lt.f32.partialorder %v2409_v47, -0.5  ;;  %v1363_v12 = vld [vmem:[%s2847_s9 + $0x268] sm:$0xff] }
 0x334   : > { %1477 = vmatpush.msra.mxu3 %v1339_v27  ;;  %1455 = vmatpush.msra.mxu2 %v1322_v33  ;;  %v963_v8 = vld [vmem:[#allocation4 + $0x78] sm:$0xff]  ;;  %vm984_vm10 = vmand %vm980_vm6, %vm982_vm7  ;;  %vm996_vm11 = vcmp.ge.f32.partialorder %v2409_v47, -0.5  ;;  %vm998_vm12 = vcmp.lt.f32.partialorder %v2409_v47, 0.0  ;;  %vm1004_vm13 = vcmp.ge.f32.partialorder %v2409_v47, 0.0  ;;  %vm1006_vm14 = vcmp.lt.f32.partialorder %v2409_v47, 0.5  ;;  %v1380_v38 = vld [vmem:[%s2847_s9 + $0x2f0] sm:$0xff] }
 0x335   : > { %1432 = vmatpush.msra.mxu1 %v1306_v41  ;;  %1410 = vmatpush.msra.mxu0 %v1289_v45  ;;  %v2435_v40 = vsel %vm984_vm10, 1.0, %v1789_v39  ;;  %vm992_vm15 = vmand %vm988_vm8, %vm990_vm9  ;;  %v2442_v42 = vadd.f32 1.5, %v2409_v47  ;;  %v2445_v44 = vsub.f32 -0.5, %v2409_v47  ;;  %v2448_v46 = vadd.f32 1.0, %v2409_v47  ;;  %v1395_v49 = vld [vmem:[%s2847_s9 + $0x368] sm:$0xff]  ;;  %v962_v50 = vld [vmem:[#allocation4 + $0x70] sm:$0xff] }
 0x336   : > { %1478 = vmatpush.msra.mxu3 %v1338_v37  ;;  %1456 = vmatpush.msra.mxu2 %v1321_v28  ;;  %v994_v52 = vsel %vm992_vm15, 1.0, %v1789_v39  ;;  %vm1000_vm0 = vmand %vm996_vm11, %vm998_vm12  ;;  %v2459_v53 = vsub.f32 0.0, %v2409_v47  ;;  %v2462_v54 = vadd.f32 0.5, %v2409_v47  ;;  %v2465_v56 = vsub.f32 0.5, %v2409_v47  ;;  %v1362_v57 = vld [vmem:[%s2847_s9 + $0x260] sm:$0xff]  ;;  %v1379_v58 = vld [vmem:[%s2847_s9 + $0x2e8] sm:$0xff] }
 0x337   : > { %1433 = vmatpush.msra.mxu1 %v1305_v43  ;;  %1411 = vmatpush.msra.mxu0 %v1288_v51  ;;  %v1002_v60 = vsel %vm1000_vm0, 1.0, %v1789_v39  ;;  %vm1008_vm1 = vmand %vm1004_vm13, %vm1006_vm14  ;;  %v1074_v61 = vmul.f32 2.0, %v2442_v42  ;;  %v1080_v62 = vmul.f32 2.0, %v2445_v44  ;;  %v1088_v63 = vmul.f32 2.0, %v2448_v46  ;;  %v1394_v1 = vld [vmem:[%s2847_s9 + $0x360] sm:$0xff]  ;;  %v961_v2 = vld [vmem:[#allocation4 + $0x68] sm:$0xff] }
 0x338   : > { %1479 = vmatpush.msra.mxu3 %v1337_v48  ;;  %1457 = vmatpush.msra.mxu2 %v1320_v11  ;;  %v2485_v3 = vsel %vm1008_vm1, 1.0, %v1789_v39  ;;  %v1094_v4 = vmul.f32 2.0, %v2459_v53  ;;  %v1102_v5 = vmul.f32 2.0, %v2462_v54  ;;  %v1108_v6 = vmul.f32 2.0, %v2465_v56  ;;  %v1361_v7 = vld [vmem:[%s2847_s9 + $0x258] sm:$0xff]  ;;  %v1378_v9 = vld [vmem:[%s2847_s9 + $0x2e0] sm:$0xff] }
 0x339   : > { %1434 = vmatpush.msra.mxu1 %v1304_v22  ;;  %1412 = vmatpush.msra.mxu0 %v1287_v25  ;;  %v1076_v10 = vmul.f32 %v1074_v61, %v2435_v40  ;;  %v1082_v13 = vmul.f32 %v1080_v62, %v994_v52  ;;  %v1090_v14 = vmul.f32 %v1088_v63, %v994_v52  ;;  %v2498_v15 = vmul.f32 0.6666667, %v2442_v42  ;;  %v1393_v16 = vld [vmem:[%s2847_s9 + $0x358] sm:$0xff]  ;;  %v960_v17 = vld [vmem:[#allocation4 + $0x60] sm:$0xff]  ;;  %v1360_v29 = vld [vmem:[%s2847_s9 + $0x250] sm:$0xff] }
 0x33a   : > { %1480 = vmatpush.msra.mxu3 %v1336_v32  ;;  %1458 = vmatpush.msra.mxu2 %v1319_v18  ;;  %v1096_v19 = vmul.f32 %v1094_v4, %v1002_v60  ;;  %v1104_v23 = vmul.f32 %v1102_v5, %v1002_v60  ;;  %v1110_v24 = vmul.f32 %v1108_v6, %v2485_v3  ;;  %v1240_v27 = vmul.f32 0.6666667, %v2465_v56  ;;  %v1377_v33 = vld [vmem:[%s2847_s9 + $0x2d8] sm:$0xff]  ;;  %v1392_v37 = vld [vmem:[%s2847_s9 + $0x350] sm:$0xff]  ;;  %v1359_v51 = vld [vmem:[%s2847_s9 + $0x248] sm:$0xff] }
 0x33b   : > { %1435 = vmatpush.msra.mxu1 %v1303_v20  ;;  %1413 = vmatpush.msra.mxu0 %v1286_v26  ;;  %v1084_v41 = vadd.f32 %v1082_v13, %v1076_v10  ;;  %vm964_vm2 = vcmp.ge.f32.partialorder %v2409_v47, -2.5  ;;  %vm966_vm3 = vcmp.lt.f32.partialorder %v2409_v47, -2.0  ;;  %vm972_vm4 = vcmp.ge.f32.partialorder %v2409_v47, -2.0  ;;  %v959_v45 = vld [vmem:[#allocation4 + $0x58] sm:$0xff]  ;;  %v1376_v11 = vld [vmem:[%s2847_s9 + $0x2d0] sm:$0xff]  ;;  %v1391_v20 = vld [vmem:[%s2847_s9 + $0x348] sm:$0xff] }
 0x33c   : > { %1481 = vmatpush.msra.mxu3 %v1335_v21  ;;  %1459 = vmatpush.msra.mxu2 %v1318_v31  ;;  %v1098_v28 = vadd.f32 %v1096_v19, %v1090_v14  ;;  %v2517_v43 = vadd.f32 %v1110_v24, %v1104_v23  ;;  %vm968_vm5 = vmand %vm964_vm2, %vm966_vm3  ;;  %vm974_vm6 = vcmp.lt.f32.partialorder %v2409_v47, -1.5  ;;  %v2521_v48 = vadd.f32 2.5, %v2409_v47  ;;  %v958_v21 = vld [vmem:[#allocation4 + $0x50] sm:$0xff]  ;;  %v1357_v61 = vld [vmem:[%s2847_s9 + $0x238] sm:$0xff] }
 0x33d   : > { %1490 = vmatpush.msrb.mxu0 %v1365_v34  ;;  %1436 = vmatpush.msra.mxu1 %v1302_v30  ;;  %v1180_v22 = vmul.f32 %v2442_v42, %v1084_v41  ;;  %v970_v32 = vsel %vm968_vm5, 1.0, %v1789_v39  ;;  %vm976_vm7 = vmand %vm972_vm4, %vm974_vm6  ;;  %v1050_v25 = vsub.f32 -1.5, %v2409_v47  ;;  %v2535_v18 = vadd.f32 2.0, %v2409_v47  ;;  %v1358_v30 = vld [vmem:[%s2847_s9 + $0x240] sm:$0xff]  ;;  %v1389_v4 = vld [vmem:[%s2847_s9 + $0x338] sm:$0xff] }
 0x33e   : > { %1536 = vmatpush.msrb.mxu2 %v1397_v36  ;;  %1482 = vmatpush.msra.mxu3 %v1334_v35  ;;  %v1182_v26 = vmul.f32 %v1098_v28, %v2459_v53  ;;  %v1186_v31 = vmul.f32 %v2448_v46, %v1098_v28  ;;  %v1188_v34 = vmul.f32 %v2517_v43, %v2465_v56  ;;  %v978_v36 = vsel %vm976_vm7, 1.0, %v1789_v39  ;;  %v1375_v35 = vld [vmem:[%s2847_s9 + $0x2c8] sm:$0xff]  ;;  %v1390_v42 = vld [vmem:[%s2847_s9 + $0x340] sm:$0xff]  ;;  %v1373_v10 = vld [vmem:[%s2847_s9 + $0x2b8] sm:$0xff] }
 0x33f   : > { %1491 = vmatpush.msrb.mxu0 %v1364_v55  ;;  %1513 = vmatpush.msrb.mxu1 %v1381_v59  ;;  %v1046_v55 = vmul.f32 2.0, %v2521_v48  ;;  %v1052_v59 = vmul.f32 2.0, %v1050_v25  ;;  %v2565_v52 = vmul.f32 0.6666667, %v2521_v48  ;;  %v1374_v62 = vld [vmem:[%s2847_s9 + $0x2c0] sm:$0xff]  ;;  %vm1012_vm8 = vcmp.ge.f32.partialorder %v2409_v47, 0.5 }
 0x340   : > { %1537 = vmatpush.msrb.mxu2 %v1396_v0  ;;  %1559 = vmatpush.msrb.mxu3 %v963_v8  ;;  %v1060_v0 = vmul.f32 2.0, %v2535_v18  ;;  %v1064_v8 = vsub.f32 -1.0, %v2409_v47  ;;  %v956_v5 = vld [vmem:[#allocation4 + $0x40] sm:$0xff]  ;;  %vm1014_vm9 = vcmp.lt.f32.partialorder %v2409_v47, 1.0  ;;  %v1388_v13 = vld [vmem:[%s2847_s9 + $0x330] sm:$0xff]  ;;  %v1355_v19 = vld [vmem:[%s2847_s9 + $0x228] sm:$0xff] }
 0x341   : > { %1492 = vmatpush.msrb.mxu0 %v1363_v12  ;;  %1514 = vmatpush.msrb.mxu1 %v1380_v38  ;;  %v2554_v12 = vadd.f32 %v1182_v26, %v1180_v22  ;;  %v2556_v38 = vadd.f32 %v1188_v34, %v1186_v31  ;;  %v1048_v56 = vmul.f32 %v1046_v55, %v970_v32  ;;  %vm1016_vm10 = vmand %vm1012_vm8, %vm1014_vm9  ;;  %v1230_v22 = vmul.f32 0.6666667, %v2459_v53  ;;  %v954_v32 = vld [vmem:[#allocation4 + $0x30] sm:$0xff]  ;;  %v1354_v25 = vld [vmem:[%s2847_s9 + $0x220] sm:$0xff] }
 0x342   : > { %1538 = vmatpush.msrb.mxu2 %v1395_v49  ;;  %1560 = vmatpush.msrb.mxu3 %v962_v50  ;;  %v957_v49 = vld [vmem:[#allocation4 + $0x48] sm:$0xff]  ;;  %v2562_v50 = vmul.f32 %v1084_v41, %v2445_v44  ;;  %v1066_v60 = vmul.f32 2.0, %v1064_v8 }
 0x343   : > { %1493 = vmatpush.msrb.mxu0 %v1362_v57  ;;  %1515 = vmatpush.msrb.mxu1 %v1379_v58  ;;  %v1054_v57 = vmul.f32 %v1052_v59, %v978_v36  ;;  %v1062_v58 = vmul.f32 %v1060_v0, %v978_v36  ;;  %v1238_v63 = vmul.f32 %v2498_v15, %v2554_v12  ;;  %v2597_v15 = vadd.f32 -0.5, %v2409_v47  ;;  %v1387_v41 = vld [vmem:[%s2847_s9 + $0x328] sm:$0xff] }
 0x344   : > { %1539 = vmatpush.msrb.mxu2 %v1394_v1  ;;  %1561 = vmatpush.msrb.mxu3 %v961_v2  ;;  %v1242_v1 = vmul.f32 %v1240_v27, %v2556_v38  ;;  %v2577_v2 = vmul.f32 0.6666667, %v2445_v44  ;;  %v1356_v44 = vld [vmem:[%s2847_s9 + $0x230] sm:$0xff]  ;;  %v1018_v27 = vsel %vm1016_vm10, 1.0, %v1789_v39  ;;  %v1371_v53 = vld [vmem:[%s2847_s9 + $0x2a8] sm:$0xff]  ;;  %v1232_v34 = vmul.f32 %v1230_v22, %v2554_v12  ;;  %v1382_v22 = vld [vmem:[%s2847_s9 + $0x300] sm:$0xff] }
 0x345   : > { %1494 = vmatpush.msrb.mxu0 %v1361_v7  ;;  %1516 = vmatpush.msrb.mxu1 %v1378_v9  ;;  %v1056_v6 = vadd.f32 %v1054_v57, %v1048_v56  ;;  %v1068_v7 = vmul.f32 %v1066_v60, %v2435_v40  ;;  %v1114_v9 = vmul.f32 2.0, %v2409_v47  ;;  %v1118_v40 = vsub.f32 1.0, %v2409_v47  ;;  %v953_v36 = vld [vmem:[#allocation4 + $0x28] sm:$0xff] }
 0x346   : > { %1540 = vmatpush.msrb.mxu2 %v1393_v16  ;;  %1562 = vmatpush.msrb.mxu3 %v960_v17  ;;  %v1244_v14 = vadd.f32 %v1242_v1, %v1238_v63  ;;  %v2601_v16 = vmul.f32 %v2462_v54, %v2517_v43  ;;  %v955_v17 = vld [vmem:[#allocation4 + $0x38] sm:$0xff]  ;;  %v1128_v28 = vmul.f32 2.0, %v2597_v15  ;;  %v1246_v43 = vmul.f32 0.6666667, %v2448_v46 }
 0x347   : > { %1495 = vmatpush.msrb.mxu0 %v1360_v29  ;;  %1517 = vmatpush.msrb.mxu1 %v1377_v33  ;;  %v1070_v23 = vadd.f32 %v1068_v7, %v1062_v58  ;;  %v1168_v24 = vmul.f32 %v2521_v48, %v1056_v6  ;;  %v1116_v29 = vmul.f32 %v1114_v9, %v2485_v3  ;;  %v1372_v33 = vld [vmem:[%s2847_s9 + $0x2b0] sm:$0xff]  ;;  %v2619_v48 = vmul.f32 0.6666667, %v1118_v40  ;;  %v1369_v6 = vld [vmem:[%s2847_s9 + $0x298] sm:$0xff] }
 0x348   : > { %1541 = vmatpush.msrb.mxu2 %v1392_v37  ;;  %1563 = vmatpush.msrb.mxu3 %v959_v45  ;;  %v2615_v37 = vld [vmem:[#allocation3] sm:$0xff]  ;;  %v1120_v45 = vmul.f32 2.0, %v1118_v40  ;;  %v2630_v46 = vmul.f32 %v1246_v43, %v2556_v38  ;;  %v1350_v43 = vld [vmem:[%s2847_s9 + $0x200] sm:$0xff] }
 0x349   : > { %1496 = vmatpush.msrb.mxu0 %v1359_v51  ;;  %1518 = vmatpush.msrb.mxu1 %v1376_v11  ;;  %v1170_v3 = vmul.f32 %v1070_v23, %v1064_v8  ;;  %v1174_v51 = vmul.f32 %v2535_v18, %v1070_v23  ;;  %v1226_v11 = vmul.f32 0.6666667, %v2535_v18  ;;  %vm981_vm11 = vcmp.ge.f32.partialorder %v2615_v37, -1.5  ;;  %v1386_v18 = vld [vmem:[%s2847_s9 + $0x320] sm:$0xff] }
 0x34a   : > { %1542 = vmatpush.msrb.mxu2 %v1391_v20  ;;  %1564 = vmatpush.msrb.mxu3 %v958_v21  ;;  %v1122_v20 = vmul.f32 %v1120_v45, %v1018_v27  ;;  %v2627_v21 = vmul.f32 %v1128_v28, %v1018_v27  ;;  %vm983_vm12 = vcmp.lt.f32.partialorder %v2615_v37, -1.0  ;;  %vm989_vm14 = vcmp.ge.f32.partialorder %v2615_v37, -1.0  ;;  %v1383_v27 = vld [vmem:[%s2847_s9 + $0x308] sm:$0xff]  ;;  %v950_v28 = vld [vmem:[#allocation4 + $0x10] sm:$0xff] }
 0x34b   : > { %1497 = vmatpush.msrb.mxu0 %v1358_v30  ;;  %1519 = vmatpush.msrb.mxu1 %v1375_v35  ;;  %v1172_v26 = vadd.f32 %v1170_v3, %v1168_v24  ;;  %v1178_v31 = vadd.f32 %v2562_v50, %v1174_v51  ;;  %vm985_vm13 = vmand %vm981_vm11, %vm983_vm12  ;;  %vm991_vm15 = vcmp.lt.f32.partialorder %v2615_v37, -0.5  ;;  %vm997_vm0 = vcmp.ge.f32.partialorder %v2615_v37, -0.5  ;;  %v1353_v50 = vld [vmem:[%s2847_s9 + $0x218] sm:$0xff]  ;;  %v1368_v24 = vld [vmem:[%s2847_s9 + $0x290] sm:$0xff] }
 0x34c   : > { %1543 = vmatpush.msrb.mxu2 %v1390_v42  ;;  %1565 = vmatpush.msrb.mxu3 %v957_v49  ;;  %v2642_v30 = vadd.f32 %v1122_v20, %v1116_v29  ;;  %v2650_v0 = vsel %vm985_vm13, 1.0, %v1789_v39  ;;  %vm993_vm1 = vmand %vm989_vm14, %vm991_vm15  ;;  %vm999_vm2 = vcmp.lt.f32.partialorder %v2615_v37, 0.0  ;;  %vm1005_vm3 = vcmp.ge.f32.partialorder %v2615_v37, 0.0  ;;  %v949_v20 = vld [vmem:[#allocation4 + $0x8] sm:$0xff] }
 0x34d   : > { %1498 = vmatpush.msrb.mxu0 %v1357_v61  ;;  %1520 = vmatpush.msrb.mxu1 %v1374_v62  ;;  %v1218_v35 = vmul.f32 %v2565_v52, %v1172_v26  ;;  %v1222_v55 = vmul.f32 %v2577_v2, %v1178_v31  ;;  %v1228_v59 = vmul.f32 %v1226_v11, %v1178_v31  ;;  %v995_v12 = vsel %vm993_vm1, 1.0, %v1789_v39  ;;  %vm1001_vm4 = vmand %vm997_vm0, %vm999_vm2  ;;  %v1370_v52 = vld [vmem:[%s2847_s9 + $0x2a0] sm:$0xff]  ;;  %v1385_v61 = vld [vmem:[%s2847_s9 + $0x318] sm:$0xff] }
 0x34e   : > { %1544 = vmatpush.msrb.mxu2 %v1389_v4  ;;  %1566 = vmatpush.msrb.mxu3 %v956_v5  ;;  %v1194_v8 = vmul.f32 %v2642_v30, %v1118_v40  ;;  %vm1007_vm5 = vcmp.lt.f32.partialorder %v2615_v37, 0.5  ;;  %v2660_v49 = vadd.f32 1.5, %v2615_v37  ;;  %v1003_v57 = vsel %vm1001_vm4, 1.0, %v1789_v39  ;;  %v952_v62 = vld [vmem:[#allocation4 + $0x20] sm:$0xff]  ;;  %v1352_v5 = vld [vmem:[%s2847_s9 + $0x210] sm:$0xff]  ;;  %v1351_v40 = vld [vmem:[%s2847_s9 + $0x208] sm:$0xff] }
 0x34f   : > { %1460 = vmatmul.f32.vlgmr.msra.gmra.mxu2 %v1244_v14  ;;  %1499 = vmatpush.msrb.mxu0 %v1356_v44  ;;  %v1224_v38 = vadd.f32 %v1222_v55, %v1218_v35  ;;  %v1234_v42 = vadd.f32 %v1232_v34, %v1228_v59  ;;  %vm1009_vm6 = vmand %vm1005_vm3, %vm1007_vm5  ;;  %v2673_v58 = vsub.f32 -0.5, %v2615_v37  ;;  %v2676_v60 = vadd.f32 1.0, %v2615_v37  ;;  %v951_v14 = vld [vmem:[#allocation4 + $0x18] sm:$0xff]  ;;  %v1367_v11 = vld [vmem:[%s2847_s9 + $0x288] sm:$0xff] }
 0x350   : > { %1521 = vmatpush.msrb.mxu1 %v1373_v10  ;;  %1545 = vmatpush.msrb.mxu2 %v1388_v13  ;;  %v2669_v56 = vadd.f32 %v1194_v8, %v2601_v16  ;;  %v2682_v63 = vsel %vm1009_vm6, 1.0, %v1789_v39  ;;  %v1075_v1 = vmul.f32 2.0, %v2660_v49  ;;  %v2686_v2 = vsub.f32 0.0, %v2615_v37  ;;  %v1384_v13 = vld [vmem:[%s2847_s9 + $0x310] sm:$0xff] }
 0x351   : > { %1567 = vmatpush.msrb.mxu3 %v955_v17  ;;  %1500 = vmatpush.msrb.mxu0 %v1355_v19  ;;  %v2689_v4 = vadd.f32 0.5, %v2615_v37  ;;  %v1081_v9 = vmul.f32 2.0, %v2673_v58  ;;  %v1089_v44 = vmul.f32 2.0, %v2676_v60  ;;  %v1107_v10 = vsub.f32 0.5, %v2615_v37 }
 0x352   : > { %1522 = vmatpush.msrb.mxu1 %v1372_v33  ;;  %1546 = vmatpush.msrb.mxu2 %v1387_v41  ;;  %v1252_v7 = vmul.f32 %v2619_v48, %v2669_v56  ;;  %v1077_v16 = vmul.f32 %v1075_v1, %v2650_v0  ;;  %v1095_v17 = vmul.f32 2.0, %v2686_v2  ;;  %v1237_v23 = vmul.f32 0.6666667, %v2660_v49 }
 0x353   : > { %1568 = vmatpush.msrb.mxu3 %v954_v32  ;;  %1501 = vmatpush.msrb.mxu0 %v1354_v25  ;;  %v1103_v19 = vmul.f32 2.0, %v2689_v4  ;;  %v1083_v33 = vmul.f32 %v1081_v9, %v995_v12  ;;  %v1091_v41 = vmul.f32 %v1089_v44, %v995_v12  ;;  %v1109_v45 = vmul.f32 2.0, %v1107_v10 }
 0x354   : > { %1523 = vmatpush.msrb.mxu1 %v1371_v53  ;;  %1547 = vmatpush.msrb.mxu2 %v1386_v18  ;;  %v1254_v29 = vadd.f32 %v1252_v7, %v2630_v46  ;;  %v1097_v48 = vmul.f32 %v1095_v17, %v1003_v57  ;;  %v1241_v51 = vmul.f32 0.6666667, %v1107_v10  ;;  %vm965_vm7 = vcmp.ge.f32.partialorder %v2615_v37, -2.5 }
 0x355   : > { %1569 = vmatpush.msrb.mxu3 %v953_v36  ;;  %1502 = vmatpush.msrb.mxu0 %v1353_v50  ;;  %v1105_v3 = vmul.f32 %v1103_v19, %v1003_v57  ;;  %v1085_v32 = vadd.f32 %v1083_v33, %v1077_v16  ;;  %v1111_v25 = vmul.f32 %v1109_v45, %v2682_v63  ;;  %vm967_vm8 = vcmp.lt.f32.partialorder %v2615_v37, -2.0  ;;  %v1366_v50 = vld [vmem:[%s2847_s9 + $0x280] sm:$0xff] }
 0x356   : > { %1524 = vmatpush.msrb.mxu1 %v1370_v52  ;;  %1414 = vmatmul.f32.vlgmr.msra.gmra.mxu0 %v1224_v38  ;;  %vm973_vm9 = vcmp.ge.f32.partialorder %v2615_v37, -2.0  ;;  %v1099_v46 = vadd.f32 %v1097_v48, %v1091_v41  ;;  %vm969_vm10 = vmand %vm965_vm7, %vm967_vm8  ;;  %vm975_vm11 = vcmp.lt.f32.partialorder %v2615_v37, -1.5  ;;  %v1669_v53 = vadd.f32 2.5, %v2615_v37  ;;  %v948_v52 = vld [vmem:[#allocation4] sm:$0xff] }
 0x357   : > { %1437 = vmatmul.f32.vlgmr.msra.gmra.mxu1 %v1234_v42  ;;  %1548 = vmatpush.msrb.mxu2 %v1385_v61  ;;  %v1051_v18 = vsub.f32 -1.5, %v2615_v37  ;;  %v1113_v26 = vadd.f32 %v1111_v25, %v1105_v3  ;;  %v1181_v31 = vmul.f32 %v2660_v49, %v1085_v32  ;;  %v971_v34 = vsel %vm969_vm10, 1.0, %v1789_v39  ;;  %vm977_vm12 = vmand %vm973_vm9, %vm975_vm11 }
 0x358   : > { %1570 = vmatpush.msrb.mxu3 %v952_v62  ;;  %1503 = vmatpush.msrb.mxu0 %v1352_v5  ;;  %v1671_v36 = vadd.f32 2.0, %v2615_v37  ;;  %v1183_v35 = vmul.f32 %v1099_v46, %v2686_v2  ;;  %v1187_v55 = vmul.f32 %v2676_v60, %v1099_v46  ;;  %v979_v59 = vsel %vm977_vm12, 1.0, %v1789_v39 }
 0x359   : > { %1525 = vmatpush.msrb.mxu1 %v1369_v6  ;;  %1549 = vmatpush.msrb.mxu2 %v1384_v13  ;;  %v1047_v8 = vmul.f32 2.0, %v1669_v53  ;;  %v1189_v12 = vmul.f32 %v1113_v26, %v1107_v10  ;;  %v1053_v38 = vmul.f32 2.0, %v1051_v18  ;;  %v1065_v49 = vsub.f32 -1.0, %v2615_v37 }
 0x35a   : > { %1571 = vmatpush.msrb.mxu3 %v951_v14  ;;  %1504 = vmatpush.msrb.mxu0 %v1351_v40  ;;  %v1061_v42 = vmul.f32 2.0, %v1671_v36  ;;  %v1185_v57 = vadd.f32 %v1183_v35, %v1181_v31  ;;  %v1177_v62 = vmul.f32 %v1085_v32, %v2673_v58  ;;  %v1217_v44 = vmul.f32 0.6666667, %v1669_v53 }
 0x35b   : > { %1526 = vmatpush.msrb.mxu1 %v1368_v24  ;;  %1483 = vmatmul.f32.vlgmr.msra.gmra.mxu3 %v1254_v29  ;;  %v1049_v61 = vmul.f32 %v1047_v8, %v971_v34  ;;  %v1191_v1 = vadd.f32 %v1189_v12, %v1187_v55  ;;  %v1055_v5 = vmul.f32 %v1053_v38, %v979_v59  ;;  %v1067_v7 = vmul.f32 2.0, %v1065_v49 }
 0x35c   : > { %1550 = vmatpush.msrb.mxu2 %v1383_v27  ;;  %1572 = vmatpush.msrb.mxu3 %v950_v28  ;;  %v1063_v6 = vmul.f32 %v1061_v42, %v979_v59  ;;  %v1239_v9 = vmul.f32 %v1237_v23, %v1185_v57  ;;  %vm1013_vm13 = vcmp.ge.f32.partialorder %v2615_v37, 0.5  ;;  %vm1015_vm14 = vcmp.lt.f32.partialorder %v2615_v37, 1.0 }
 0x35d   : > { %1505 = vmatpush.msrb.mxu0 %v1350_v43  ;;  %1527 = vmatpush.msrb.mxu1 %v1367_v11  ;;  %v1243_v10 = vmul.f32 %v1241_v51, %v1191_v1  ;;  %v1057_v13 = vadd.f32 %v1055_v5, %v1049_v61  ;;  %v1069_v14 = vmul.f32 %v1067_v7, %v2650_v0  ;;  %vm1017_vm15 = vmand %vm1013_vm13, %vm1015_vm14  ;;  %v1115_v40 = vmul.f32 2.0, %v2615_v37 }
 0x35e   : > { %1551 = vmatpush.msrb.mxu2 %v1382_v22  ;;  %1573 = vmatpush.msrb.mxu3 %v949_v20  ;;  %v1221_v16 = vmul.f32 0.6666667, %v2673_v58  ;;  %v2752_v17 = vsel %vm1017_vm15, 1.0, %v1789_v39  ;;  %v1119_v19 = vsub.f32 1.0, %v2615_v37  ;;  %v1247_v23 = vmul.f32 0.6666667, %v2676_v60 }
 0x35f   : > { %1528 = vmatpush.msrb.mxu1 %v1366_v50  ;;  %v1245_v24 = vadd.f32 %v1243_v10, %v1239_v9  ;;  %v1071_v27 = vadd.f32 %v1069_v14, %v1063_v6  ;;  %v1169_v29 = vmul.f32 %v1669_v53, %v1057_v13  ;;  %v1193_v33 = vmul.f32 %v2689_v4, %v1113_v26 }
 0x360   : > { %1574 = vmatpush.msrb.mxu3 %v948_v52  ;;  %v1117_v41 = vmul.f32 %v1115_v40, %v2682_v63  ;;  %v1121_v0 = vmul.f32 2.0, %v1119_v19  ;;  %v1249_v45 = vmul.f32 %v1247_v23, %v1191_v1  ;;  %v1227_v28 = vmul.f32 0.6666667, %v1671_v36 }
 0x361   : > { %1463 = vmatmul.f32.gmra.mxu2 %v1245_v24  ;;  %v1171_v43 = vmul.f32 %v1071_v27, %v1065_v49  ;;  %v1175_v58 = vmul.f32 %v1671_v36, %v1071_v27  ;;  %v1231_v48 = vmul.f32 0.6666667, %v2686_v2  ;;  %vm1020_vm0 = vcmp.ge.f32.partialorder %v2409_v47, 1.0 }
 0x362   : > { %v1123_v3 = vmul.f32 %v1121_v0, %v2752_v17  ;;  %v1251_v60 = vmul.f32 0.6666667, %v1119_v19  ;;  %vm1022_vm1 = vcmp.lt.f32.partialorder %v2409_v47, 1.5  ;;  %v1132_v51 = vsub.f32 1.5, %v2409_v47 }
 0x363   : > { %v1173_v11 = vadd.f32 %v1171_v43, %v1169_v29  ;;  %v1179_v22 = vadd.f32 %v1177_v62, %v1175_v58  ;;  %v1233_v63 = vmul.f32 %v1231_v48, %v1185_v57  ;;  %vm1024_vm2 = vmand %vm1020_vm0, %vm1022_vm1  ;;  %v1198_v32 = vmul.f32 %v2642_v30, %v2409_v47 }
 0x364   : > { %v2765_v25 = vadd.f32 %v1123_v3, %v1117_v41  ;;  %v1026_v2 = vsel %vm1024_vm2, 1.0, %v1789_v39  ;;  %v1134_v20 = vmul.f32 2.0, %v1132_v51  ;;  %v1256_v46 = vmul.f32 0.6666667, %v2462_v54 }
 0x365   : > { %v1219_v53 = vmul.f32 %v1217_v44, %v1173_v11  ;;  %v1223_v18 = vmul.f32 %v1221_v16, %v1179_v22  ;;  %v1229_v26 = vmul.f32 %v1227_v28, %v1179_v22  ;;  %v1260_v31 = vmul.f32 0.6666667, %v1132_v51 }
 0x366   : > { %v1195_v34 = vmul.f32 %v2765_v25, %v1119_v19  ;;  %v1136_v36 = vmul.f32 %v1134_v20, %v1026_v2  ;;  %vm1028_vm3 = vcmp.ge.f32.partialorder %v2409_v47, 1.5  ;;  %vm1030_vm4 = vcmp.lt.f32.partialorder %v2409_v47, 2.0 }
 0x367   : > { %v1225_v35 = vadd.f32 %v1223_v18, %v1219_v53  ;;  %v1235_v30 = vadd.f32 %v1233_v63, %v1229_v26  ;;  %vm1032_vm5 = vmand %vm1028_vm3, %vm1030_vm4  ;;  %vm1036_vm6 = vcmp.ge.f32.partialorder %v2409_v47, 2.0  ;;  %vm1038_vm7 = vcmp.lt.f32.partialorder %v2409_v47, 2.5 }
 0x368   : > { %v2774_v55 = vadd.f32 %v1195_v34, %v1193_v33  ;;  %v1138_v54 = vadd.f32 %v1136_v36, %v2627_v21  ;;  %v1258_v59 = vmul.f32 %v1256_v46, %v2669_v56  ;;  %vm1040_vm8 = vmand %vm1036_vm6, %vm1038_vm7  ;;  %v1680_v8 = vadd.f32 -1.0, %v2409_v47 }
 0x369   : > { %1417 = vmatmul.f32.gmra.mxu0 %v1225_v35  ;;  %1440 = vmatmul.f32.gmra.mxu1 %v1235_v30  ;;  %v1034_v12 = vsel %vm1032_vm5, 1.0, %v1789_v39  ;;  %v1146_v38 = vsub.f32 2.0, %v2409_v47  ;;  %v1682_v42 = vadd.f32 -1.5, %v2409_v47  ;;  %v1160_v49 = vsub.f32 2.5, %v2409_v47 }
 0x36a   : > { %v1253_v50 = vmul.f32 %v1251_v60, %v2774_v55  ;;  %v1200_v52 = vmul.f32 %v1138_v54, %v1132_v51  ;;  %v1042_v21 = vsel %vm1040_vm8, 1.0, %v1789_v39  ;;  %v1142_v57 = vmul.f32 2.0, %v1680_v8 }
 0x36b   : > { %v1148_v56 = vmul.f32 2.0, %v1146_v38  ;;  %v1156_v61 = vmul.f32 2.0, %v1682_v42  ;;  %v1162_v62 = vmul.f32 2.0, %v1160_v49  ;;  %v1204_v1 = vmul.f32 %v2597_v15, %v1138_v54 }
 0x36c   : > { %v1255_v5 = vadd.f32 %v1253_v50, %v1249_v45  ;;  %v1202_v6 = vadd.f32 %v1200_v52, %v1198_v32  ;;  %v1144_v7 = vmul.f32 %v1142_v57, %v1026_v2  ;;  %v1276_v9 = vmul.f32 0.6666667, %v2597_v15 }
 0x36d   : > { %v1150_v44 = vmul.f32 %v1148_v56, %v1034_v12  ;;  %v1158_v10 = vmul.f32 %v1156_v61, %v1034_v12  ;;  %v1164_v13 = vmul.f32 %v1162_v62, %v1042_v21  ;;  %v1280_v14 = vmul.f32 0.6666667, %v1160_v49 }
 0x36e   : > { %1486 = vmatmul.f32.gmra.mxu3 %v1255_v5  ;;  %v1262_v40 = vmul.f32 %v1260_v31, %v1202_v6  ;;  %v1266_v16 = vmul.f32 0.6666667, %v2409_v47  ;;  %v1666_v19 = vmul.f32 -1.442695, %v2409_v47  ;;  %vm1021_vm9 = vcmp.ge.f32.partialorder %v2615_v37, 1.0 }
 0x36f   : > { %v1152_v23 = vadd.f32 %v1150_v44, %v1144_v7  ;;  %v1166_v24 = vadd.f32 %v1164_v13, %v1158_v10  ;;  %v1270_v27 = vmul.f32 0.6666667, %v1146_v38  ;;  %vm1023_vm10 = vcmp.lt.f32.partialorder %v2615_v37, 1.5 }
 0x370   : > { %v1264_v29 = vadd.f32 %v1262_v40, %v1258_v59  ;;  %1733 = vpow2.f32 %v1666_v19  ;;  %vm1025_vm11 = vmand %vm1021_vm9, %vm1023_vm10  ;;  %v2792_v15 = vadd.f32 -0.5, %v2615_v37  ;;  %v1133_v33 = vsub.f32 1.5, %v2615_v37 }
 0x371   : > { %v1206_v41 = vmul.f32 %v1152_v23, %v1146_v38  ;;  %v1210_v0 = vmul.f32 %v1680_v8, %v1152_v23  ;;  %v1212_v45 = vmul.f32 %v1166_v24, %v1160_v49  ;;  %v1027_v28 = vsel %vm1025_vm11, 1.0, %v1789_v39 }
 0x372   : > { %1506 = vmatmul.f32.vlgmr.msrb.gmra.mxu0 %v1264_v29  ;;  %v1129_v43 = vmul.f32 2.0, %v2792_v15  ;;  %v1135_v58 = vmul.f32 2.0, %v1133_v33  ;;  %v1268_v60 = vmul.f32 %v1266_v16, %v1202_v6  ;;  %vm1029_vm12 = vcmp.ge.f32.partialorder %v2615_v37, 1.5 }
 0x373   : > { %v1208_v48 = vadd.f32 %v1206_v41, %v1204_v1  ;;  %v1214_v3 = vadd.f32 %v1212_v45, %v1210_v0  ;;  %v1199_v22 = vmul.f32 %v2765_v25, %v2615_v37  ;;  %vm1031_vm13 = vcmp.lt.f32.partialorder %v2615_v37, 2.0 }
 0x374   : > { %v1131_v51 = vmul.f32 %v1129_v43, %v2752_v17  ;;  %v1137_v11 = vmul.f32 %v1135_v58, %v1027_v28  ;;  %v1257_v20 = vmul.f32 0.6666667, %v2689_v4  ;;  %vm2803_vm14 = vmand %vm1029_vm12, %vm1031_vm13  ;;  %vm1037_vm15 = vcmp.ge.f32.partialorder %v2615_v37, 2.0 }
 0x375   : > { %v1278_v63 = vmul.f32 %v1276_v9, %v1208_v48  ;;  %v1282_v32 = vmul.f32 %v1280_v14, %v1214_v3  ;;  %v1272_v2 = vmul.f32 %v1270_v27, %v1208_v48  ;;  %vm1039_vm0 = vcmp.lt.f32.partialorder %v2615_v37, 2.5 }
 0x376   : > { %v1734_v46 = vpop.eup %1733  ;;  %v1139_v53 = vadd.f32 %v1137_v11, %v1131_v51  ;;  %v1681_v17 = vadd.f32 -1.0, %v2615_v37  ;;  %v1147_v34 = vsub.f32 2.0, %v2615_v37  ;;  %v1261_v35 = vmul.f32 0.6666667, %v1133_v33  ;;  %vm1041_vm1 = vmand %vm1037_vm15, %vm1039_vm0 }
 0x377   : > { %v1284_v25 = vadd.f32 %v1282_v32, %v1278_v63  ;;  %v1274_v26 = vadd.f32 %v1272_v2, %v1268_v60  ;;  %v914_v31 = vadd.f32 1.0, %v1734_v46  ;;  %v1683_v30 = vadd.f32 -1.5, %v2615_v37 }
 0x378   : > { %v1201_v36 = vmul.f32 %v1139_v53, %v1133_v33  ;;  %v1143_v4 = vmul.f32 2.0, %v1681_v17  ;;  %v1259_v54 = vmul.f32 %v1257_v20, %v2774_v55  ;;  %v1035_v59 = vsel %vm2803_vm14, 1.0, %v1789_v39 }
 0x379   : > { %1552 = vmatmul.f32.vlgmr.msrb.gmra.mxu2 %v1284_v25  ;;  %1529 = vmatmul.f32.vlgmr.msrb.gmra.mxu1 %v1274_v26  ;;  %1735 = vrcp.f32 %v914_v31  ;;  %v1149_v38 = vmul.f32 2.0, %v1147_v34  ;;  %v1157_v42 = vmul.f32 2.0, %v1683_v30  ;;  %v1161_v49 = vsub.f32 2.5, %v2615_v37 }
 0x37a   : > { %v1203_v8 = vadd.f32 %v1201_v36, %v1199_v22  ;;  %v1145_v12 = vmul.f32 %v1143_v4, %v1027_v28  ;;  %v1043_v52 = vsel %vm1041_vm1, 1.0, %v1789_v39  ;;  %v1205_v56 = vmul.f32 %v2792_v15, %v1139_v53 }
 0x37b   : > { %v1151_v21 = vmul.f32 %v1149_v38, %v1035_v59  ;;  %v1159_v55 = vmul.f32 %v1157_v42, %v1035_v59  ;;  %v1163_v57 = vmul.f32 2.0, %v1161_v49  ;;  %v1267_v1 = vmul.f32 0.6666667, %v2615_v37 }
 0x37c   : > { %v1263_v50 = vmul.f32 %v1261_v35, %v1203_v8  ;;  %v1667_v5 = vmul.f32 -1.442695, %v2615_v37  ;;  %vm921_vm2 = vweird.f32 %v914_v31  ;;  %v925_v7 = vand.u32 2147483647, %v914_v31 }
 0x37d   : > { %v1153_v62 = vadd.f32 %v1151_v21, %v1145_v12  ;;  %v1165_v9 = vmul.f32 %v1163_v57, %v1043_v52  ;;  %v927_v10 = vand.u32 2147483648, %v914_v31  ;;  %v1271_v39 = vmul.f32 0.6666667, %v1147_v34 }
 0x37e   : > { %v1265_v61 = vadd.f32 %v1263_v50, %v1259_v54  ;;  %v1277_v16 = vmul.f32 0.6666667, %v2792_v15  ;;  %1737 = vpow2.f32 %v1667_v5  ;;  %v1269_v24 = vmul.f32 %v1267_v1, %v1203_v8 }
 0x37f   : > { %v1736_v6 = vpop.eup %1735  ;;  %v1207_v13 = vmul.f32 %v1153_v62, %v1147_v34  ;;  %v1167_v14 = vadd.f32 %v1165_v9, %v1159_v55  ;;  %v1211_v40 = vmul.f32 %v1681_v17, %v1153_v62  ;;  %v1281_v29 = vmul.f32 0.6666667, %v1161_v49 }
 0x380   : > { %v917_v44 = vmul.f32 %v1736_v6, %v914_v31  ;;  %1509 = vmatmul.f32.gmra.mxu0 %v1265_v61  ;;  %vm922_vm3 = vweird.f32 %v1736_v6  ;;  %v928_v0 = vor.u32 1.1754944e-38, %v927_v10  ;;  %vm926_vm5 = vcmp.eq.f32.partialorder %v925_v7, 8.507059e+37 }
 0x381   : > { %v1209_v23 = vadd.f32 %v1207_v13, %v1205_v56  ;;  %v1213_v27 = vmul.f32 %v1167_v14, %v1161_v49  ;;  %vm923_vm4 = vmor %vm921_vm2, %vm922_vm3 }
 0x382   : > { %v918_v19 = vsub.f32 1.0, %v917_v44 }
 0x383   : > { %v1273_v41 = vmul.f32 %v1271_v39, %v1209_v23  ;;  %v1215_v45 = vadd.f32 %v1213_v27, %v1211_v40  ;;  %v1279_v28 = vmul.f32 %v1277_v16, %v1209_v23 }
 0x384   : > { %v919_v33 = vmul.f32 %v1736_v6, %v918_v19  ;;  %v1738_v48 = vpop.eup %1737 }
 0x385   : > { %v1275_v58 = vadd.f32 %v1273_v41, %v1269_v24  ;;  %v1283_v3 = vmul.f32 %v1281_v29, %v1215_v45  ;;  %v915_v60 = vadd.f32 1.0, %v1738_v48 }
 0x386   : > { %v920_v43 = vadd.f32 %v1736_v6, %v919_v33 }
 0x387   : > { %1532 = vmatmul.f32.gmra.mxu1 %v1275_v58  ;;  %v1285_v11 = vadd.f32 %v1283_v3, %v1279_v28  ;;  %1739 = vrcp.f32 %v915_v60  ;;  %v942_v2 = vand.u32 2147483648, %v915_v60  ;;  %vm936_vm6 = vweird.f32 %v915_v60 }
 0x388   : > { %v924_v15 = vsel %vm923_vm4, %v1736_v6, %v920_v43  ;;  %v940_v46 = vand.u32 2147483647, %v915_v60 }
 0x389   : > { %v929_v51 = vsel %vm926_vm5, %v928_v0, %v924_v15  ;;  %1555 = vmatmul.f32.gmra.mxu2 %v1285_v11  ;;  %v943_v18 = vor.u32 1.1754944e-38, %v942_v2 }
 0x38a   : > { %v946_v22 = vmul.f32 %v929_v51, %v2409_v47  ;;  %vm941_vm9 = vcmp.eq.f32.partialorder %v940_v46, 8.507059e+37 }
 0x38c   : > { %1575 = vmatmul.f32.vlgmr.msrb.gmra.mxu3 %v946_v22 }
 0x38d   : > { %v1740_v63 = vpop.eup %1739 }
 0x38e   : > { %v932_v32 = vmul.f32 %v1740_v63, %v915_v60  ;;  %vm937_vm7 = vweird.f32 %v1740_v63 }
 0x38f   : > { %vm938_vm8 = vmor %vm936_vm6, %vm937_vm7 }
 0x390   : > { %v933_v20 = vsub.f32 1.0, %v932_v32 }
 0x392   : > { %v934_v53 = vmul.f32 %v1740_v63, %v933_v20 }
 0x394   : > { %v935_v17 = vadd.f32 %v1740_v63, %v934_v53 }
 0x396   : > { %v939_v25 = vsel %vm938_vm8, %v1740_v63, %v935_v17 }
 0x397   : > { %v944_v26 = vsel %vm941_vm9, %v943_v18, %v939_v25 }
 0x398   : > { %v947_v31 = vmul.f32 %v944_v26, %v2615_v37 }
 0x39a   : > { %1578 = vmatmul.f32.gmra.mxu3 %v947_v31 }
 0x3d2   : > { %v1461_v36 = vpop.f32.mrf.mxu2 }
 0x3d3   : > { %v1415_v47 = vpop.f32.mrf.mxu0 }
 0x3d4   : > { %v1438_v34 = vpop.f32.mrf.mxu1 }
 0x3d5   : > { %v1439_v4 = vadd.f32 %v1438_v34, %v1415_v47 }
 0x3d7   : > { %v1462_v59 = vadd.f32 %v1461_v36, %v1439_v4 }
 0x3de   : > { %v1484_v30 = vpop.f32.mrf.mxu3 }
 0x3df   : > { %v1485_v38 = vadd.f32 %v1484_v30, %v1462_v59 }
 0x3e4   : > { %v1464_v8 = vpop.f32.mrf.mxu2 }
 0x3e6   : > { %v1418_v35 = vpop.f32.mrf.mxu0  ;;  %v1441_v54 = vpop.f32.mrf.mxu1 }
 0x3e7   : > { %v1442_v57 = vadd.f32 %v1441_v54, %v1418_v35 }
 0x3e9   : > { %v1465_v61 = vadd.f32 %v1464_v8, %v1442_v57 }
 0x3ef   : > { %v1507_v12 = vpop.f32.mrf.mxu0 }
 0x3f0   : > { %v1508_v42 = vadd.f32 %v1507_v12, %v1485_v38 }
 0x3f1   : > { %v1487_v49 = vpop.f32.mrf.mxu3 }
 0x3f2   : > { %v1488_v1 = vadd.f32 %v1487_v49, %v1465_v61 }
 0x3f6   : > { %v1530_v50 = vpop.f32.mrf.mxu1 }
 0x3f7   : > { %v1531_v21 = vadd.f32 %v1530_v50, %v1508_v42 }
 0x3fc   : > { %v1553_v52 = vpop.f32.mrf.mxu2 }
 0x3fd   : > { %v1554_v55 = vadd.f32 %v1553_v52, %v1531_v21  ;;  %v1510_v62 = vpop.f32.mrf.mxu0 }
 0x3fe   : > { %v1511_v5 = vadd.f32 %v1510_v62, %v1488_v1 }
 0x404   : > { %v1533_v6 = vpop.f32.mrf.mxu1 }
 0x405   : > { %v1534_v9 = vadd.f32 %v1533_v6, %v1511_v5 }
 0x40c   : > { %v1556_v7 = vpop.f32.mrf.mxu2 }
 0x40d   : > { %v1557_v44 = vadd.f32 %v1556_v7, %v1534_v9 }
 0x40f   : > { %v1576_v37 = vpop.f32.mrf.mxu3 }
 0x410   : > { %v1577_v56 = vadd.f32 %v1576_v37, %v1554_v55 }
 0x412   : > { %1582 = vst [vmem:[%s2848_s10] sm:$0xff] %v1577_v56 }
 0x41d   : > { %v1579_v10 = vpop.f32.mrf.mxu3 }
 0x41e   : > { %v1580_v13 = vadd.f32 %v1579_v10, %v1557_v44 }
 0x420   : > { %1583 = vst [vmem:[%s2848_s10 + $0x8] sm:$0xff] %v1580_v13 }
 0x421 PF: > { %s21_s13 = sadd.s32 1, %s1781_s13  }
 0x422   : > { %p18_p10 = scmp.ge.s32.totalorder %s21_s13, 4  }
 0x424   :  { %20 = sbr.rel (!%p18_p10) target bundleno = 1 (0x1), region = 105 }
 0x429   :  { %1595 = vsyncpa [#allocation5], 1 }
 0x42a   :  { %1597 = vsyncpa [#allocation5 + $0x1], 1 }

</bundles_post_ra>
